<compile_context>
chip_gen: v6e
topology: v6e:2x2x1
jax: 0.10.0
libtpu: 0.0.40
codegen_flags: <defaults>
</compile_context>

<pallas_src>
import math

import jax
import jax.numpy as jnp
from jax.experimental import pallas as pl
from jax.experimental.pallas import tpu as pltpu


def _make_transformer_block_kernel(n_heads, d_model, batch_block, seq, eps):
    d_k = d_model // n_heads
    scale = 1.0 / math.sqrt(d_k)
    M = batch_block * seq
    inv_nm1 = 1.0 / (d_model - 1)

    def kernel(x_ref, mask_ref,
               ln1_a_ref, ln1_b_ref,
               wqkv_ref, bqkv_ref, wo_ref, bo_ref,
               ln2_a_ref, ln2_b_ref,
               w1_ref, b1_ref, w2_ref, b2_ref,
               o_ref):
        # x block: (Bt, S, D) f32 -> flatten batch into the matmul M dimension.
        x = x_ref[...].reshape(M, d_model)

        def layer_norm(v, a_ref, b_ref):
            # PyTorch: a_2 * (x - mean) / (std + eps) + b_2, std unbiased (N-1)
            mean = jnp.mean(v, axis=-1, keepdims=True)
            c = v - mean
            var = jnp.sum(c * c, axis=-1, keepdims=True) * inv_nm1
            inv = pl.reciprocal(jnp.sqrt(var) + eps, approx=True)
            return a_ref[...] * c * inv + b_ref[...]

        # ---- sublayer 0: x + self_attn(norm(x)) -----------------------------
        h = layer_norm(x, ln1_a_ref, ln1_b_ref).astype(jnp.bfloat16)

        # Fused QKV projection: one (M, D) x (D, 3D) matmul, f32 accumulation.
        qkv = jnp.dot(h, wqkv_ref[...],
                      preferred_element_type=jnp.float32) + bqkv_ref[...]
        # 128-aligned lane slices; fold the 1/sqrt(d_k) scale into q once.
        q = (qkv[:, :d_model] * scale).reshape(
            batch_block, seq, d_model).astype(jnp.bfloat16)
        k = qkv[:, d_model:2 * d_model].reshape(
            batch_block, seq, d_model).astype(jnp.bfloat16)
        v = qkv[:, 2 * d_model:].reshape(
            batch_block, seq, d_model).astype(jnp.bfloat16)

        # Additive mask bias, computed once and shared across heads.
        bias = jnp.where(mask_ref[...] != 0, 0.0, -1e9).astype(jnp.float32)

        # Per-head attention; accumulate directly through the matching W_o
        # row-slice (no concat, small live set).
        acc = None
        for hd in range(n_heads):
            sl = slice(hd * d_k, (hd + 1) * d_k)
            s = jnp.einsum('bqd,bkd->bqk', q[..., sl], k[..., sl],
                           preferred_element_type=jnp.float32) + bias
            s = s - jnp.max(s, axis=-1, keepdims=True)
            p = jnp.exp(s)
            p = p * pl.reciprocal(jnp.sum(p, axis=-1, keepdims=True),
                                  approx=True)
            ctx = jnp.einsum('bqk,bkd->bqd', p.astype(jnp.bfloat16), v[..., sl],
                             preferred_element_type=jnp.float32)
            part = jnp.dot(ctx.reshape(M, d_k).astype(jnp.bfloat16),
                           wo_ref[sl, :], preferred_element_type=jnp.float32)
            acc = part if acc is None else acc + part

        x = x + acc + bo_ref[...]        # dropout = identity

        # ---- sublayer 1: x + feed_forward(norm(x)) --------------------------
        h = layer_norm(x, ln2_a_ref, ln2_b_ref).astype(jnp.bfloat16)
        ff = jnp.maximum(
            jnp.dot(h, w1_ref[...], preferred_element_type=jnp.float32)
            + b1_ref[...], 0.0)
        ff = jnp.dot(ff.astype(jnp.bfloat16), w2_ref[...],
                     preferred_element_type=jnp.float32) + b2_ref[...]
        out = x + ff                      # dropout = identity
        o_ref[...] = out.reshape(batch_block, seq, d_model).astype(o_ref.dtype)

    return kernel


def transformer_block_forward(x, mask, params, *, n_heads, eps=1e-6,
                              batch_block=None):
    """x: (batch, seq, d_model) f32; mask: (batch, seq, seq) int32.

    batch_block: batch rows folded into one program.  Default = whole batch
    (best on 1-TC v5e/v6e); pick batch_block = B // 2 on v7x to use both TCs.
    """
    B, S, D = x.shape
    if batch_block is None:
        batch_block = B
    assert B % batch_block == 0
    grid_b = B // batch_block
    d_ff = params["w1"].shape[1]

    f32, bf16 = jnp.float32, jnp.bfloat16
    # Pack Q/K/V weights into one (D, 3D) matrix; pre-cast matmul weights to
    # bf16 (biases and LayerNorm params stay f32 for exact epilogues).
    wqkv = jnp.concatenate(
        [params["wq"], params["wk"], params["wv"]], axis=1).astype(bf16)
    bqkv = jnp.concatenate(
        [params["bq"], params["bk"], params["bv"]], axis=1).astype(f32)
    weights = [
        params["ln1_a"].astype(f32), params["ln1_b"].astype(f32),
        wqkv, bqkv,
        params["wo"].astype(bf16), params["bo"].astype(f32),
        params["ln2_a"].astype(f32), params["ln2_b"].astype(f32),
        params["w1"].astype(bf16), params["b1"].astype(f32),
        params["w2"].astype(bf16), params["b2"].astype(f32),
    ]

    def full_spec(a):
        zeros = (0,) * a.ndim
        return pl.BlockSpec(a.shape, lambda b, _z=zeros: _z)

    in_specs = [
        pl.BlockSpec((batch_block, S, D), lambda b: (b, 0, 0)),   # x
        pl.BlockSpec((batch_block, S, S), lambda b: (b, 0, 0)),   # mask
    ] + [full_spec(a) for a in weights]                           # weights
    out_specs = pl.BlockSpec((batch_block, S, D), lambda b: (b, 0, 0))

    kernel = _make_transformer_block_kernel(
        n_heads=n_heads, d_model=D, batch_block=batch_block, seq=S, eps=eps)

    # Advisory cost estimate for the XLA scheduler.
    flops = B * (2 * S * D * 3 * D        # fused qkv projection
                 + 4 * S * S * D          # scores + probs@V across heads
                 + 2 * S * D * D          # output projection
                 + 4 * S * D * d_ff)      # FFN
    bytes_accessed = (x.size * 4 + mask.size * 4
                      + sum(int(w.size) * w.dtype.itemsize for w in weights)
                      + B * S * D * 4)
    cost = pl.CostEstimate(flops=int(flops),
                           transcendentals=int(B * n_heads * S * S),
                           bytes_accessed=int(bytes_accessed))

    return pl.pallas_call(
        kernel,
        out_shape=jax.ShapeDtypeStruct((B, S, D), x.dtype),
        grid_spec=pltpu.PrefetchScalarGridSpec(
            num_scalar_prefetch=0,
            grid=(grid_b,),
            in_specs=in_specs,
            out_specs=out_specs,
        ),
        compiler_params=pltpu.CompilerParams(
            dimension_semantics=("parallel",),   # batch blocks independent
        ),
        cost_estimate=cost,
    )(x, mask, *weights)


def init_params(key, *, d_model, d_ff):
    """Deterministic init mirroring nn.Linear defaults; LayerNorm = (ones, zeros)."""
    ks = jax.random.split(key, 6)

    def linear(k, fan_in, fan_out):
        bound = 1.0 / math.sqrt(fan_in)
        kw, kb = jax.random.split(k)
        # stored transposed: (in, out) so the kernel does x @ W
        w = jax.random.uniform(kw, (fan_in, fan_out), jnp.float32, -bound, bound)
        b = jax.random.uniform(kb, (1, fan_out), jnp.float32, -bound, bound)
        return w, b

    wq, bq = linear(ks[0], d_model, d_model)
    wk, bk = linear(ks[1], d_model, d_model)
    wv, bv = linear(ks[2], d_model, d_model)
    wo, bo = linear(ks[3], d_model, d_model)
    w1, b1 = linear(ks[4], d_model, d_ff)
    w2, b2 = linear(ks[5], d_ff, d_model)

    return {
        "ln1_a": jnp.ones((1, d_model), jnp.float32),
        "ln1_b": jnp.zeros((1, d_model), jnp.float32),
        "ln2_a": jnp.ones((1, d_model), jnp.float32),
        "ln2_b": jnp.zeros((1, d_model), jnp.float32),
        "wq": wq, "bq": bq, "wk": wk, "bk": bk, "wv": wv, "bv": bv,
        "wo": wo, "bo": bo, "w1": w1, "b1": b1, "w2": w2, "b2": b2,
    }


def transformer_block_ref(x, mask, p, *, n_heads, eps=1e-6):
    """Pure-JAX f32 reference matching the PyTorch module (dropout = identity)."""
    B, S, D = x.shape
    d_k = D // n_heads

    def layer_norm(v, a, b):
        mean = v.mean(-1, keepdims=True)
        var = ((v - mean) ** 2).sum(-1, keepdims=True) / (D - 1)   # unbiased std
        std = jnp.sqrt(var)
        return a * (v - mean) / (std + eps) + b

    # sublayer 0: x + self_attn(norm(x), norm(x), norm(x), mask)
    h = layer_norm(x, p["ln1_a"], p["ln1_b"])
    q = h @ p["wq"] + p["bq"]
    k = h @ p["wk"] + p["bk"]
    v = h @ p["wv"] + p["bv"]

    def split(t):
        return t.reshape(B, S, n_heads, d_k).transpose(0, 2, 1, 3)

    qh, kh, vh = split(q), split(k), split(v)
    scores = jnp.einsum("bhqd,bhkd->bhqk", qh, kh) / math.sqrt(d_k)
    scores = jnp.where(mask[:, None, :, :] != 0, scores, -1e9)
    probs = jax.nn.softmax(scores, axis=-1)
    attn = jnp.einsum("bhqk,bhkd->bhqd", probs, vh)
    attn = attn.transpose(0, 2, 1, 3).reshape(B, S, D)
    attn = attn @ p["wo"] + p["bo"]
    x = x + attn

    # sublayer 1: x + feed_forward(norm(x))
    h = layer_norm(x, p["ln2_a"], p["ln2_b"])
    ff = jnp.maximum(h @ p["w1"] + p["b1"], 0.0) @ p["w2"] + p["b2"]
    return x + ff


if __name__ == "__main__":
    # Small but TPU-aligned shapes (lane-dense: d_model=128, d_ff=256).
    BATCH, SEQ, D_MODEL, N_HEADS, D_FF = 2, 64, 128, 4, 256

    key = jax.random.PRNGKey(0)
    kp, kx = jax.random.split(key)

    params = init_params(kp, d_model=D_MODEL, d_ff=D_FF)
    x = jax.random.normal(kx, (BATCH, SEQ, D_MODEL), jnp.float32)

    # Causal ("subsequent") mask, broadcast over heads inside the kernel.
    causal = jnp.tril(jnp.ones((SEQ, SEQ), jnp.int32))
    mask = jnp.tile(causal[None, :, :], (BATCH, 1, 1)).astype(jnp.int32)

    out = transformer_block_forward(x, mask, params, n_heads=N_HEADS)
    jax.block_until_ready(out)

    ref = transformer_block_ref(x, mask, params, n_heads=N_HEADS)
    assert out.shape == (BATCH, SEQ, D_MODEL)

    # bf16 MXU inputs + approx-reciprocal softmax/LayerNorm vs. the pure-f32
    # reference: tolerate small numeric drift, still catches real bugs.
    err_max = float(jnp.max(jnp.abs(out - ref)))
    err_mean = float(jnp.mean(jnp.abs(out - ref)))
    assert err_max < 1e-1 and err_mean < 1e-2, (err_max, err_mean)

    print("KERNEL_OK")
</pallas_src>

<mosaic_0001>
module attributes {stable_mosaic.version = 11 : i64} {
  func.func @kernel(%arg0: i32, %arg1: memref<2x64x128xf32, #tpu.memory_space<vmem>>, %arg2: memref<2x64x64xi32, #tpu.memory_space<vmem>>, %arg3: memref<1x128xf32, #tpu.memory_space<vmem>>, %arg4: memref<1x128xf32, #tpu.memory_space<vmem>>, %arg5: memref<128x384xbf16, #tpu.memory_space<vmem>>, %arg6: memref<1x384xf32, #tpu.memory_space<vmem>>, %arg7: memref<128x128xbf16, #tpu.memory_space<vmem>>, %arg8: memref<1x128xf32, #tpu.memory_space<vmem>>, %arg9: memref<1x128xf32, #tpu.memory_space<vmem>>, %arg10: memref<1x128xf32, #tpu.memory_space<vmem>>, %arg11: memref<128x256xbf16, #tpu.memory_space<vmem>>, %arg12: memref<1x256xf32, #tpu.memory_space<vmem>>, %arg13: memref<256x128xbf16, #tpu.memory_space<vmem>>, %arg14: memref<1x128xf32, #tpu.memory_space<vmem>>, %arg15: memref<2x64x128xf32, #tpu.memory_space<vmem>>) attributes {dimension_semantics = [#tpu.dimension_semantics<parallel>], iteration_bounds = array<i64: 1>, scalar_prefetch = 0 : i64, scratch_operands = 0 : i64, tpu.core_type = #tpu.core_type<tc>, window_params = [{transform_indices = @transform_0, window_bounds = array<i64: 2, 64, 128>}, {transform_indices = @transform_1, window_bounds = array<i64: 2, 64, 64>}, {pipeline_mode = #tpu.pipeline_mode<synchronous>, transform_indices = @transform_2, window_bounds = array<i64: 1, 128>}, {pipeline_mode = #tpu.pipeline_mode<synchronous>, transform_indices = @transform_3, window_bounds = array<i64: 1, 128>}, {pipeline_mode = #tpu.pipeline_mode<synchronous>, transform_indices = @transform_4, window_bounds = array<i64: 128, 384>}, {pipeline_mode = #tpu.pipeline_mode<synchronous>, transform_indices = @transform_5, window_bounds = array<i64: 1, 384>}, {pipeline_mode = #tpu.pipeline_mode<synchronous>, transform_indices = @transform_6, window_bounds = array<i64: 128, 128>}, {pipeline_mode = #tpu.pipeline_mode<synchronous>, transform_indices = @transform_7, window_bounds = array<i64: 1, 128>}, {pipeline_mode = #tpu.pipeline_mode<synchronous>, transform_indices = @transform_8, window_bounds = array<i64: 1, 128>}, {pipeline_mode = #tpu.pipeline_mode<synchronous>, transform_indices = @transform_9, window_bounds = array<i64: 1, 128>}, {pipeline_mode = #tpu.pipeline_mode<synchronous>, transform_indices = @transform_10, window_bounds = array<i64: 128, 256>}, {pipeline_mode = #tpu.pipeline_mode<synchronous>, transform_indices = @transform_11, window_bounds = array<i64: 1, 256>}, {pipeline_mode = #tpu.pipeline_mode<synchronous>, transform_indices = @transform_12, window_bounds = array<i64: 256, 128>}, {pipeline_mode = #tpu.pipeline_mode<synchronous>, transform_indices = @transform_13, window_bounds = array<i64: 1, 128>}, {transform_indices = @transform_14, window_bounds = array<i64: 2, 64, 128>}]} {
    %c0 = arith.constant 0 : index
    %c0_0 = arith.constant 0 : index
    %c0_1 = arith.constant 0 : index
    %0 = vector.load %arg1[%c0, %c0_0, %c0_1] : memref<2x64x128xf32, #tpu.memory_space<vmem>>, vector<2x64x128xf32>
    %1 = vector.shape_cast %0 : vector<2x64x128xf32> to vector<128x128xf32>
    %cst = arith.constant dense<0.000000e+00> : vector<128xf32>
    %2 = vector.multi_reduction <add>, %1, %cst [1] : vector<128x128xf32> to vector<128xf32>
    %3 = vector.shape_cast %2 : vector<128xf32> to vector<128x1xf32>
    %cst_2 = arith.constant 1.280000e+02 : f32
    %4 = vector.broadcast %cst_2 : f32 to vector<128x1xf32>
    %5 = arith.divf %3, %4 : vector<128x1xf32>
    %6 = vector.broadcast %5 : vector<128x1xf32> to vector<128x128xf32>
    %7 = arith.subf %1, %6 : vector<128x128xf32>
    %8 = arith.mulf %7, %7 : vector<128x128xf32>
    %cst_3 = arith.constant dense<0.000000e+00> : vector<128xf32>
    %9 = vector.multi_reduction <add>, %8, %cst_3 [1] : vector<128x128xf32> to vector<128xf32>
    %10 = vector.shape_cast %9 : vector<128xf32> to vector<128x1xf32>
    %cst_4 = arith.constant 0.00787401571 : f32
    %11 = vector.broadcast %cst_4 : f32 to vector<128x1xf32>
    %12 = arith.mulf %10, %11 : vector<128x1xf32>
    %13 = math.sqrt %12 : vector<128x1xf32>
    %cst_5 = arith.constant 9.99999997E-7 : f32
    %14 = vector.broadcast %cst_5 : f32 to vector<128x1xf32>
    %15 = arith.addf %13, %14 : vector<128x1xf32>
    %16 = tpu.reciprocal %15 {approx = true} : vector<128x1xf32> -> vector<128x1xf32>
    %c0_6 = arith.constant 0 : index
    %c0_7 = arith.constant 0 : index
    %17 = vector.load %arg3[%c0_6, %c0_7] : memref<1x128xf32, #tpu.memory_space<vmem>>, vector<1x128xf32>
    %18 = vector.broadcast %17 : vector<1x128xf32> to vector<128x128xf32>
    %19 = arith.mulf %18, %7 : vector<128x128xf32>
    %20 = vector.broadcast %16 : vector<128x1xf32> to vector<128x128xf32>
    %21 = arith.mulf %19, %20 : vector<128x128xf32>
    %c0_8 = arith.constant 0 : index
    %c0_9 = arith.constant 0 : index
    %22 = vector.load %arg4[%c0_8, %c0_9] : memref<1x128xf32, #tpu.memory_space<vmem>>, vector<1x128xf32>
    %23 = vector.broadcast %22 : vector<1x128xf32> to vector<128x128xf32>
    %24 = arith.addf %21, %23 : vector<128x128xf32>
    %25 = arith.truncf %24 : vector<128x128xf32> to vector<128x128xbf16>
    %c0_10 = arith.constant 0 : index
    %c0_11 = arith.constant 0 : index
    %26 = vector.load %arg5[%c0_10, %c0_11] : memref<128x384xbf16, #tpu.memory_space<vmem>>, vector<128x384xbf16>
    %cst_12 = arith.constant dense<0.000000e+00> : vector<128x384xf32>
    %27 = tpu.matmul %25, %26, %cst_12 {dimension_numbers = #tpu.dot_dimension_numbers<[1], [0], [0], [1], [0, 0, 1, 1], [], []>} : vector<128x128xbf16>, vector<128x384xbf16>, vector<128x384xf32> -> vector<128x384xf32>
    %c0_13 = arith.constant 0 : index
    %c0_14 = arith.constant 0 : index
    %28 = vector.load %arg6[%c0_13, %c0_14] : memref<1x384xf32, #tpu.memory_space<vmem>>, vector<1x384xf32>
    %29 = vector.broadcast %28 : vector<1x384xf32> to vector<128x384xf32>
    %30 = arith.addf %27, %29 : vector<128x384xf32>
    %31 = vector.extract_strided_slice %30 {offsets = [0, 0], sizes = [128, 128], strides = [1, 1]} : vector<128x384xf32> to vector<128x128xf32>
    %cst_15 = arith.constant 0.176776692 : f32
    %32 = vector.broadcast %cst_15 : f32 to vector<128x128xf32>
    %33 = arith.mulf %31, %32 : vector<128x128xf32>
    %34 = vector.shape_cast %33 : vector<128x128xf32> to vector<2x64x128xf32>
    %35 = arith.truncf %34 : vector<2x64x128xf32> to vector<2x64x128xbf16>
    %36 = vector.extract_strided_slice %30 {offsets = [0, 128], sizes = [128, 128], strides = [1, 1]} : vector<128x384xf32> to vector<128x128xf32>
    %37 = vector.shape_cast %36 : vector<128x128xf32> to vector<2x64x128xf32>
    %38 = arith.truncf %37 : vector<2x64x128xf32> to vector<2x64x128xbf16>
    %39 = vector.extract_strided_slice %30 {offsets = [0, 256], sizes = [128, 128], strides = [1, 1]} : vector<128x384xf32> to vector<128x128xf32>
    %40 = vector.shape_cast %39 : vector<128x128xf32> to vector<2x64x128xf32>
    %41 = arith.truncf %40 : vector<2x64x128xf32> to vector<2x64x128xbf16>
    %c0_16 = arith.constant 0 : index
    %c0_17 = arith.constant 0 : index
    %c0_18 = arith.constant 0 : index
    %42 = vector.load %arg2[%c0_16, %c0_17, %c0_18] : memref<2x64x64xi32, #tpu.memory_space<vmem>>, vector<2x64x64xi32>
    %c0_i32 = arith.constant 0 : i32
    %43 = vector.broadcast %c0_i32 : i32 to vector<2x64x64xi32>
    %44 = arith.cmpi ne, %42, %43 : vector<2x64x64xi32>
    %cst_19 = arith.constant 0.000000e+00 : f32
    %cst_20 = arith.constant -1.000000e+09 : f32
    %45 = vector.broadcast %cst_19 : f32 to vector<2x64x64xf32>
    %46 = vector.broadcast %cst_20 : f32 to vector<2x64x64xf32>
    %47 = arith.select %44, %45, %46 : vector<2x64x64xi1>, vector<2x64x64xf32>
    %48 = vector.extract_strided_slice %35 {offsets = [0, 0, 0], sizes = [2, 64, 32], strides = [1, 1, 1]} : vector<2x64x128xbf16> to vector<2x64x32xbf16>
    %49 = vector.extract_strided_slice %38 {offsets = [0, 0, 0], sizes = [2, 64, 32], strides = [1, 1, 1]} : vector<2x64x128xbf16> to vector<2x64x32xbf16>
    "tpu.trace_start"() <{level = 10 : i32, message = "bqd,bkd->bqk"}> : () -> ()
    %cst_21 = arith.constant dense<0.000000e+00> : vector<2x64x64xf32>
    %50 = tpu.matmul %48, %49, %cst_21 {dimension_numbers = #tpu.dot_dimension_numbers<[2], [2], [1], [1], [0, 0, 0, 1, 1, 1], [0], [0]>} : vector<2x64x32xbf16>, vector<2x64x32xbf16>, vector<2x64x64xf32> -> vector<2x64x64xf32>
    "tpu.trace_stop"() : () -> ()
    %51 = arith.addf %50, %47 : vector<2x64x64xf32>
    %cst_22 = arith.constant dense<0xFF800000> : vector<2x64xf32>
    %52 = vector.multi_reduction <maximumf>, %51, %cst_22 [2] : vector<2x64x64xf32> to vector<2x64xf32>
    %53 = vector.shape_cast %52 : vector<2x64xf32> to vector<2x64x1xf32>
    %54 = vector.broadcast %53 : vector<2x64x1xf32> to vector<2x64x64xf32>
    %55 = arith.subf %51, %54 : vector<2x64x64xf32>
    %56 = math.exp %55 : vector<2x64x64xf32>
    %cst_23 = arith.constant dense<0.000000e+00> : vector<2x64xf32>
    %57 = vector.multi_reduction <add>, %56, %cst_23 [2] : vector<2x64x64xf32> to vector<2x64xf32>
    %58 = vector.shape_cast %57 : vector<2x64xf32> to vector<2x64x1xf32>
    %59 = tpu.reciprocal %58 {approx = true} : vector<2x64x1xf32> -> vector<2x64x1xf32>
    %60 = vector.broadcast %59 : vector<2x64x1xf32> to vector<2x64x64xf32>
    %61 = arith.mulf %56, %60 : vector<2x64x64xf32>
    %62 = arith.truncf %61 : vector<2x64x64xf32> to vector<2x64x64xbf16>
    %63 = vector.extract_strided_slice %41 {offsets = [0, 0, 0], sizes = [2, 64, 32], strides = [1, 1, 1]} : vector<2x64x128xbf16> to vector<2x64x32xbf16>
    "tpu.trace_start"() <{level = 10 : i32, message = "bqk,bkd->bqd"}> : () -> ()
    %cst_24 = arith.constant dense<0.000000e+00> : vector<2x64x32xf32>
    %64 = tpu.matmul %62, %63, %cst_24 {dimension_numbers = #tpu.dot_dimension_numbers<[2], [1], [1], [2], [0, 0, 0, 1, 1, 2], [0], [0]>} : vector<2x64x64xbf16>, vector<2x64x32xbf16>, vector<2x64x32xf32> -> vector<2x64x32xf32>
    "tpu.trace_stop"() : () -> ()
    %65 = vector.shape_cast %64 : vector<2x64x32xf32> to vector<128x32xf32>
    %66 = arith.truncf %65 : vector<128x32xf32> to vector<128x32xbf16>
    %c0_25 = arith.constant 0 : index
    %c0_26 = arith.constant 0 : index
    %67 = vector.load %arg7[%c0_25, %c0_26] : memref<128x128xbf16, #tpu.memory_space<vmem>>, vector<32x128xbf16>
    %cst_27 = arith.constant dense<0.000000e+00> : vector<128x128xf32>
    %68 = tpu.matmul %66, %67, %cst_27 {dimension_numbers = #tpu.dot_dimension_numbers<[1], [0], [0], [1], [0, 0, 1, 1], [], []>} : vector<128x32xbf16>, vector<32x128xbf16>, vector<128x128xf32> -> vector<128x128xf32>
    %69 = vector.extract_strided_slice %35 {offsets = [0, 0, 32], sizes = [2, 64, 32], strides = [1, 1, 1]} : vector<2x64x128xbf16> to vector<2x64x32xbf16>
    %70 = vector.extract_strided_slice %38 {offsets = [0, 0, 32], sizes = [2, 64, 32], strides = [1, 1, 1]} : vector<2x64x128xbf16> to vector<2x64x32xbf16>
    "tpu.trace_start"() <{level = 10 : i32, message = "bqd,bkd->bqk"}> : () -> ()
    %cst_28 = arith.constant dense<0.000000e+00> : vector<2x64x64xf32>
    %71 = tpu.matmul %69, %70, %cst_28 {dimension_numbers = #tpu.dot_dimension_numbers<[2], [2], [1], [1], [0, 0, 0, 1, 1, 1], [0], [0]>} : vector<2x64x32xbf16>, vector<2x64x32xbf16>, vector<2x64x64xf32> -> vector<2x64x64xf32>
    "tpu.trace_stop"() : () -> ()
    %72 = arith.addf %71, %47 : vector<2x64x64xf32>
    %cst_29 = arith.constant dense<0xFF800000> : vector<2x64xf32>
    %73 = vector.multi_reduction <maximumf>, %72, %cst_29 [2] : vector<2x64x64xf32> to vector<2x64xf32>
    %74 = vector.shape_cast %73 : vector<2x64xf32> to vector<2x64x1xf32>
    %75 = vector.broadcast %74 : vector<2x64x1xf32> to vector<2x64x64xf32>
    %76 = arith.subf %72, %75 : vector<2x64x64xf32>
    %77 = math.exp %76 : vector<2x64x64xf32>
    %cst_30 = arith.constant dense<0.000000e+00> : vector<2x64xf32>
    %78 = vector.multi_reduction <add>, %77, %cst_30 [2] : vector<2x64x64xf32> to vector<2x64xf32>
    %79 = vector.shape_cast %78 : vector<2x64xf32> to vector<2x64x1xf32>
    %80 = tpu.reciprocal %79 {approx = true} : vector<2x64x1xf32> -> vector<2x64x1xf32>
    %81 = vector.broadcast %80 : vector<2x64x1xf32> to vector<2x64x64xf32>
    %82 = arith.mulf %77, %81 : vector<2x64x64xf32>
    %83 = arith.truncf %82 : vector<2x64x64xf32> to vector<2x64x64xbf16>
    %84 = vector.extract_strided_slice %41 {offsets = [0, 0, 32], sizes = [2, 64, 32], strides = [1, 1, 1]} : vector<2x64x128xbf16> to vector<2x64x32xbf16>
    "tpu.trace_start"() <{level = 10 : i32, message = "bqk,bkd->bqd"}> : () -> ()
    %cst_31 = arith.constant dense<0.000000e+00> : vector<2x64x32xf32>
    %85 = tpu.matmul %83, %84, %cst_31 {dimension_numbers = #tpu.dot_dimension_numbers<[2], [1], [1], [2], [0, 0, 0, 1, 1, 2], [0], [0]>} : vector<2x64x64xbf16>, vector<2x64x32xbf16>, vector<2x64x32xf32> -> vector<2x64x32xf32>
    "tpu.trace_stop"() : () -> ()
    %86 = vector.shape_cast %85 : vector<2x64x32xf32> to vector<128x32xf32>
    %87 = arith.truncf %86 : vector<128x32xf32> to vector<128x32xbf16>
    %c32 = arith.constant 32 : index
    %c0_32 = arith.constant 0 : index
    %88 = vector.load %arg7[%c32, %c0_32] : memref<128x128xbf16, #tpu.memory_space<vmem>>, vector<32x128xbf16>
    %cst_33 = arith.constant dense<0.000000e+00> : vector<128x128xf32>
    %89 = tpu.matmul %87, %88, %cst_33 {dimension_numbers = #tpu.dot_dimension_numbers<[1], [0], [0], [1], [0, 0, 1, 1], [], []>} : vector<128x32xbf16>, vector<32x128xbf16>, vector<128x128xf32> -> vector<128x128xf32>
    %90 = arith.addf %68, %89 : vector<128x128xf32>
    %91 = vector.extract_strided_slice %35 {offsets = [0, 0, 64], sizes = [2, 64, 32], strides = [1, 1, 1]} : vector<2x64x128xbf16> to vector<2x64x32xbf16>
    %92 = vector.extract_strided_slice %38 {offsets = [0, 0, 64], sizes = [2, 64, 32], strides = [1, 1, 1]} : vector<2x64x128xbf16> to vector<2x64x32xbf16>
    "tpu.trace_start"() <{level = 10 : i32, message = "bqd,bkd->bqk"}> : () -> ()
    %cst_34 = arith.constant dense<0.000000e+00> : vector<2x64x64xf32>
    %93 = tpu.matmul %91, %92, %cst_34 {dimension_numbers = #tpu.dot_dimension_numbers<[2], [2], [1], [1], [0, 0, 0, 1, 1, 1], [0], [0]>} : vector<2x64x32xbf16>, vector<2x64x32xbf16>, vector<2x64x64xf32> -> vector<2x64x64xf32>
    "tpu.trace_stop"() : () -> ()
    %94 = arith.addf %93, %47 : vector<2x64x64xf32>
    %cst_35 = arith.constant dense<0xFF800000> : vector<2x64xf32>
    %95 = vector.multi_reduction <maximumf>, %94, %cst_35 [2] : vector<2x64x64xf32> to vector<2x64xf32>
    %96 = vector.shape_cast %95 : vector<2x64xf32> to vector<2x64x1xf32>
    %97 = vector.broadcast %96 : vector<2x64x1xf32> to vector<2x64x64xf32>
    %98 = arith.subf %94, %97 : vector<2x64x64xf32>
    %99 = math.exp %98 : vector<2x64x64xf32>
    %cst_36 = arith.constant dense<0.000000e+00> : vector<2x64xf32>
    %100 = vector.multi_reduction <add>, %99, %cst_36 [2] : vector<2x64x64xf32> to vector<2x64xf32>
    %101 = vector.shape_cast %100 : vector<2x64xf32> to vector<2x64x1xf32>
    %102 = tpu.reciprocal %101 {approx = true} : vector<2x64x1xf32> -> vector<2x64x1xf32>
    %103 = vector.broadcast %102 : vector<2x64x1xf32> to vector<2x64x64xf32>
    %104 = arith.mulf %99, %103 : vector<2x64x64xf32>
    %105 = arith.truncf %104 : vector<2x64x64xf32> to vector<2x64x64xbf16>
    %106 = vector.extract_strided_slice %41 {offsets = [0, 0, 64], sizes = [2, 64, 32], strides = [1, 1, 1]} : vector<2x64x128xbf16> to vector<2x64x32xbf16>
    "tpu.trace_start"() <{level = 10 : i32, message = "bqk,bkd->bqd"}> : () -> ()
    %cst_37 = arith.constant dense<0.000000e+00> : vector<2x64x32xf32>
    %107 = tpu.matmul %105, %106, %cst_37 {dimension_numbers = #tpu.dot_dimension_numbers<[2], [1], [1], [2], [0, 0, 0, 1, 1, 2], [0], [0]>} : vector<2x64x64xbf16>, vector<2x64x32xbf16>, vector<2x64x32xf32> -> vector<2x64x32xf32>
    "tpu.trace_stop"() : () -> ()
    %108 = vector.shape_cast %107 : vector<2x64x32xf32> to vector<128x32xf32>
    %109 = arith.truncf %108 : vector<128x32xf32> to vector<128x32xbf16>
    %c64 = arith.constant 64 : index
    %c0_38 = arith.constant 0 : index
    %110 = vector.load %arg7[%c64, %c0_38] : memref<128x128xbf16, #tpu.memory_space<vmem>>, vector<32x128xbf16>
    %cst_39 = arith.constant dense<0.000000e+00> : vector<128x128xf32>
    %111 = tpu.matmul %109, %110, %cst_39 {dimension_numbers = #tpu.dot_dimension_numbers<[1], [0], [0], [1], [0, 0, 1, 1], [], []>} : vector<128x32xbf16>, vector<32x128xbf16>, vector<128x128xf32> -> vector<128x128xf32>
    %112 = arith.addf %90, %111 : vector<128x128xf32>
    %113 = vector.extract_strided_slice %35 {offsets = [0, 0, 96], sizes = [2, 64, 32], strides = [1, 1, 1]} : vector<2x64x128xbf16> to vector<2x64x32xbf16>
    %114 = vector.extract_strided_slice %38 {offsets = [0, 0, 96], sizes = [2, 64, 32], strides = [1, 1, 1]} : vector<2x64x128xbf16> to vector<2x64x32xbf16>
    "tpu.trace_start"() <{level = 10 : i32, message = "bqd,bkd->bqk"}> : () -> ()
    %cst_40 = arith.constant dense<0.000000e+00> : vector<2x64x64xf32>
    %115 = tpu.matmul %113, %114, %cst_40 {dimension_numbers = #tpu.dot_dimension_numbers<[2], [2], [1], [1], [0, 0, 0, 1, 1, 1], [0], [0]>} : vector<2x64x32xbf16>, vector<2x64x32xbf16>, vector<2x64x64xf32> -> vector<2x64x64xf32>
    "tpu.trace_stop"() : () -> ()
    %116 = arith.addf %115, %47 : vector<2x64x64xf32>
    %cst_41 = arith.constant dense<0xFF800000> : vector<2x64xf32>
    %117 = vector.multi_reduction <maximumf>, %116, %cst_41 [2] : vector<2x64x64xf32> to vector<2x64xf32>
    %118 = vector.shape_cast %117 : vector<2x64xf32> to vector<2x64x1xf32>
    %119 = vector.broadcast %118 : vector<2x64x1xf32> to vector<2x64x64xf32>
    %120 = arith.subf %116, %119 : vector<2x64x64xf32>
    %121 = math.exp %120 : vector<2x64x64xf32>
    %cst_42 = arith.constant dense<0.000000e+00> : vector<2x64xf32>
    %122 = vector.multi_reduction <add>, %121, %cst_42 [2] : vector<2x64x64xf32> to vector<2x64xf32>
    %123 = vector.shape_cast %122 : vector<2x64xf32> to vector<2x64x1xf32>
    %124 = tpu.reciprocal %123 {approx = true} : vector<2x64x1xf32> -> vector<2x64x1xf32>
    %125 = vector.broadcast %124 : vector<2x64x1xf32> to vector<2x64x64xf32>
    %126 = arith.mulf %121, %125 : vector<2x64x64xf32>
    %127 = arith.truncf %126 : vector<2x64x64xf32> to vector<2x64x64xbf16>
    %128 = vector.extract_strided_slice %41 {offsets = [0, 0, 96], sizes = [2, 64, 32], strides = [1, 1, 1]} : vector<2x64x128xbf16> to vector<2x64x32xbf16>
    "tpu.trace_start"() <{level = 10 : i32, message = "bqk,bkd->bqd"}> : () -> ()
    %cst_43 = arith.constant dense<0.000000e+00> : vector<2x64x32xf32>
    %129 = tpu.matmul %127, %128, %cst_43 {dimension_numbers = #tpu.dot_dimension_numbers<[2], [1], [1], [2], [0, 0, 0, 1, 1, 2], [0], [0]>} : vector<2x64x64xbf16>, vector<2x64x32xbf16>, vector<2x64x32xf32> -> vector<2x64x32xf32>
    "tpu.trace_stop"() : () -> ()
    %130 = vector.shape_cast %129 : vector<2x64x32xf32> to vector<128x32xf32>
    %131 = arith.truncf %130 : vector<128x32xf32> to vector<128x32xbf16>
    %c96 = arith.constant 96 : index
    %c0_44 = arith.constant 0 : index
    %132 = vector.load %arg7[%c96, %c0_44] : memref<128x128xbf16, #tpu.memory_space<vmem>>, vector<32x128xbf16>
    %cst_45 = arith.constant dense<0.000000e+00> : vector<128x128xf32>
    %133 = tpu.matmul %131, %132, %cst_45 {dimension_numbers = #tpu.dot_dimension_numbers<[1], [0], [0], [1], [0, 0, 1, 1], [], []>} : vector<128x32xbf16>, vector<32x128xbf16>, vector<128x128xf32> -> vector<128x128xf32>
    %134 = arith.addf %112, %133 : vector<128x128xf32>
    %135 = arith.addf %1, %134 : vector<128x128xf32>
    %c0_46 = arith.constant 0 : index
    %c0_47 = arith.constant 0 : index
    %136 = vector.load %arg8[%c0_46, %c0_47] : memref<1x128xf32, #tpu.memory_space<vmem>>, vector<1x128xf32>
    %137 = vector.broadcast %136 : vector<1x128xf32> to vector<128x128xf32>
    %138 = arith.addf %135, %137 : vector<128x128xf32>
    %cst_48 = arith.constant dense<0.000000e+00> : vector<128xf32>
    %139 = vector.multi_reduction <add>, %138, %cst_48 [1] : vector<128x128xf32> to vector<128xf32>
    %140 = vector.shape_cast %139 : vector<128xf32> to vector<128x1xf32>
    %cst_49 = arith.constant 1.280000e+02 : f32
    %141 = vector.broadcast %cst_49 : f32 to vector<128x1xf32>
    %142 = arith.divf %140, %141 : vector<128x1xf32>
    %143 = vector.broadcast %142 : vector<128x1xf32> to vector<128x128xf32>
    %144 = arith.subf %138, %143 : vector<128x128xf32>
    %145 = arith.mulf %144, %144 : vector<128x128xf32>
    %cst_50 = arith.constant dense<0.000000e+00> : vector<128xf32>
    %146 = vector.multi_reduction <add>, %145, %cst_50 [1] : vector<128x128xf32> to vector<128xf32>
    %147 = vector.shape_cast %146 : vector<128xf32> to vector<128x1xf32>
    %cst_51 = arith.constant 0.00787401571 : f32
    %148 = vector.broadcast %cst_51 : f32 to vector<128x1xf32>
    %149 = arith.mulf %147, %148 : vector<128x1xf32>
    %150 = math.sqrt %149 : vector<128x1xf32>
    %cst_52 = arith.constant 9.99999997E-7 : f32
    %151 = vector.broadcast %cst_52 : f32 to vector<128x1xf32>
    %152 = arith.addf %150, %151 : vector<128x1xf32>
    %153 = tpu.reciprocal %152 {approx = true} : vector<128x1xf32> -> vector<128x1xf32>
    %c0_53 = arith.constant 0 : index
    %c0_54 = arith.constant 0 : index
    %154 = vector.load %arg9[%c0_53, %c0_54] : memref<1x128xf32, #tpu.memory_space<vmem>>, vector<1x128xf32>
    %155 = vector.broadcast %154 : vector<1x128xf32> to vector<128x128xf32>
    %156 = arith.mulf %155, %144 : vector<128x128xf32>
    %157 = vector.broadcast %153 : vector<128x1xf32> to vector<128x128xf32>
    %158 = arith.mulf %156, %157 : vector<128x128xf32>
    %c0_55 = arith.constant 0 : index
    %c0_56 = arith.constant 0 : index
    %159 = vector.load %arg10[%c0_55, %c0_56] : memref<1x128xf32, #tpu.memory_space<vmem>>, vector<1x128xf32>
    %160 = vector.broadcast %159 : vector<1x128xf32> to vector<128x128xf32>
    %161 = arith.addf %158, %160 : vector<128x128xf32>
    %162 = arith.truncf %161 : vector<128x128xf32> to vector<128x128xbf16>
    %c0_57 = arith.constant 0 : index
    %c0_58 = arith.constant 0 : index
    %163 = vector.load %arg11[%c0_57, %c0_58] : memref<128x256xbf16, #tpu.memory_space<vmem>>, vector<128x256xbf16>
    %cst_59 = arith.constant dense<0.000000e+00> : vector<128x256xf32>
    %164 = tpu.matmul %162, %163, %cst_59 {dimension_numbers = #tpu.dot_dimension_numbers<[1], [0], [0], [1], [0, 0, 1, 1], [], []>} : vector<128x128xbf16>, vector<128x256xbf16>, vector<128x256xf32> -> vector<128x256xf32>
    %c0_60 = arith.constant 0 : index
    %c0_61 = arith.constant 0 : index
    %165 = vector.load %arg12[%c0_60, %c0_61] : memref<1x256xf32, #tpu.memory_space<vmem>>, vector<1x256xf32>
    %166 = vector.broadcast %165 : vector<1x256xf32> to vector<128x256xf32>
    %167 = arith.addf %164, %166 : vector<128x256xf32>
    %cst_62 = arith.constant 0.000000e+00 : f32
    %168 = vector.broadcast %cst_62 : f32 to vector<128x256xf32>
    %169 = arith.maximumf %167, %168 : vector<128x256xf32>
    %170 = arith.truncf %169 : vector<128x256xf32> to vector<128x256xbf16>
    %c0_63 = arith.constant 0 : index
    %c0_64 = arith.constant 0 : index
    %171 = vector.load %arg13[%c0_63, %c0_64] : memref<256x128xbf16, #tpu.memory_space<vmem>>, vector<256x128xbf16>
    %cst_65 = arith.constant dense<0.000000e+00> : vector<128x128xf32>
    %172 = tpu.matmul %170, %171, %cst_65 {dimension_numbers = #tpu.dot_dimension_numbers<[1], [0], [0], [1], [0, 0, 1, 1], [], []>} : vector<128x256xbf16>, vector<256x128xbf16>, vector<128x128xf32> -> vector<128x128xf32>
    %c0_66 = arith.constant 0 : index
    %c0_67 = arith.constant 0 : index
    %173 = vector.load %arg14[%c0_66, %c0_67] : memref<1x128xf32, #tpu.memory_space<vmem>>, vector<1x128xf32>
    %174 = vector.broadcast %173 : vector<1x128xf32> to vector<128x128xf32>
    %175 = arith.addf %172, %174 : vector<128x128xf32>
    %176 = arith.addf %138, %175 : vector<128x128xf32>
    %177 = vector.shape_cast %176 : vector<128x128xf32> to vector<2x64x128xf32>
    %c0_68 = arith.constant 0 : index
    %c0_69 = arith.constant 0 : index
    %c0_70 = arith.constant 0 : index
    %178 = vector.load %arg15[%c0_68, %c0_69, %c0_70] : memref<2x64x128xf32, #tpu.memory_space<vmem>>, vector<2x64x128xf32>
    tpu.vector_store %arg15[%c0_68, %c0_69, %c0_70], %177 {strides = array<i32>} : memref<2x64x128xf32, #tpu.memory_space<vmem>>, vector<2x64x128xf32>,
    return
  }
  func.func @transform_0(%arg0: i32) -> (i32, i32, i32) {
    %c0_i32 = arith.constant 0 : i32
    %c0_i32_0 = arith.constant 0 : i32
    %c0_i32_1 = arith.constant 0 : i32
    return %arg0, %c0_i32, %c0_i32_0 : i32, i32, i32
  }
  func.func @transform_1(%arg0: i32) -> (i32, i32, i32) {
    %c0_i32 = arith.constant 0 : i32
    %c0_i32_0 = arith.constant 0 : i32
    %c0_i32_1 = arith.constant 0 : i32
    return %arg0, %c0_i32, %c0_i32_0 : i32, i32, i32
  }
  func.func @transform_2(%arg0: i32) -> (i32, i32) {
    %c0_i32 = arith.constant 0 : i32
    %c0_i32_0 = arith.constant 0 : i32
    %c0_i32_1 = arith.constant 0 : i32
    return %c0_i32, %c0_i32_0 : i32, i32
  }
  func.func @transform_3(%arg0: i32) -> (i32, i32) {
    %c0_i32 = arith.constant 0 : i32
    %c0_i32_0 = arith.constant 0 : i32
    %c0_i32_1 = arith.constant 0 : i32
    return %c0_i32, %c0_i32_0 : i32, i32
  }
  func.func @transform_4(%arg0: i32) -> (i32, i32) {
    %c0_i32 = arith.constant 0 : i32
    %c0_i32_0 = arith.constant 0 : i32
    %c0_i32_1 = arith.constant 0 : i32
    return %c0_i32, %c0_i32_0 : i32, i32
  }
  func.func @transform_5(%arg0: i32) -> (i32, i32) {
    %c0_i32 = arith.constant 0 : i32
    %c0_i32_0 = arith.constant 0 : i32
    %c0_i32_1 = arith.constant 0 : i32
    return %c0_i32, %c0_i32_0 : i32, i32
  }
  func.func @transform_6(%arg0: i32) -> (i32, i32) {
    %c0_i32 = arith.constant 0 : i32
    %c0_i32_0 = arith.constant 0 : i32
    %c0_i32_1 = arith.constant 0 : i32
    return %c0_i32, %c0_i32_0 : i32, i32
  }
  func.func @transform_7(%arg0: i32) -> (i32, i32) {
    %c0_i32 = arith.constant 0 : i32
    %c0_i32_0 = arith.constant 0 : i32
    %c0_i32_1 = arith.constant 0 : i32
    return %c0_i32, %c0_i32_0 : i32, i32
  }
  func.func @transform_8(%arg0: i32) -> (i32, i32) {
    %c0_i32 = arith.constant 0 : i32
    %c0_i32_0 = arith.constant 0 : i32
    %c0_i32_1 = arith.constant 0 : i32
    return %c0_i32, %c0_i32_0 : i32, i32
  }
  func.func @transform_9(%arg0: i32) -> (i32, i32) {
    %c0_i32 = arith.constant 0 : i32
    %c0_i32_0 = arith.constant 0 : i32
    %c0_i32_1 = arith.constant 0 : i32
    return %c0_i32, %c0_i32_0 : i32, i32
  }
  func.func @transform_10(%arg0: i32) -> (i32, i32) {
    %c0_i32 = arith.constant 0 : i32
    %c0_i32_0 = arith.constant 0 : i32
    %c0_i32_1 = arith.constant 0 : i32
    return %c0_i32, %c0_i32_0 : i32, i32
  }
  func.func @transform_11(%arg0: i32) -> (i32, i32) {
    %c0_i32 = arith.constant 0 : i32
    %c0_i32_0 = arith.constant 0 : i32
    %c0_i32_1 = arith.constant 0 : i32
    return %c0_i32, %c0_i32_0 : i32, i32
  }
  func.func @transform_12(%arg0: i32) -> (i32, i32) {
    %c0_i32 = arith.constant 0 : i32
    %c0_i32_0 = arith.constant 0 : i32
    %c0_i32_1 = arith.constant 0 : i32
    return %c0_i32, %c0_i32_0 : i32, i32
  }
  func.func @transform_13(%arg0: i32) -> (i32, i32) {
    %c0_i32 = arith.constant 0 : i32
    %c0_i32_0 = arith.constant 0 : i32
    %c0_i32_1 = arith.constant 0 : i32
    return %c0_i32, %c0_i32_0 : i32, i32
  }
  func.func @transform_14(%arg0: i32) -> (i32, i32, i32) {
    %c0_i32 = arith.constant 0 : i32
    %c0_i32_0 = arith.constant 0 : i32
    %c0_i32_1 = arith.constant 0 : i32
    return %arg0, %c0_i32, %c0_i32_0 : i32, i32, i32
  }
}

</mosaic_0001>

<bundles_post_ra>
// kernel: tpu_custom_call.1
= control target key start
LH: loop header
LB: loop body
LE: loop exit
PB: predicated region body
PF: predicated region fallthrough
CT: control target
= control target key end

     0   :  { %19 = vsyncpa [#allocation3], 0  ;;  %s8527_s0 = inlined_call_operand.hbm [shape: f32[2,64,128], index: 0, kind: input, shape index: {}]   ;;  %s8528_s1 = inlined_call_operand.hbm [shape: s32[2,64,64], index: 1, kind: input, shape index: {}]   ;;  %s8529_s2 = inlined_call_operand.hbm [shape: f32[1,128], index: 2, kind: input, shape index: {}]   ;;  %s8530_s3 = inlined_call_operand.hbm [shape: f32[1,128], index: 3, kind: input, shape index: {}]   ;;  %s8531_s4 = inlined_call_operand.hbm [shape: bf16[128,384], index: 4, kind: input, shape index: {}]   ;;  %s8532_s5 = inlined_call_operand.vmem [shape: f32[1,384], index: 5, kind: input, shape index: {}]   ;;  %s8533_s6 = inlined_call_operand.hbm [shape: bf16[128,128], index: 6, kind: input, shape index: {}]   ;;  %s8534_s7 = inlined_call_operand.vmem [shape: f32[1,128], index: 7, kind: input, shape index: {}]   ;;  %s8535_s8 = inlined_call_operand.vmem [shape: f32[1,128], index: 8, kind: input, shape index: {}]   ;;  %s8536_s9 = inlined_call_operand.vmem [shape: f32[1,128], index: 9, kind: input, shape index: {}]   ;;  %s8537_s10 = inlined_call_operand.hbm [shape: bf16[128,256], index: 10, kind: input, shape index: {}]   ;;  %s8538_s11 = inlined_call_operand.vmem [shape: f32[1,256], index: 11, kind: input, shape index: {}]   ;;  %s8539_s12 = inlined_call_operand.hbm [shape: bf16[256,128], index: 12, kind: input, shape index: {}]   ;;  %s8540_s13 = inlined_call_operand.vmem [shape: f32[1,128], index: 13, kind: input, shape index: {}]   ;;  %s8541_s14 = inlined_call_operand.hbm [shape: f32[2,64,128], index: 14, kind: output, shape index: {}]  }
   0x1   :  { %20 = vsyncpa [#allocation6], 0 }
   0x2   :  { %21 = vsyncpa [#allocation9], 0 }
   0x3   :  { %22 = vsyncpa [#allocation12], 0 }
   0x4   :  { %23 = vsyncpa [#allocation15], 0 }
   0x5   :  { %24 = vsyncpa [#allocation4], 0  ;;  %s6298_s29 = smov [#allocation5]   ;;  %s6299_s15 = smov [#allocation8]  }
   0x6   :  { %s42_s30 = sshll.u32 %s6298_s29, 4  ;;  %s65_s16 = sshll.u32 %s6299_s15, 4  ;;  %s43_s30 = int_to_ptr.vmem [resolvable:$true] %s42_s30  ;;  %s66_s16 = int_to_ptr.vmem [resolvable:$true] %s65_s16 }
   0x7   :  { %s6114_s17 = scalar_lea.vmem %s43_s30, 2048  ;;  %p6119_p1 = scmp.lt.s32.totalorder %s43_s30, %s43_s30 }
   0x8   :  { %p6115_p0 = scmp.ne.s32.totalorder %s43_s30, %s6114_s17  ;;  %p6120_p2 = scmp.lt.s32.totalorder %s6114_s17, %s6114_s17 }
   0xa   :  { %p6121_p3 = por %p6120_p2, %p6119_p1 }
   0xc   :  { %p6122_p4 = pnand %p6121_p3, %p6115_p0 }
   0xe   :  { %6125 = shalt.err (!%p6122_p4)
}
   0xf   :  { %s6300_s18 = smov 128   ;;  %s6301_s19 = smov 8  }
  0x10   :  { %48 = dma.hbm_to_vmem [thread:$0]  %s8528_s1, 2048, %s43_s30, [#allocation6], %s6300_s18, %s6300_s18, %s6301_s19  }
  0x11   :  { %s6134_s22 = scalar_lea.vmem %s66_s16, 16  ;;  %s6138_s23 = scalar_lea.vmem %s66_s16, 32 }
  0x12   :  { %p6135_p5 = scmp.ne.s32.totalorder %s66_s16, %s6134_s22  ;;  %p6139_p6 = scmp.lt.s32.totalorder %s66_s16, %s66_s16 }
  0x13   :  { %p6140_p7 = scmp.lt.s32.totalorder %s6138_s23, %s6134_s22 }
  0x15   :  { %p6141_p8 = por %p6140_p7, %p6139_p6 }
  0x17   :  { %p6142_p9 = pnand %p6141_p8, %p6135_p5 }
  0x19   :  { %6145 = shalt.err (!%p6142_p9)
}
  0x1a   :  { %68 = dma.hbm_to_vmem [thread:$0]  %s8530_s3, 16, %s66_s16, [#allocation9]  }
  0x1b   :  { %s6302_s26 = smov [#allocation11]  }
  0x1c   :  { %s88_s27 = sshll.u32 %s6302_s26, 4  ;;  %s89_s27 = int_to_ptr.vmem [resolvable:$true] %s88_s27 }
  0x1d   :  { %s6154_s28 = scalar_lea.vmem %s89_s27, 1024  ;;  %p6159_p11 = scmp.lt.s32.totalorder %s89_s27, %s89_s27 }
  0x1e   :  { %p6155_p10 = scmp.ne.s32.totalorder %s89_s27, %s6154_s28  ;;  %p6160_p12 = scmp.lt.s32.totalorder %s6154_s28, %s6154_s28 }
  0x20   :  { %p6161_p13 = por %p6160_p12, %p6159_p11 }
  0x22   :  { %p6162_p0 = pnand %p6161_p13, %p6155_p10 }
  0x24   :  { %6165 = shalt.err (!%p6162_p0)
}
  0x25   :  { %s6303_s1 = smov 64   ;;  %s6304_s29 = smov 4  }
  0x26   :  { %94 = dma.hbm_to_vmem [thread:$0]  %s8533_s6, 1024, %s89_s27, [#allocation12], %s6303_s1, %s6303_s1, %s6304_s29  }
  0x27   :  { %s6305_s3 = smov [#allocation2]   ;;  %s6306_s17 = smov [#allocation7]  }
  0x28   :  { %s30_s16 = sshll.u32 %s6305_s3, 4  ;;  %s55_s20 = sshll.u32 %s6306_s17, 4  ;;  %s31_s16 = int_to_ptr.vmem [resolvable:$true] %s30_s16  ;;  %s56_s20 = int_to_ptr.vmem [resolvable:$true] %s55_s20 }
  0x29   :  { %s6174_s21 = scalar_lea.vmem %s31_s16, 2048  ;;  %p6179_p2 = scmp.lt.s32.totalorder %s31_s16, %s31_s16 }
  0x2a   :  { %p6175_p1 = scmp.ne.s32.totalorder %s31_s16, %s6174_s21  ;;  %p6180_p3 = scmp.lt.s32.totalorder %s6174_s21, %s6174_s21 }
  0x2c   :  { %p6181_p4 = por %p6180_p3, %p6179_p2 }
  0x2e   :  { %p6182_p5 = pnand %p6181_p4, %p6175_p1 }
  0x30   :  { %6185 = shalt.err (!%p6182_p5)
}
  0x31   :  { %36 = dma.hbm_to_vmem [thread:$0]  %s8527_s0, 2048, %s31_s16, [#allocation3], %s6300_s18, %s6300_s18, %s6301_s19  }
  0x32   :  { %s6194_s6 = scalar_lea.vmem %s56_s20, 16  ;;  %s6198_s24 = scalar_lea.vmem %s56_s20, 32 }
  0x33   :  { %p6195_p6 = scmp.ne.s32.totalorder %s56_s20, %s6194_s6  ;;  %p6199_p7 = scmp.lt.s32.totalorder %s56_s20, %s56_s20 }
  0x34   :  { %p6200_p8 = scmp.lt.s32.totalorder %s6198_s24, %s6194_s6 }
  0x36   :  { %p6201_p9 = por %p6200_p8, %p6199_p7 }
  0x38   :  { %p6202_p10 = pnand %p6201_p9, %p6195_p6 }
  0x3a   :  { %6205 = shalt.err (!%p6202_p10)
}
  0x3b   :  { %58 = dma.hbm_to_vmem [thread:$0]  %s8529_s2, 16, %s56_s20, [#allocation6]  }
  0x3c   :  { %s6307_s27 = smov [#allocation10]  }
  0x3d   :  { %s74_s28 = sshll.u32 %s6307_s27, 4  ;;  %s75_s28 = int_to_ptr.vmem [resolvable:$true] %s74_s28 }
  0x3e   :  { %s6214_s30 = scalar_lea.vmem %s75_s28, 3072  ;;  %p6219_p12 = scmp.lt.s32.totalorder %s75_s28, %s75_s28 }
  0x3f   :  { %p6215_p11 = scmp.ne.s32.totalorder %s75_s28, %s6214_s30  ;;  %p6220_p13 = scmp.lt.s32.totalorder %s6214_s30, %s6214_s30 }
  0x41   :  { %p6221_p0 = por %p6220_p13, %p6219_p12 }
  0x43   :  { %p6222_p1 = pnand %p6221_p0, %p6215_p11 }
  0x45   :  { %6225 = shalt.err (!%p6222_p1)
}
  0x46   :  { %s6308_s0 = smov 192   ;;  %s6309_s15 = smov 12  }
  0x47   :  { %80 = dma.hbm_to_vmem [thread:$0]  %s8531_s4, 3072, %s75_s28, [#allocation9], %s6308_s0, %s6308_s0, %s6309_s15  }
  0x48   :  { %s6310_s17 = smov [#allocation13]   ;;  %s6311_s22 = smov [#allocation14]  }
  0x49   :  { %s106_s21 = sshll.u32 %s6310_s17, 4  ;;  %s120_s2 = sshll.u32 %s6311_s22, 4  ;;  %s107_s21 = int_to_ptr.vmem [resolvable:$true] %s106_s21  ;;  %s121_s2 = int_to_ptr.vmem [resolvable:$true] %s120_s2 }
  0x4a   :  { %s6234_s20 = scalar_lea.vmem %s107_s21, 2048  ;;  %p6239_p3 = scmp.lt.s32.totalorder %s107_s21, %s107_s21 }
  0x4b   :  { %p6235_p2 = scmp.ne.s32.totalorder %s107_s21, %s6234_s20  ;;  %p6240_p4 = scmp.lt.s32.totalorder %s6234_s20, %s6234_s20 }
  0x4d   :  { %p6241_p5 = por %p6240_p4, %p6239_p3 }
  0x4f   :  { %p6242_p6 = pnand %p6241_p5, %p6235_p2 }
  0x51   :  { %6245 = shalt.err (!%p6242_p6)
}
  0x52   :  { %112 = dma.hbm_to_vmem [thread:$0]  %s8537_s10, 2048, %s107_s21, [#allocation12], %s6300_s18, %s6300_s18, %s6301_s19  }
  0x53   :  { %s6254_s4 = scalar_lea.vmem %s121_s2, 2048  ;;  %p6259_p8 = scmp.lt.s32.totalorder %s121_s2, %s121_s2 }
  0x54   :  { %p6255_p7 = scmp.ne.s32.totalorder %s121_s2, %s6254_s4  ;;  %p6260_p9 = scmp.lt.s32.totalorder %s6254_s4, %s6254_s4 }
  0x56   :  { %p6261_p10 = por %p6260_p9, %p6259_p8 }
  0x58   :  { %p6262_p11 = pnand %p6261_p10, %p6255_p7 }
  0x5a   :  { %6265 = shalt.err (!%p6262_p11)
}
  0x5b   :  { %126 = dma.hbm_to_vmem [thread:$0]  %s8539_s12, 2048, %s121_s2, [#allocation15], %s6303_s1, %s6303_s1, %s6304_s29  }
  0x5c   :  { %6286 = dma.done.wait [#allocation3], 2048  }
  0x5d   :  { %6287 = vsyncadd [#allocation3], 4294965248 }
  0x5e   :  { %6288 = dma.done.wait [#allocation6], 2064  }
  0x5f   :  { %6289 = vsyncadd [#allocation6], 4294965232 }
  0x60   :  { %6290 = dma.done.wait [#allocation9], 3088  }
  0x61   :  { %6291 = vsyncadd [#allocation9], 4294964208 }
  0x62   :  { %6292 = dma.done.wait [#allocation12], 3072  }
  0x63   :  { %6293 = vsyncadd [#allocation12], 4294964224 }
  0x64   :  { %6294 = dma.done.wait [#allocation15], 2048  }
  0x65   :  { %6295 = vsyncadd [#allocation15], 4294965248  ;;  %v154_v0 = vld [vmem:[#allocation2] sm:$0xff]  ;;  %v156_v1 = vld [vmem:[#allocation2 + $0x10] sm:$0xff]  ;;  %s6315_s29 = smov 32  }
  0x66   :  { %170 = vadd.xlane.f32.xlu0 %v154_v0  ;;  %174 = vadd.xlane.f32.xlu1 %v156_v1  ;;  %v155_v2 = vld [vmem:[#allocation2 + $0x8] sm:$0xff]  ;;  %v157_v3 = vld [vmem:[#allocation2 + $0x18] sm:$0xff]  ;;  %v158_v4 = vld [vmem:[#allocation2 + $0x20] sm:$0xff] }
  0x67   :  { %v159_v5 = vld [vmem:[#allocation2 + $0x28] sm:$0xff]  ;;  %v160_v6 = vld [vmem:[#allocation2 + $0x30] sm:$0xff]  ;;  %v161_v7 = vld [vmem:[#allocation2 + $0x38] sm:$0xff] }
  0x68   :  { %v162_v8 = vld [vmem:[#allocation2 + $0x40] sm:$0xff]  ;;  %v163_v9 = vld [vmem:[#allocation2 + $0x48] sm:$0xff]  ;;  %v6431_v10 = vld [vmem:[#allocation2 + $0x50] sm:$0xff] }
  0x69   :  { %v6433_v11 = vld [vmem:[#allocation2 + $0x58] sm:$0xff]  ;;  %v6435_v12 = vld [vmem:[#allocation2 + $0x60] sm:$0xff]  ;;  %v6437_v13 = vld [vmem:[#allocation2 + $0x68] sm:$0xff] }
  0x6a   :  { %172 = vadd.xlane.f32.xlu0 %v155_v2  ;;  %176 = vadd.xlane.f32.xlu1 %v157_v3  ;;  %v6441_v14 = vld [vmem:[#allocation2 + $0x70] sm:$0xff]  ;;  %v6443_v15 = vld [vmem:[#allocation2 + $0x78] sm:$0xff] }
  0x6e   :  { %178 = vadd.xlane.f32.xlu0 %v158_v4  ;;  %180 = vadd.xlane.f32.xlu1 %v159_v5 }
  0x72   :  { %182 = vadd.xlane.f32.xlu0 %v160_v6  ;;  %184 = vadd.xlane.f32.xlu1 %v161_v7 }
  0x76   :  { %186 = vadd.xlane.f32.xlu0 %v162_v8  ;;  %188 = vadd.xlane.f32.xlu1 %v163_v9 }
  0x7a   :  { %190 = vadd.xlane.f32.xlu0 %v6431_v10  ;;  %192 = vadd.xlane.f32.xlu1 %v6433_v11 }
  0x7e   :  { %194 = vadd.xlane.f32.xlu0 %v6435_v12  ;;  %196 = vadd.xlane.f32.xlu1 %v6437_v13 }
  0x82   :  { %198 = vadd.xlane.f32.xlu0 %v6441_v14  ;;  %200 = vadd.xlane.f32.xlu1 %v6443_v15 }
  0xef   :  { %v171_v16 = vpop.xlane.xlu0 %170  ;;  %v175_v17 = vpop.xlane.xlu1 %174 }
  0xf0   :  { %v203_v18 = vmul.f32 0.0078125, %v171_v16  ;;  %v205_v19 = vmul.f32 0.0078125, %v175_v17 }
  0xf2   :  { %v6449_v20 = vsub.f32 %v154_v0, %v203_v18  ;;  %v6451_v21 = vsub.f32 %v156_v1, %v205_v19  ;;  %v5629_v19 = vld [vmem:[#allocation10 + $0x94] ss:$12 sps:$4 sm:$0xff]  }
  0xf3   :  { %v173_v22 = vpop.xlane.xlu0 %172  ;;  %v177_v23 = vpop.xlane.xlu1 %176 }
  0xf4   :  { %v204_v24 = vmul.f32 0.0078125, %v173_v22  ;;  %v235_v25 = vmul.f32 %v6449_v20, %v6449_v20  ;;  %v206_v26 = vmul.f32 0.0078125, %v177_v23  ;;  %v237_v27 = vmul.f32 %v6451_v21, %v6451_v21  ;;  %v5631_v22 = vld [vmem:[#allocation10 + $0xb0] ss:$12 sps:$4 sm:$0xff]  }
  0xf5   :  { %5207 = vmatprep.subr.bf16.mxu1 %v5631_v22 }
  0xf6   :  { %251 = vadd.xlane.f32.xlu0 %v235_v25  ;;  %v6457_v28 = vsub.f32 %v155_v2, %v204_v24  ;;  %v6459_v29 = vsub.f32 %v157_v3, %v206_v26  ;;  %v5632_v24 = vld [vmem:[#allocation10 + $0x90] ss:$12 sps:$4 sm:$0xff]   ;;  %5208 = vmatpush3.bf16.msra.mxu1 %v5631_v22  ;;  %v5636_v25 = vld [vmem:[#allocation10 + $0x78] ss:$12 sps:$4 sm:$0xff]  }
  0xf7   :  { %v179_v30 = vpop.xlane.xlu0 %178  ;;  %v181_v31 = vpop.xlane.xlu1 %180  ;;  %v5637_v26 = vld [vmem:[#allocation10 + $0x64] ss:$12 sps:$4 sm:$0xff]  }
  0xf8   :  { %v207_v32 = vmul.f32 0.0078125, %v179_v30  ;;  %v236_v33 = vmul.f32 %v6457_v28, %v6457_v28  ;;  %v208_v34 = vmul.f32 0.0078125, %v181_v31  ;;  %v238_v35 = vmul.f32 %v6459_v29, %v6459_v29  ;;  %v5640_v30 = vld [vmem:[#allocation10 + $0x60] ss:$12 sps:$4 sm:$0xff]  }
  0xf9   :  { %v5641_v31 = vld [vmem:[#allocation10 + $0x4c] ss:$12 sps:$4 sm:$0xff]  }
  0xfa   :  { %255 = vadd.xlane.f32.xlu0 %v237_v27  ;;  %253 = vadd.xlane.f32.xlu1 %v236_v33  ;;  %v6465_v36 = vsub.f32 %v158_v4, %v207_v32  ;;  %v6467_v37 = vsub.f32 %v159_v5, %v208_v34  ;;  %v5639_v27 = vld [vmem:[#allocation10 + $0x80] ss:$12 sps:$4 sm:$0xff]   ;;  %v5643_v32 = vld [vmem:[#allocation10 + $0x68] ss:$12 sps:$4 sm:$0xff]  }
  0xfb   :  { %v183_v38 = vpop.xlane.xlu0 %182  ;;  %v185_v39 = vpop.xlane.xlu1 %184  ;;  %v5644_v33 = vld [vmem:[#allocation10 + $0x48] ss:$12 sps:$4 sm:$0xff]  }
  0xfc   :  { %v209_v40 = vmul.f32 0.0078125, %v183_v38  ;;  %v239_v41 = vmul.f32 %v6465_v36, %v6465_v36  ;;  %v210_v42 = vmul.f32 0.0078125, %v185_v39  ;;  %v240_v43 = vmul.f32 %v6467_v37, %v6467_v37  ;;  %v5645_v34 = vld [vmem:[#allocation10 + $0x34] ss:$12 sps:$4 sm:$0xff]   ;;  %v5648_v38 = vld [vmem:[#allocation10 + $0x30] ss:$12 sps:$4 sm:$0xff]  }
  0xfd   :  { %v5649_v39 = vld [vmem:[#allocation10 + $0x1c] ss:$12 sps:$4 sm:$0xff]  }
  0xfe   :  { %257 = vadd.xlane.f32.xlu1 %v238_v35  ;;  %259 = vadd.xlane.f32.xlu0 %v239_v41  ;;  %v6473_v44 = vsub.f32 %v160_v6, %v209_v40  ;;  %v6475_v45 = vsub.f32 %v161_v7, %v210_v42  ;;  %v5647_v35 = vld [vmem:[#allocation10 + $0x50] ss:$12 sps:$4 sm:$0xff]   ;;  %v5651_v40 = vld [vmem:[#allocation10 + $0x38] ss:$12 sps:$4 sm:$0xff]  }
  0xff   :  { %v187_v46 = vpop.xlane.xlu0 %186  ;;  %v189_v47 = vpop.xlane.xlu1 %188  ;;  %v5652_v41 = vld [vmem:[#allocation10 + $0x18] ss:$12 sps:$4 sm:$0xff]  }
 0x100   :  { %v211_v48 = vmul.f32 0.0078125, %v187_v46  ;;  %v241_v49 = vmul.f32 %v6473_v44, %v6473_v44  ;;  %v212_v50 = vmul.f32 0.0078125, %v189_v47  ;;  %v242_v51 = vmul.f32 %v6475_v45, %v6475_v45  ;;  %v5653_v42 = vld [vmem:[#allocation10 + $0x4] ss:$12 sps:$4 sm:$0xff]   ;;  %v5656_v46 = vld [vmem:[#allocation10] ss:$12 sps:$4 sm:$0xff]  }
 0x101   :  { %v8544_v47 = vmov 0  }
 0x102   :  { %261 = vadd.xlane.f32.xlu1 %v240_v43  ;;  %263 = vadd.xlane.f32.xlu0 %v241_v49  ;;  %v6481_v52 = vsub.f32 %v162_v8, %v211_v48  ;;  %v6483_v53 = vsub.f32 %v163_v9, %v212_v50  ;;  %v5655_v43 = vld [vmem:[#allocation10 + $0x20] ss:$12 sps:$4 sm:$0xff]   ;;  %v5657_v48 = vld [vmem:[#allocation10 + $0x8] ss:$12 sps:$4 sm:$0xff]  }
 0x103   :  { %v191_v54 = vpop.xlane.xlu0 %190  ;;  %v193_v55 = vpop.xlane.xlu1 %192  ;;  %722 = vmatprep.mubr.bf16.mxu0 %v8544_v47 }
 0x104   :  { %v213_v56 = vmul.f32 0.0078125, %v191_v54  ;;  %v243_v57 = vmul.f32 %v6481_v52, %v6481_v52  ;;  %v214_v58 = vmul.f32 0.0078125, %v193_v55  ;;  %v244_v59 = vmul.f32 %v6483_v53, %v6483_v53 }
 0x106   :  { %265 = vadd.xlane.f32.xlu1 %v242_v51  ;;  %267 = vadd.xlane.f32.xlu0 %v243_v57  ;;  %v6490_v60 = vsub.f32 %v6431_v10, %v213_v56  ;;  %v6493_v61 = vsub.f32 %v6433_v11, %v214_v58  ;;  %v5626_v11 = vld [vmem:[#allocation10 + $0xac] ss:$12 sps:$4 sm:$0xff]  }
 0x107   :  { %v195_v62 = vpop.xlane.xlu0 %194  ;;  %v197_v63 = vpop.xlane.xlu1 %196  ;;  %690 = vmatprep.subr.bf16.mxu0 %v5626_v11 }
 0x108   :  { %v215_v0 = vmul.f32 0.0078125, %v195_v62  ;;  %v245_v1 = vmul.f32 %v6490_v60, %v6490_v60  ;;  %v216_v2 = vmul.f32 0.0078125, %v197_v63  ;;  %v246_v3 = vmul.f32 %v6493_v61, %v6493_v61 }
 0x10a   :  { %269 = vadd.xlane.f32.xlu1 %v244_v59  ;;  %271 = vadd.xlane.f32.xlu0 %v245_v1  ;;  %v6500_v4 = vsub.f32 %v6435_v12, %v215_v0  ;;  %v6503_v5 = vsub.f32 %v6437_v13, %v216_v2  ;;  %v5628_v13 = vld [vmem:[#allocation10 + $0xa8] ss:$12 sps:$4 sm:$0xff]  }
 0x10b   :  { %v199_v6 = vpop.xlane.xlu0 %198  ;;  %v201_v7 = vpop.xlane.xlu1 %200  ;;  %691 = vmatpush1.bf16.msra.mxu0 %v5628_v13 }
 0x10c   :  { %v217_v8 = vmul.f32 0.0078125, %v199_v6  ;;  %v247_v9 = vmul.f32 %v6500_v4, %v6500_v4  ;;  %v218_v10 = vmul.f32 0.0078125, %v201_v7  ;;  %v248_v16 = vmul.f32 %v6503_v5, %v6503_v5  ;;  %692 = vmatprep.subr.bf16.mxu0 %v5629_v19 }
 0x10e   :  { %273 = vadd.xlane.f32.xlu1 %v246_v3  ;;  %275 = vadd.xlane.f32.xlu0 %v247_v9  ;;  %v6510_v17 = vsub.f32 %v6441_v14, %v217_v8  ;;  %v6513_v12 = vsub.f32 %v6443_v15, %v218_v10  ;;  %v5633_v14 = vld [vmem:[#allocation10 + $0x7c] ss:$12 sps:$4 sm:$0xff]   ;;  %v5635_v15 = vld [vmem:[#allocation10 + $0x98] ss:$12 sps:$4 sm:$0xff]  }
 0x10f   :  { %693 = vmatpush1.bf16.msra.mxu0 %v5632_v24  ;;  %5209 = vmatprep.subr.bf16.mxu1 %v5635_v15  ;;  %v6536_v3 = vld [vmem:[#allocation7] ss:$0 sm:$0xff] }
 0x110   :  { %v249_v18 = vmul.f32 %v6510_v17, %v6510_v17  ;;  %v250_v23 = vmul.f32 %v6513_v12, %v6513_v12  ;;  %694 = vmatprep.subr.bf16.mxu0 %v5633_v14  ;;  %5210 = vmatpush3.bf16.msra.mxu1 %v5635_v15  ;;  %v6550_v13 = vmul.f32 %v6536_v3, %v6451_v21 }
 0x111   :  { %5211 = vmatprep.subr.bf16.mxu1 %v5639_v27 }
 0x112   :  { %277 = vadd.xlane.f32.xlu1 %v248_v16  ;;  %279 = vadd.xlane.f32.xlu0 %v249_v18  ;;  %v6546_v16 = vmul.f32 %v6536_v3, %v6449_v20  ;;  %v6554_v18 = vmul.f32 %v6536_v3, %v6457_v28  ;;  %v6563_v20 = vmul.f32 %v6536_v3, %v6465_v36 }
 0x113   :  { %695 = vmatpush1.bf16.msra.mxu0 %v5636_v25 }
 0x114   :  { %696 = vmatprep.subr.bf16.mxu0 %v5637_v26  ;;  %5212 = vmatpush3.bf16.msra.mxu1 %v5639_v27 }
 0x115   :  { %5213 = vmatprep.subr.bf16.mxu1 %v5643_v32 }
 0x116   :  { %281 = vadd.xlane.f32.xlu1 %v250_v23  ;;  %v6559_v23 = vmul.f32 %v6536_v3, %v6459_v29 }
 0x117   :  { %697 = vmatpush1.bf16.msra.mxu0 %v5640_v30 }
 0x118   :  { %698 = vmatprep.subr.bf16.mxu0 %v5641_v31  ;;  %5214 = vmatpush3.bf16.msra.mxu1 %v5643_v32 }
 0x119   :  { %5215 = vmatprep.subr.bf16.mxu1 %v5647_v35 }
 0x11b   :  { %699 = vmatpush1.bf16.msra.mxu0 %v5644_v33 }
 0x11c   :  { %700 = vmatprep.subr.bf16.mxu0 %v5645_v34  ;;  %5216 = vmatpush3.bf16.msra.mxu1 %v5647_v35 }
 0x11d   :  { %5217 = vmatprep.subr.bf16.mxu1 %v5651_v40 }
 0x11f   :  { %701 = vmatpush1.bf16.msra.mxu0 %v5648_v38 }
 0x120   :  { %702 = vmatprep.subr.bf16.mxu0 %v5649_v39  ;;  %5218 = vmatpush3.bf16.msra.mxu1 %v5651_v40 }
 0x121   :  { %5219 = vmatprep.subr.bf16.mxu1 %v5655_v43 }
 0x123   :  { %703 = vmatpush1.bf16.msra.mxu0 %v5652_v41 }
 0x124   :  { %704 = vmatprep.subr.bf16.mxu0 %v5653_v42  ;;  %5220 = vmatpush3.bf16.msra.mxu1 %v5655_v43 }
 0x125   :  { %5221 = vmatprep.subr.bf16.mxu1 %v5657_v48 }
 0x127   :  { %705 = vmatpush1.bf16.msra.mxu0 %v5656_v46 }
 0x128   :  { %5222 = vmatpush3.bf16.msra.mxu1 %v5657_v48 }
 0x17f   :  { %v252_v49 = vpop.xlane.xlu0 %251 }
 0x180   :  { %v283_v50 = vmul.f32 0.007874016, %v252_v49 }
 0x182   :  { %5706 = vrsqrt.f32 %v283_v50  ;;  %vm301_vm0 = vcmp.eq.f32.partialorder %v283_v50, inf  ;;  %v304_v24 = vand.u32 2147483648, %v283_v50  ;;  %vm303_vm1 = vcmp.eq.f32.partialorder %v283_v50, 0.0 }
 0x183   :  { %v254_v51 = vpop.xlane.xlu1 %253  ;;  %v256_v54 = vpop.xlane.xlu0 %255 }
 0x184   :  { %v6520_v55 = vmul.f32 0.007874016, %v254_v51  ;;  %v6522_v56 = vmul.f32 0.007874016, %v256_v54 }
 0x186   :  { %5708 = vrsqrt.f32 %v6520_v55  ;;  %vm308_vm2 = vcmp.eq.f32.partialorder %v6520_v55, inf  ;;  %vm310_vm3 = vcmp.eq.f32.partialorder %v6520_v55, 0.0  ;;  %v311_v28 = vand.u32 2147483648, %v6520_v55 }
 0x187   :  { %5710 = vrsqrt.f32 %v6522_v56  ;;  %v258_v57 = vpop.xlane.xlu1 %257  ;;  %v260_v58 = vpop.xlane.xlu0 %259  ;;  %vm315_vm4 = vcmp.eq.f32.partialorder %v6522_v56, inf  ;;  %vm317_vm5 = vcmp.eq.f32.partialorder %v6522_v56, 0.0  ;;  %v318_v30 = vand.u32 2147483648, %v6522_v56 }
 0x188   :  { %v6526_v59 = vmul.f32 0.007874016, %v258_v57  ;;  %v6528_v62 = vmul.f32 0.007874016, %v260_v58 }
 0x18a   :  { %5712 = vrsqrt.f32 %v6526_v59  ;;  %vm322_vm6 = vcmp.eq.f32.partialorder %v6526_v59, inf  ;;  %v325_v32 = vand.u32 2147483648, %v6526_v59  ;;  %vm329_vm7 = vcmp.eq.f32.partialorder %v6528_v62, inf }
 0x18b   :  { %5714 = vrsqrt.f32 %v6528_v62  ;;  %v262_v63 = vpop.xlane.xlu1 %261  ;;  %v264_v0 = vpop.xlane.xlu0 %263  ;;  %vm324_vm8 = vcmp.eq.f32.partialorder %v6526_v59, 0.0  ;;  %v332_v38 = vand.u32 2147483648, %v6528_v62  ;;  %vm331_vm10 = vcmp.eq.f32.partialorder %v6528_v62, 0.0 }
 0x18c   :  { %v6532_v1 = vmul.f32 0.007874016, %v262_v63  ;;  %v6534_v2 = vmul.f32 0.007874016, %v264_v0 }
 0x18e   :  { %5716 = vrsqrt.f32 %v6532_v1  ;;  %vm336_vm9 = vcmp.eq.f32.partialorder %v6532_v1, inf  ;;  %v339_v39 = vand.u32 2147483648, %v6532_v1  ;;  %vm343_vm11 = vcmp.eq.f32.partialorder %v6534_v2, inf }
 0x18f   :  { %v5707_v6 = vpop.eup %5706  ;;  %5718 = vrsqrt.f32 %v6534_v2  ;;  %v266_v7 = vpop.xlane.xlu1 %265  ;;  %vm345_vm12 = vcmp.eq.f32.partialorder %v6534_v2, 0.0  ;;  %vm338_vm13 = vcmp.eq.f32.partialorder %v6532_v1, 0.0  ;;  %v346_v46 = vand.u32 2147483648, %v6534_v2 }
 0x190   :  { %v268_v8 = vpop.xlane.xlu0 %267  ;;  %v300_v9 = vmul.f32 %v5707_v6, %v283_v50  ;;  %v6540_v10 = vmul.f32 0.007874016, %v266_v7 }
 0x191   :  { %v6542_v11 = vmul.f32 0.007874016, %v268_v8 }
 0x192   :  { %v302_v19 = vsel %vm301_vm0, %v283_v50, %v300_v9  ;;  %5720 = vrsqrt.f32 %v6540_v10  ;;  %vm350_vm14 = vcmp.eq.f32.partialorder %v6540_v10, inf  ;;  %v353_v50 = vand.u32 2147483648, %v6540_v10 }
 0x193   :  { %v5709_v22 = vpop.eup %5708  ;;  %5722 = vrsqrt.f32 %v6542_v11  ;;  %v270_v21 = vpop.xlane.xlu1 %269  ;;  %v305_v25 = vsel %vm303_vm1, %v304_v24, %v302_v19  ;;  %vm352_vm15 = vcmp.eq.f32.partialorder %v6540_v10, 0.0  ;;  %vm357_vm0 = vcmp.eq.f32.partialorder %v6542_v11, inf }
 0x194   :  { %v272_v14 = vpop.xlane.xlu0 %271  ;;  %v5711_v15 = vpop.eup %5710  ;;  %v307_v29 = vmul.f32 %v5709_v22, %v6520_v55  ;;  %v6570_v26 = vmul.f32 0.007874016, %v270_v21  ;;  %v411_v35 = vadd.f32 1e-06, %v305_v25  ;;  %vm359_vm1 = vcmp.eq.f32.partialorder %v6542_v11, 0.0 }
 0x195   :  { %v6572_v36 = vmul.f32 0.007874016, %v272_v14  ;;  %v314_v27 = vmul.f32 %v5711_v15, %v6522_v56  ;;  %v360_v9 = vand.u32 2147483648, %v6542_v11 }
 0x196   :  { %5724 = vrsqrt.f32 %v6570_v26  ;;  %v309_v41 = vsel %vm308_vm2, %v6520_v55, %v307_v29  ;;  %vm364_vm2 = vcmp.eq.f32.partialorder %v6570_v26, inf  ;;  %v367_v25 = vand.u32 2147483648, %v6570_v26 }
 0x197   :  { %v5713_v31 = vpop.eup %5712  ;;  %v274_v33 = vpop.xlane.xlu1 %273  ;;  %5726 = vrsqrt.f32 %v6572_v36  ;;  %v316_v42 = vsel %vm315_vm4, %v6522_v56, %v314_v27  ;;  %v312_v63 = vsel %vm310_vm3, %v311_v28, %v309_v41  ;;  %vm366_vm3 = vcmp.eq.f32.partialorder %v6570_v26, 0.0 }
 0x198   :  { %v5715_v34 = vpop.eup %5714  ;;  %v276_v40 = vpop.xlane.xlu0 %275  ;;  %v321_v43 = vmul.f32 %v5713_v31, %v6526_v59  ;;  %v6602_v51 = vmul.f32 0.007874016, %v274_v33  ;;  %5728 = vrcp.f32 %v411_v35  ;;  %v319_v6 = vsel %vm317_vm5, %v318_v30, %v316_v42 }
 0x199   :  { %v328_v49 = vmul.f32 %v5715_v34, %v6528_v62  ;;  %v6604_v54 = vmul.f32 0.007874016, %v276_v40  ;;  %v412_v22 = vadd.f32 1e-06, %v312_v63  ;;  %v413_v14 = vadd.f32 1e-06, %v319_v6 }
 0x19a   :  { %5730 = vrsqrt.f32 %v6602_v51  ;;  %v323_v55 = vsel %vm322_vm6, %v6526_v59, %v321_v43  ;;  %vm371_vm4 = vcmp.eq.f32.partialorder %v6572_v36, inf  ;;  %vm373_vm5 = vcmp.eq.f32.partialorder %v6572_v36, 0.0 }
 0x19b   :  { %v5717_v48 = vpop.eup %5716  ;;  %v278_v57 = vpop.xlane.xlu1 %277  ;;  %5732 = vrsqrt.f32 %v6604_v54  ;;  %v330_v56 = vsel %vm329_vm7, %v6528_v62, %v328_v49  ;;  %v326_v27 = vsel %vm324_vm8, %v325_v32, %v323_v55  ;;  %v374_v43 = vand.u32 2147483648, %v6572_v36 }
 0x19c   :  { %v5719_v58 = vpop.eup %5718  ;;  %v335_v0 = vmul.f32 %v5717_v48, %v6532_v1  ;;  %v6615_v8 = vmul.f32 0.007874016, %v278_v57  ;;  %v280_v24 = vpop.xlane.xlu0 %279  ;;  %v333_v33 = vsel %vm331_vm10, %v332_v38, %v330_v56  ;;  %v414_v38 = vadd.f32 1e-06, %v326_v27 }
 0x19d   :  { %v342_v7 = vmul.f32 %v5719_v58, %v6534_v2  ;;  %v6646_v35 = vmul.f32 0.007874016, %v280_v24  ;;  %v415_v42 = vadd.f32 1e-06, %v333_v33  ;;  %vm378_vm6 = vcmp.eq.f32.partialorder %v6602_v51, inf }
 0x19e   :  { %v337_v15 = vsel %vm336_vm9, %v6532_v1, %v335_v0  ;;  %5734 = vrsqrt.f32 %v6615_v8  ;;  %vm380_vm7 = vcmp.eq.f32.partialorder %v6602_v51, 0.0  ;;  %v381_v6 = vand.u32 2147483648, %v6602_v51 }
 0x19f   :  { %v5721_v19 = vpop.eup %5720  ;;  %v282_v29 = vpop.xlane.xlu1 %281  ;;  %v344_v30 = vsel %vm343_vm11, %v6534_v2, %v342_v7  ;;  %v340_v59 = vsel %vm338_vm13, %v339_v39, %v337_v15  ;;  %5736 = vrcp.f32 %v412_v22  ;;  %vm385_vm8 = vcmp.eq.f32.partialorder %v6604_v54, inf }
 0x1a0   :  { %v5723_v21 = vpop.eup %5722  ;;  %v349_v28 = vmul.f32 %v5721_v19, %v6540_v10  ;;  %v6653_v40 = vmul.f32 0.007874016, %v282_v29  ;;  %v347_v41 = vsel %vm345_vm12, %v346_v46, %v344_v30  ;;  %5738 = vrsqrt.f32 %v6646_v35 }
 0x1a1   :  { %v356_v31 = vmul.f32 %v5723_v21, %v6542_v11  ;;  %v416_v49 = vadd.f32 1e-06, %v340_v59  ;;  %v417_v2 = vadd.f32 1e-06, %v347_v41  ;;  %v388_v56 = vand.u32 2147483648, %v6604_v54 }
 0x1a2   :  { %v351_v34 = vsel %vm350_vm14, %v6540_v10, %v349_v28  ;;  %5740 = vrsqrt.f32 %v6653_v40  ;;  %vm387_vm9 = vcmp.eq.f32.partialorder %v6604_v54, 0.0  ;;  %vm392_vm10 = vcmp.eq.f32.partialorder %v6615_v8, inf }
 0x1a3   :  { %v358_v32 = vsel %vm357_vm0, %v6542_v11, %v356_v31  ;;  %v5725_v62 = vpop.eup %5724  ;;  %v354_v1 = vsel %vm352_vm15, %v353_v50, %v351_v34  ;;  %5742 = vrcp.f32 %v413_v14  ;;  %vm394_vm11 = vcmp.eq.f32.partialorder %v6615_v8, 0.0 }
 0x1a4   :  { %v363_v39 = vmul.f32 %v5725_v62, %v6570_v26  ;;  %v5727_v48 = vpop.eup %5726  ;;  %v361_v57 = vsel %vm359_vm1, %v360_v9, %v358_v32  ;;  %v418_v50 = vadd.f32 1e-06, %v354_v1  ;;  %5744 = vrcp.f32 %v414_v38 }
 0x1a5   :  { %v370_v10 = vmul.f32 %v5727_v48, %v6572_v36  ;;  %v5729_v11 = vpop.eup %5728  ;;  %v419_v63 = vadd.f32 1e-06, %v361_v57  ;;  %5746 = vrcp.f32 %v415_v42  ;;  %v395_v21 = vand.u32 2147483648, %v6615_v8 }
 0x1a6   :  { %v365_v46 = vsel %vm364_vm2, %v6570_v26, %v363_v39  ;;  %5748 = vrcp.f32 %v416_v49  ;;  %v455_v33 = vmul.f32 %v6536_v3, %v6467_v37  ;;  %vm399_vm12 = vcmp.eq.f32.partialorder %v6646_v35, inf }
 0x1a7   :  { %v368_v58 = vsel %vm366_vm3, %v367_v25, %v365_v46  ;;  %v372_v0 = vsel %vm371_vm4, %v6572_v36, %v370_v10  ;;  %v5731_v7 = vpop.eup %5730  ;;  %5750 = vrcp.f32 %v417_v2  ;;  %v466_v25 = vmul.f32 %v5729_v11, %v6546_v16 }
 0x1a8   :  { %v420_v55 = vadd.f32 1e-06, %v368_v58  ;;  %v375_v9 = vsel %vm373_vm5, %v374_v43, %v372_v0  ;;  %v5733_v26 = vpop.eup %5732  ;;  %v377_v22 = vmul.f32 %v5731_v7, %v6602_v51  ;;  %5752 = vrcp.f32 %v418_v50 }
 0x1a9   :  { %v421_v19 = vadd.f32 1e-06, %v375_v9  ;;  %v384_v24 = vmul.f32 %v5733_v26, %v6604_v54  ;;  %5754 = vrcp.f32 %v419_v63  ;;  %vm401_vm13 = vcmp.eq.f32.partialorder %v6646_v35, 0.0 }
 0x1aa   :  { %v379_v36 = vsel %vm378_vm6, %v6602_v51, %v377_v22  ;;  %5756 = vrcp.f32 %v420_v55  ;;  %v6702_v51 = vld [vmem:[#allocation8] ss:$0 sm:$0xff]  ;;  %v402_v59 = vand.u32 2147483648, %v6646_v35  ;;  %vm406_vm14 = vcmp.eq.f32.partialorder %v6653_v40, inf }
 0x1ab   :  { %v5735_v14 = vpop.eup %5734  ;;  %v382_v15 = vsel %vm380_vm7, %v381_v6, %v379_v36  ;;  %v386_v28 = vsel %vm385_vm8, %v6604_v54, %v384_v24  ;;  %5758 = vrcp.f32 %v421_v19  ;;  %v409_v42 = vand.u32 2147483648, %v6653_v40 }
 0x1ac   :  { %v422_v29 = vadd.f32 1e-06, %v382_v15  ;;  %v389_v27 = vsel %vm387_vm9, %v388_v56, %v386_v28  ;;  %v391_v30 = vmul.f32 %v5735_v14, %v6615_v8  ;;  %v5737_v31 = vpop.eup %5736  ;;  %v489_v1 = vadd.f32 %v6702_v51, %v466_v25 }
 0x1ad   :  { %v423_v34 = vadd.f32 1e-06, %v389_v27  ;;  %v5739_v54 = vpop.eup %5738  ;;  %v467_v32 = vmul.f32 %v5737_v31, %v6554_v18  ;;  %v456_v18 = vmul.f32 %v6536_v3, %v6473_v44  ;;  %vm408_vm15 = vcmp.eq.f32.partialorder %v6653_v40, 0.0 }
 0x1ae   :  { %v393_v16 = vsel %vm392_vm10, %v6615_v8, %v391_v30  ;;  %5760 = vrcp.f32 %v422_v29  ;;  %v398_v62 = vmul.f32 %v5739_v54, %v6646_v35  ;;  %v457_v44 = vmul.f32 %v6536_v3, %v6475_v45 }
 0x1af   :  { %v396_v37 = vsel %vm394_vm11, %v395_v21, %v393_v16  ;;  %5762 = vrcp.f32 %v423_v34  ;;  %v5741_v38 = vpop.eup %5740  ;;  %v490_v39 = vadd.f32 %v6702_v51, %v467_v32  ;;  %v460_v21 = vmul.f32 %v6536_v3, %v6490_v60 }
 0x1b0   :  { %v424_v41 = vadd.f32 1e-06, %v396_v37  ;;  %v5743_v43 = vpop.eup %5742  ;;  %v400_v8 = vsel %vm399_vm12, %v6646_v35, %v398_v62  ;;  %v405_v48 = vmul.f32 %v5741_v38, %v6653_v40  ;;  %v461_v29 = vmul.f32 %v6536_v3, %v6493_v61 }
 0x1b1   :  { %v5745_v49 = vpop.eup %5744  ;;  %v403_v57 = vsel %vm401_vm13, %v402_v59, %v400_v8  ;;  %v505_v2 = vpack.c.bf16 %v490_v39, %v489_v1  ;;  %v468_v46 = vmul.f32 %v5743_v43, %v6550_v13  ;;  %v462_v54 = vmul.f32 %v6536_v3, %v6500_v4 }
 0x1b2   :  { %5764 = vrcp.f32 %v424_v41  ;;  %v5747_v10 = vpop.eup %5746  ;;  %v425_v50 = vadd.f32 1e-06, %v403_v57  ;;  %v407_v58 = vsel %vm406_vm14, %v6653_v40, %v405_v48  ;;  %v469_v11 = vmul.f32 %v5745_v49, %v6559_v23 }
 0x1b3   :  { %v5749_v63 = vpop.eup %5748  ;;  %v410_v0 = vsel %vm408_vm15, %v409_v42, %v407_v58  ;;  %723 = vmatmul.mubr.bf16.vlgmr.msra.gmra.mxu0 %v505_v2  ;;  %5223 = vmatprep.mubr.bf16.mxu1 %v505_v2  ;;  %v491_v35 = vadd.f32 %v6702_v51, %v468_v46  ;;  %v470_v13 = vmul.f32 %v5747_v10, %v6563_v20  ;;  %v545_v46 = vld [vmem:[%s8532_s5] sm:$0x7]  ;;  %vm988_vm0 = vcmask 261120   ;;  %s6313_s5 = smov 96  }
 0x1b4   :  { %v5751_v6 = vpop.eup %5750  ;;  %v426_v7 = vadd.f32 1e-06, %v410_v0  ;;  %v492_v55 = vadd.f32 %v6702_v51, %v469_v11  ;;  %732 = vmatprep.mubr.bf16.mxu0 %v8544_v47  ;;  %v471_v45 = vmul.f32 %v5749_v63, %v455_v33  ;;  %5766 = vrcp.f32 %v425_v50 }
 0x1b5   :  { %v5753_v9 = vpop.eup %5752  ;;  %v458_v23 = vmul.f32 %v6536_v3, %v6481_v52  ;;  %v459_v40 = vmul.f32 %v6536_v3, %v6483_v53  ;;  %v493_v26 = vadd.f32 %v6702_v51, %v470_v13  ;;  %v472_v19 = vmul.f32 %v5751_v6, %v456_v18 }
 0x1b6   :  { %v5755_v22 = vpop.eup %5754  ;;  %v506_v20 = vpack.c.bf16 %v492_v55, %v491_v35  ;;  %v494_v56 = vadd.f32 %v6702_v51, %v471_v45  ;;  %v473_v24 = vmul.f32 %v5753_v9, %v457_v44  ;;  %5768 = vrcp.f32 %v426_v7 }
 0x1b7   :  { %v5757_v36 = vpop.eup %5756  ;;  %v474_v14 = vmul.f32 %v5755_v22, %v458_v23  ;;  %v495_v28 = vadd.f32 %v6702_v51, %v472_v19  ;;  %v463_v61 = vmul.f32 %v6536_v3, %v6503_v5  ;;  %v464_v1 = vmul.f32 %v6536_v3, %v6510_v17 }
 0x1b8   :  { %v5759_v15 = vpop.eup %5758  ;;  %5224 = vmatmul.mubr.bf16.vlgmr.msra.gmra.mxu1 %v506_v20  ;;  %v507_v52 = vpack.c.bf16 %v494_v56, %v493_v26  ;;  %v496_v53 = vadd.f32 %v6702_v51, %v473_v24  ;;  %v475_v25 = vmul.f32 %v5757_v36, %v459_v40  ;;  %v465_v5 = vmul.f32 %v6536_v3, %v6513_v12 }
 0x1b9   :  { %v476_v27 = vmul.f32 %v5759_v15, %v460_v21  ;;  %v497_v33 = vadd.f32 %v6702_v51, %v474_v14  ;;  %v547_v12 = vlaneseq  ;;  %vm1167_vm4 = vcmask 523264  }
 0x1ba   :  { %5227 = vmatprep.mubr.bf16.mxu1 %v507_v52  ;;  %v508_v31 = vpack.c.bf16 %v496_v53, %v495_v28  ;;  %v498_v60 = vadd.f32 %v6702_v51, %v475_v25 }
 0x1bb   :  { %v5761_v30 = vpop.eup %5760  ;;  %733 = vmatmul.mubr.bf16.gmra.mxu0 %v506_v20  ;;  %v499_v32 = vadd.f32 %v6702_v51, %v476_v27  ;;  %v6770_v3 = vshrl.u32 %v547_v12, 7 }
 0x1bc   :  { %v5763_v34 = vpop.eup %5762  ;;  %v477_v16 = vmul.f32 %v5761_v30, %v461_v29  ;;  %742 = vmatprep.mubr.bf16.mxu0 %v8544_v47  ;;  %v509_v59 = vpack.c.bf16 %v498_v60, %v497_v33 }
 0x1bd   :  { %v478_v62 = vmul.f32 %v5763_v34, %v462_v54  ;;  %8605 = vst [vmem:[#allocation23_spill] sm:$0xff] %v6770_v3  ;;  %v8543_v44 = vsub.s32 1, %v6770_v3  ;;  %v557_v28 = vsub.s32 2, %v6770_v3 }
 0x1be   :  { %v500_v37 = vadd.f32 %v6702_v51, %v477_v16 }
 0x1bf   :  { %v5765_v38 = vpop.eup %5764  ;;  %v501_v39 = vadd.f32 %v6702_v51, %v478_v62  ;;  %v6784_v63 = vrot.slane %v545_v46, %v8543_v44 }
 0x1c0   :  { %v510_v41 = vpack.c.bf16 %v500_v37, %v499_v32  ;;  %v479_v42 = vmul.f32 %v5765_v38, %v463_v61  ;;  %5228 = vmatmul.mubr.bf16.gmra.mxu1 %v508_v31 }
 0x1c1   :  { %v5767_v4 = vpop.eup %5766  ;;  %5231 = vmatprep.mubr.bf16.mxu1 %v509_v59 }
 0x1c2   :  { %v502_v43 = vadd.f32 %v6702_v51, %v479_v42  ;;  %v480_v18 = vmul.f32 %v5767_v4, %v464_v1 }
 0x1c3   :  { %v5769_v8 = vpop.eup %5768  ;;  %743 = vmatmul.mubr.bf16.gmra.mxu0 %v507_v52 }
 0x1c4   :  { %v511_v48 = vpack.c.bf16 %v502_v43, %v501_v39  ;;  %752 = vmatprep.mubr.bf16.mxu0 %v8544_v47  ;;  %v481_v49 = vmul.f32 %v5769_v8, %v465_v5  ;;  %v503_v57 = vadd.f32 %v6702_v51, %v480_v18 }
 0x1c6   :  { %v504_v17 = vadd.f32 %v6702_v51, %v481_v49  ;;  %v8542_v51 = vsub.s32 0, %v6770_v3 }
 0x1c8   :  { %5232 = vmatmul.mubr.bf16.gmra.mxu1 %v510_v41  ;;  %v512_v2 = vpack.c.bf16 %v504_v17, %v503_v57  ;;  %v6778_v10 = vrot.slane %v545_v46, %v8542_v51 }
 0x1c9   :  { %5235 = vmatprep.mubr.bf16.mxu1 %v511_v48 }
 0x1cb   :  { %753 = vmatmul.mubr.bf16.gmra.mxu0 %v508_v31  ;;  %v6826_v31 = vrot.slane %v545_v46, %v557_v28 }
 0x1cc   :  { %762 = vmatprep.mubr.bf16.mxu0 %v8544_v47 }
 0x1d0   :  { %5236 = vmatmul.mubr.bf16.gmra.mxu1 %v512_v2 }
 0x1d3   :  { %763 = vmatmul.mubr.bf16.gmra.mxu0 %v509_v59 }
 0x1d4   :  { %772 = vmatprep.mubr.bf16.mxu0 %v8544_v47 }
 0x1db   :  { %773 = vmatmul.mubr.bf16.gmra.mxu0 %v510_v41 }
 0x1dc   :  { %782 = vmatprep.mubr.bf16.mxu0 %v8544_v47 }
 0x1e3   :  { %783 = vmatmul.mubr.bf16.gmra.mxu0 %v511_v48 }
 0x1e4   :  { %792 = vmatprep.mubr.bf16.mxu0 %v8544_v47 }
 0x1eb   :  { %793 = vmatmul.mubr.bf16.gmra.mxu0 %v512_v2 }
 0x273   :  { %v724_v50 = vpop.f32.mrf.mxu0 }
 0x274   :  { %v725_v11 = vadd.f32 %v724_v50, %v6778_v10 }
 0x275   :  { %v726_v58 = vpop.f32.mrf.mxu0 }
 0x276   :  { %v900_v7 = vmul.f32 0.17677669, %v725_v11  ;;  %v727_v55 = vadd.f32 %v726_v58, %v6784_v63 }
 0x277   :  { %v728_v0 = vpop.f32.mrf.mxu0 }
 0x278   :  { %v729_v35 = vadd.f32 %v728_v0, %v6778_v10  ;;  %v6787_v13 = vpop.f32.mrf.mxu1 }
 0x279   :  { %v730_v6 = vpop.f32.mrf.mxu0 }
 0x27a   :  { %v901_v45 = vmul.f32 0.17677669, %v729_v35  ;;  %v731_v9 = vadd.f32 %v730_v6, %v6784_v63  ;;  %v6791_v23 = vpop.f32.mrf.mxu1 }
 0x27b   :  { %v6793_v40 = vpop.f32.mrf.mxu0 }
 0x27c   :  { %v6795_v26 = vpack.c.bf16 %v901_v45, %v900_v7  ;;  %v6797_v19 = vpack.c.bf16 %v731_v9, %v727_v55  ;;  %v6799_v22 = vpop.f32.mrf.mxu1 }
 0x27d   :  { %v736_v20 = vpop.f32.mrf.mxu0 }
 0x27e   :  { %8606 = vst [vmem:[#allocation24_spill] sm:$0xff] %v6795_v26  ;;  %8607 = vst [vmem:[#allocation25_spill] sm:$0xff] %v6797_v19  ;;  %v6801_v56 = vpop.f32.mrf.mxu1  ;;  %1534 = vrot.lane.b32.xlu1 %v6797_v19, %s6313_s5  ;;  %5247 = vmatprep.mubr.msk.bf16.mxu1 %vm988_vm0, %v6795_v26  ;;  %v737_v14 = vadd.f32 %v736_v20, %v6784_v63 }
 0x27f   :  { %v6807_v24 = vpop.f32.mrf.mxu0 }
 0x280   :  { %v6809_v36 = vpop.f32.mrf.mxu1 }
 0x281   :  { %v740_v21 = vpop.f32.mrf.mxu0 }
 0x282   :  { %v741_v15 = vadd.f32 %v740_v21, %v6784_v63  ;;  %v6813_v52 = vpop.f32.mrf.mxu1 }
 0x283   :  { %v6816_v53 = vpop.f32.mrf.mxu0 }
 0x284   :  { %v6818_v25 = vpack.c.bf16 %v741_v15, %v737_v14  ;;  %v6820_v29 = vpop.f32.mrf.mxu1 }
 0x285   :  { %v746_v27 = vpop.f32.mrf.mxu0 }
 0x286   :  { %8608 = vst [vmem:[#allocation26_spill] sm:$0xff] %v6818_v25  ;;  %v6822_v30 = vpop.f32.mrf.mxu1  ;;  %1536 = vrot.lane.b32.xlu0 %v6818_v25, %s6313_s5  ;;  %v747_v16 = vadd.f32 %v746_v27, %v6784_v63 }
 0x287   :  { %v6828_v33 = vpop.f32.mrf.mxu0 }
 0x288   :  { %v5233_v60 = vpop.f32.mrf.mxu1 }
 0x289   :  { %v878_v34 = vadd.f32 %v5233_v60, %v6826_v31  ;;  %v750_v54 = vpop.f32.mrf.mxu0 }
 0x28a   :  { %v751_v59 = vadd.f32 %v750_v54, %v6784_v63  ;;  %v869_v61 = vpop.f32.mrf.mxu1 }
 0x28b   :  { %v870_v32 = vadd.f32 %v869_v61, %v6826_v31  ;;  %v6834_v37 = vpop.f32.mrf.mxu0 }
 0x28c   :  { %v6836_v62 = vpack.c.bf16 %v751_v59, %v747_v16  ;;  %v5234_v38 = vpop.f32.mrf.mxu1  ;;  %v1005_v16 = vsel %vm988_vm0, %v6818_v25, 0 }
 0x28d   :  { %v881_v41 = vadd.f32 %v5234_v38, %v6826_v31  ;;  %v756_v42 = vpop.f32.mrf.mxu0 }
 0x28e   :  { %8609 = vst [vmem:[#allocation27_spill] sm:$0xff] %v6836_v62  ;;  %v872_v1 = vpop.f32.mrf.mxu1  ;;  %1538 = vrot.lane.b32.xlu1 %v6836_v62, %s6313_s5  ;;  %v757_v48 = vadd.f32 %v756_v42, %v6784_v63  ;;  %v1008_v28 = vsel %vm988_vm0, %v6836_v62, 0 }
 0x28f   :  { %v6841_v4 = vpack.c.bf16 %v881_v41, %v878_v34  ;;  %v873_v39 = vadd.f32 %v872_v1, %v6826_v31  ;;  %v6844_v43 = vpop.f32.mrf.mxu0  ;;  %v739_v1 = vadd.f32 %v6807_v24, %v6778_v10  ;;  %v1002_v24 = vsel %vm988_vm0, %v6797_v19, 0 }
 0x290   :  { %v6846_v5 = vpop.f32.mrf.mxu1 }
 0x291   :  { %v6848_v18 = vpack.c.bf16 %v873_v39, %v870_v32  ;;  %v760_v8 = vpop.f32.mrf.mxu0  ;;  %v865_v32 = vadd.f32 %v6820_v29, %v6826_v31  ;;  %v862_v39 = vadd.f32 %v6809_v36, %v6826_v31  ;;  %v735_v29 = vadd.f32 %v6793_v40, %v6778_v10 }
 0x292   :  { %v761_v49 = vadd.f32 %v760_v8, %v6784_v63  ;;  %v885_v57 = vpop.f32.mrf.mxu1  ;;  %v745_v36 = vadd.f32 %v6816_v53, %v6778_v10  ;;  %v759_v53 = vadd.f32 %v6844_v43, %v6778_v10  ;;  %v849_v43 = vadd.f32 %v6799_v22, %v6826_v31 }
 0x293   :  { %v886_v17 = vadd.f32 %v885_v57, %v6826_v31  ;;  %v764_v2 = vpop.f32.mrf.mxu0  ;;  %v6912_v57 = vpack.c.bf16 %v865_v32, %v862_v39  ;;  %v902_v40 = vmul.f32 0.17677669, %v735_v29  ;;  %v841_v32 = vadd.f32 %v6801_v56, %v6826_v31 }
 0x294   :  { %v6853_v12 = vpack.c.bf16 %v761_v49, %v757_v48  ;;  %v6855_v46 = vpop.f32.mrf.mxu1  ;;  %v765_v58 = vadd.f32 %v764_v2, %v6778_v10  ;;  %v749_v48 = vadd.f32 %v6828_v33, %v6778_v10  ;;  %v903_v2 = vmul.f32 0.17677669, %v739_v1 }
 0x295   :  { %v6857_v50 = vpop.f32.mrf.mxu0  ;;  %8613 = vst [vmem:[#allocation31_spill] sm:$0xff] %v6912_v57  ;;  %v897_v56 = vadd.f32 %v6855_v46, %v6826_v31 }
 0x296   :  { %8610 = vst [vmem:[#allocation28_spill] sm:$0xff] %v6853_v12  ;;  %v888_v11 = vpop.f32.mrf.mxu1  ;;  %1540 = vrot.lane.b32.xlu0 %v6853_v12, %s6313_s5  ;;  %5575 = vmatprep.subr.msk.bf16.mxu1 %vm988_vm0, %v6853_v12  ;;  %v1011_v0 = vsel %vm988_vm0, %v6853_v12, 0  ;;  %v908_v9 = vmul.f32 0.17677669, %v765_v58  ;;  %v905_v33 = vmul.f32 0.17677669, %v749_v48 }
 0x297   :  { %v889_v35 = vadd.f32 %v888_v11, %v6826_v31  ;;  %v768_v6 = vpop.f32.mrf.mxu0  ;;  %5240 = vmatpush3.bf16.xpose.msra.mxu1 %v1011_v0 }
 0x298   :  { %v769_v7 = vadd.f32 %v768_v6, %v6778_v10  ;;  %5576 = vmatprep.subr.msk.bf16.mxu1 %vm988_vm0, %v6836_v62  ;;  %v857_v6 = vadd.f32 %v6822_v30, %v6826_v31 }
 0x299   :  { %v6870_v55 = vpack.c.bf16 %v889_v35, %v886_v17  ;;  %v6872_v45 = vpop.f32.mrf.mxu0  ;;  %v904_v35 = vmul.f32 0.17677669, %v745_v36 }
 0x29a   :  { %v909_v20 = vmul.f32 0.17677669, %v769_v7  ;;  %v6927_v7 = vpack.c.bf16 %v903_v2, %v902_v40  ;;  %v771_v46 = vadd.f32 %v6872_v45, %v6784_v63 }
 0x29b   :  { %8611 = vst [vmem:[#allocation29_spill] sm:$0xff] %v6870_v55  ;;  %v6874_v21 = vpop.f32.mrf.mxu0 }
 0x29c   :  { %v6876_v14 = vpack.c.bf16 %v909_v20, %v908_v9  ;;  %8614 = vst [vmem:[#allocation32_spill] sm:$0xff] %v6927_v7  ;;  %v854_v20 = vadd.f32 %v6813_v52, %v6826_v31  ;;  %v907_v52 = vmul.f32 0.17677669, %v759_v53 }
 0x29d   :  { %v6878_v15 = vpop.f32.mrf.mxu0 }
 0x29e   :  { %5263 = vmatprep.mubr.msk.bf16.mxu0 %vm988_vm0, %v6876_v14  ;;  %v777_v1 = vadd.f32 %v6878_v15, %v6784_v63 }
 0x29f   :  { %v6884_v27 = vpop.f32.mrf.mxu0  ;;  %5242 = vmatpush3.bf16.xpose.msra.mxu1 %v1008_v28  ;;  %v6935_v28 = vpack.c.bf16 %v905_v33, %v904_v35 }
 0x2a0   :  { %5577 = vmatprep.subr.msk.bf16.mxu1 %vm988_vm0, %v6818_v25 }
 0x2a1   :  { %v780_v60 = vpop.f32.mrf.mxu0 }
 0x2a3   :  { %v6888_v34 = vpop.f32.mrf.mxu0 }
 0x2a5   :  { %v786_v54 = vpop.f32.mrf.mxu0 }
 0x2a6   :  { %v787_v38 = vadd.f32 %v786_v54, %v6784_v63  ;;  %v755_v54 = vadd.f32 %v6834_v37, %v6778_v10  ;;  %v846_v37 = vadd.f32 %v6787_v13, %v6826_v31  ;;  %v838_v13 = vadd.f32 %v6791_v23, %v6826_v31 }
 0x2a7   :  { %v6892_v59 = vpop.f32.mrf.mxu0  ;;  %5244 = vmatpush3.bf16.xpose.msra.mxu1 %v1005_v16  ;;  %v6947_v16 = vpack.c.bf16 %v857_v6, %v854_v20  ;;  %v894_v23 = vadd.f32 %v6846_v5, %v6826_v31  ;;  %v779_v5 = vadd.f32 %v6884_v27, %v6778_v10 }
 0x2a8   :  { %5578 = vmatprep.subr.msk.bf16.mxu1 %vm988_vm0, %v6797_v19  ;;  %v906_v22 = vmul.f32 0.17677669, %v755_v54  ;;  %v6974_v39 = vpack.c.bf16 %v841_v32, %v838_v13  ;;  %v789_v45 = vadd.f32 %v6892_v59, %v6778_v10  ;;  %v941_v32 = vld [vmem:[#allocation5 + $0x8] sm:$0xff] }
 0x2a9   :  { %v790_v61 = vpop.f32.mrf.mxu0  ;;  %8616 = vst [vmem:[#allocation34_spill] sm:$0xff] %v6947_v16  ;;  %v6988_v15 = vpack.c.bf16 %v897_v56, %v894_v23  ;;  %v911_v36 = vmul.f32 0.17677669, %v779_v5  ;;  %vm957_vm5 = vcmp.ne.s32.totalorder %v941_v32, 0 }
 0x2aa   :  { %v791_v41 = vadd.f32 %v790_v61, %v6784_v63  ;;  %v6959_v61 = vpack.c.bf16 %v849_v43, %v846_v37  ;;  %8618 = vst [vmem:[#allocation36_spill] sm:$0xff] %v6974_v39  ;;  %v913_v2 = vmul.f32 0.17677669, %v789_v45  ;;  %v940_v43 = vld [vmem:[#allocation5] sm:$0xff]  ;;  %v6314_v37 = vmov -1e+09  }
 0x2ab   :  { %v6900_v42 = vpop.f32.mrf.mxu0  ;;  %8619 = vst [vmem:[#allocation37_spill] sm:$0xff] %v6988_v15  ;;  %vm956_vm2 = vcmp.ne.s32.totalorder %v940_v43, 0  ;;  %v7054_v45 = vsel %vm957_vm5, 0.0, %v6314_v37 }
 0x2ac   :  { %v6906_v8 = vpack.c.bf16 %v791_v41, %v787_v38  ;;  %8617 = vst [vmem:[#allocation35_spill] sm:$0xff] %v6959_v61  ;;  %v781_v38 = vadd.f32 %v780_v60, %v6784_v63  ;;  %v6964_v41 = vpack.c.bf16 %v907_v52, %v906_v22  ;;  %v943_v52 = vld [vmem:[#allocation5 + $0x18] sm:$0xff]  ;;  %v7040_v13 = vsel %vm956_vm2, 0.0, %v6314_v37  ;;  %8624 = vst [vmem:[#allocation42_spill] sm:$0xff] %v7054_v45 }
 0x2ad   :  { %v796_v49 = vpop.f32.mrf.mxu0  ;;  %vm959_vm3 = vcmp.ne.s32.totalorder %v943_v52, 0  ;;  %8622 = vst [vmem:[#allocation40_spill] sm:$0xff] %v7040_v13 }
 0x2ae   :  { %8612 = vst [vmem:[#allocation30_spill] sm:$0xff] %v6906_v8  ;;  %1651 = vrot.lane.b32.xlu1 %v6906_v8, %s6313_s5  ;;  %v797_v11 = vadd.f32 %v796_v49, %v6784_v63  ;;  %v6978_v60 = vpack.c.bf16 %v781_v38, %v777_v1  ;;  %v1097_v48 = vsel %vm988_vm0, %v6906_v8, 0  ;;  %v767_v49 = vadd.f32 %v6857_v50, %v6784_v63  ;;  %v946_v1 = vld [vmem:[#allocation5 + $0x30] sm:$0xff] }
 0x2af   :  { %v6920_v17 = vpop.f32.mrf.mxu0  ;;  %5246 = vmatpush3.bf16.xpose.msra.mxu1 %v1002_v24  ;;  %v785_v24 = vadd.f32 %v6888_v34, %v6778_v10  ;;  %v7046_v23 = vsel %vm959_vm3, 0.0, %v6314_v37  ;;  %vm962_vm6 = vcmp.ne.s32.totalorder %v946_v1, 0  ;;  %v950_v1 = vld [vmem:[#allocation5 + $0x50] sm:$0xff] }
 0x2b0   :  { %5271 = vmatprep.subr.bf16.mxu1 %v6912_v57  ;;  %v6996_v29 = vpack.c.bf16 %v771_v46, %v767_v49  ;;  %v1094_v31 = vsel %vm988_vm0, %v6978_v60, 0  ;;  %v799_v27 = vadd.f32 %v6920_v17, %v6778_v10  ;;  %8623 = vst [vmem:[#allocation41_spill] sm:$0xff] %v7046_v23  ;;  %v944_v46 = vld [vmem:[#allocation5 + $0x20] sm:$0xff]  ;;  %vm966_vm10 = vcmp.ne.s32.totalorder %v950_v1, 0 }
 0x2b1   :  { %v800_v58 = vpop.f32.mrf.mxu0  ;;  %vm960_vm7 = vcmp.ne.s32.totalorder %v944_v46, 0  ;;  %v951_v46 = vld [vmem:[#allocation5 + $0x58] sm:$0xff] }
 0x2b2   :  { %v801_v0 = vadd.f32 %v800_v58, %v6784_v63  ;;  %v775_v63 = vadd.f32 %v6874_v21, %v6778_v10  ;;  %v1091_v50 = vsel %vm988_vm0, %v6996_v29, 0  ;;  %v912_v58 = vmul.f32 0.17677669, %v785_v24 }
 0x2b3   :  { %v795_v21 = vadd.f32 %v6900_v42, %v6778_v10  ;;  %v915_v34 = vmul.f32 0.17677669, %v799_v27  ;;  %vm967_vm12 = vcmp.ne.s32.totalorder %v951_v46, 0 }
 0x2b4   :  { %v6931_v9 = vpack.c.bf16 %v801_v0, %v797_v11  ;;  %v910_v33 = vmul.f32 0.17677669, %v775_v63  ;;  %v7016_v59 = vpack.c.bf16 %v913_v2, %v912_v58  ;;  %v947_v63 = vld [vmem:[#allocation5 + $0x38] sm:$0xff]  ;;  %v945_v2 = vld [vmem:[#allocation5 + $0x28] sm:$0xff] }
 0x2b5   :  { %v914_v11 = vmul.f32 0.17677669, %v795_v21  ;;  %vm963_vm8 = vcmp.ne.s32.totalorder %v947_v63, 0  ;;  %vm961_vm9 = vcmp.ne.s32.totalorder %v945_v2, 0  ;;  %v954_v2 = vld [vmem:[#allocation5 + $0x70] sm:$0xff] }
 0x2b6   :  { %8615 = vst [vmem:[#allocation33_spill] sm:$0xff] %v6931_v9  ;;  %5248 = vmatmul.mubr.msk.bf16.vlgmr.msra.gmra.mxu1 %vm988_vm0, %v6927_v7  ;;  %1653 = vrot.lane.b32.xlu1 %v6931_v9, %s6313_s5  ;;  %v1100_v30 = vsel %vm988_vm0, %v6931_v9, 0  ;;  %v7012_v40 = vpack.c.bf16 %v911_v36, %v910_v33  ;;  %8620 = vst [vmem:[#allocation38_spill] sm:$0xff] %v7016_v59  ;;  %v7060_v36 = vsel %vm962_vm6, 0.0, %v6314_v37  ;;  %vm970_vm14 = vcmp.ne.s32.totalorder %v954_v2, 0 }
 0x2b7   :  { %5579 = vmatprep.subr.msk.bf16.mxu0 %vm988_vm0, %v6931_v9  ;;  %5251 = vmatprep.mubr.msk.bf16.mxu1 %vm988_vm0, %v6935_v28  ;;  %v7024_v0 = vpack.c.bf16 %v915_v34, %v914_v11  ;;  %8625 = vst [vmem:[#allocation43_spill] sm:$0xff] %v7060_v36  ;;  %v7070_v34 = vsel %vm960_vm7, 0.0, %v6314_v37  ;;  %v7124_v1 = vsel %vm970_vm14, 0.0, %v6314_v37 }
 0x2b8   :  { %5256 = vmatpush3.bf16.xpose.msra.mxu0 %v1100_v30  ;;  %5272 = vmatpush3.bf16.msra.mxu1 %v6912_v57  ;;  %v942_v30 = vld [vmem:[#allocation5 + $0x10] sm:$0xff]  ;;  %8626 = vst [vmem:[#allocation44_spill] sm:$0xff] %v7070_v34  ;;  %8633 = vst [vmem:[#allocation51_spill] sm:$0xff] %v7124_v1 }
 0x2b9   :  { %5580 = vmatprep.subr.msk.bf16.mxu0 %vm988_vm0, %v6906_v8  ;;  %5273 = vmatprep.subr.bf16.mxu1 %v6947_v16  ;;  %vm958_vm1 = vcmp.ne.s32.totalorder %v942_v30, 0 }
 0x2ba   :  { %v7037_v22 = vsel %vm958_vm1, 0.0, %v6314_v37 }
 0x2bb   :  { %8621 = vst [vmem:[#allocation39_spill] sm:$0xff] %v7037_v22 }
 0x2bc   :  { %5274 = vmatpush3.bf16.msra.mxu1 %v6947_v16 }
 0x2bd   :  { %5275 = vmatprep.subr.bf16.mxu1 %v6959_v61 }
 0x2be   :  { %5252 = vmatmul.mubr.msk.bf16.gmra.mxu1 %vm988_vm0, %v6964_v41 }
 0x2c0   :  { %5258 = vmatpush3.bf16.xpose.msra.mxu0 %v1097_v48  ;;  %5276 = vmatpush3.bf16.msra.mxu1 %v6959_v61 }
 0x2c1   :  { %5581 = vmatprep.subr.msk.bf16.mxu0 %vm988_vm0, %v6978_v60  ;;  %5277 = vmatprep.subr.bf16.mxu1 %v6974_v39 }
 0x2c4   :  { %5278 = vmatpush3.bf16.msra.mxu1 %v6974_v39 }
 0x2c5   :  { %5287 = vmatprep.subr.bf16.mxu1 %v6988_v15 }
 0x2c8   :  { %5260 = vmatpush3.bf16.xpose.msra.mxu0 %v1094_v31 }
 0x2c9   :  { %5582 = vmatprep.subr.msk.bf16.mxu0 %vm988_vm0, %v6996_v29 }
 0x2d0   :  { %5262 = vmatpush3.bf16.xpose.msra.mxu0 %v1091_v50 }
 0x2d7   :  { %5264 = vmatmul.mubr.msk.bf16.vlgmr.msra.gmra.mxu0 %vm988_vm0, %v7012_v40 }
 0x2d8   :  { %5267 = vmatprep.mubr.msk.bf16.mxu0 %vm988_vm0, %v7016_v59 }
 0x2df   :  { %5268 = vmatmul.mubr.msk.bf16.gmra.mxu0 %vm988_vm0, %v7024_v0 }
 0x2f0   :  { %v1535_v17 = vpop.permute.xlu1 %1534 }
 0x2f1   :  { %v1555_v54 = vsel %vm988_vm0, %v1535_v17, 0 }
 0x2f8   :  { %v1537_v35 = vpop.permute.xlu0 %1536 }
 0x2f9   :  { %v1558_v20 = vsel %vm988_vm0, %v1537_v35, 0 }
 0x300   :  { %v1539_v42 = vpop.permute.xlu1 %1538 }
 0x301   :  { %v1561_v53 = vsel %vm988_vm0, %v1539_v42, 0 }
 0x308   :  { %v1541_v6 = vpop.permute.xlu0 %1540 }
 0x309   :  { %5583 = vmatprep.subr.msk.bf16.mxu0 %vm988_vm0, %v1541_v6  ;;  %v1564_v10 = vsel %vm988_vm0, %v1541_v6, 0 }
 0x30a   :  { %5304 = vmatpush3.bf16.xpose.msra.mxu0 %v1564_v10 }
 0x30b   :  { %5584 = vmatprep.subr.msk.bf16.mxu0 %vm988_vm0, %v1539_v42 }
 0x312   :  { %5306 = vmatpush3.bf16.xpose.msra.mxu0 %v1561_v53 }
 0x313   :  { %5585 = vmatprep.subr.msk.bf16.mxu0 %vm988_vm0, %v1537_v35 }
 0x31a   :  { %5308 = vmatpush3.bf16.xpose.msra.mxu0 %v1558_v20  ;;  %v7086_v20 = vsel %vm961_vm9, 0.0, %v6314_v37 }
 0x31b   :  { %5586 = vmatprep.subr.msk.bf16.mxu0 %vm988_vm0, %v1535_v17  ;;  %v7076_v17 = vsel %vm963_vm8, 0.0, %v6314_v37  ;;  %8628 = vst [vmem:[#allocation46_spill] sm:$0xff] %v7086_v20 }
 0x31c   :  { %8627 = vst [vmem:[#allocation45_spill] sm:$0xff] %v7076_v17 }
 0x322   :  { %5310 = vmatpush3.bf16.xpose.msra.mxu0 %v1555_v54 }
 0x376   :  { %v5249_v38 = vpop.f32.mrf.mxu1 }
 0x377   :  { %v7043_v56 = vadd.f32 %v5249_v38, %v7037_v22 }
 0x378   :  { %v1047_v48 = vpop.f32.mrf.mxu1 }
 0x379   :  { %v7049_v49 = vadd.f32 %v1047_v48, %v7040_v13  ;;  %v1174_v31 = vsel %vm1167_vm4, %v7043_v56, -inf  ;;  %v948_v48 = vld [vmem:[#allocation5 + $0x40] sm:$0xff] }
 0x37a   :  { %1175 = vmax.xlane.f32.xlu0 %v1174_v31  ;;  %v5250_v5 = vpop.f32.mrf.mxu1  ;;  %vm964_vm11 = vcmp.ne.s32.totalorder %v948_v48, 0  ;;  %v7101_v31 = vsel %vm966_vm10, 0.0, %v6314_v37  ;;  %v953_v48 = vld [vmem:[#allocation5 + $0x68] sm:$0xff] }
 0x37b   :  { %v7057_v50 = vadd.f32 %v5250_v5, %v7046_v23  ;;  %v1168_v58 = vsel %vm1167_vm4, %v7049_v49, -inf  ;;  %8629 = vst [vmem:[#allocation47_spill] sm:$0xff] %v7101_v31  ;;  %v949_v5 = vld [vmem:[#allocation5 + $0x48] sm:$0xff]  ;;  %vm969_vm2 = vcmp.ne.s32.totalorder %v953_v48, 0 }
 0x37c   :  { %v1050_v24 = vpop.f32.mrf.mxu1  ;;  %vm965_vm13 = vcmp.ne.s32.totalorder %v949_v5, 0 }
 0x37d   :  { %v7063_v33 = vadd.f32 %v1050_v24, %v7054_v45  ;;  %v1177_v27 = vsel %vm1167_vm4, %v7057_v50, -inf  ;;  %v7104_v24 = vsel %vm964_vm11, 0.0, %v6314_v37 }
 0x37e   :  { %v5253_v21 = vpop.f32.mrf.mxu1  ;;  %1169 = vmax.xlane.f32.xlu0 %v1168_v58  ;;  %1178 = vmax.xlane.f32.xlu1 %v1177_v27  ;;  %8630 = vst [vmem:[#allocation48_spill] sm:$0xff] %v7104_v24 }
 0x37f   :  { %v7073_v11 = vadd.f32 %v5253_v21, %v7060_v36  ;;  %v1171_v42 = vsel %vm1167_vm4, %v7063_v33, -inf  ;;  %v7110_v21 = vsel %vm967_vm12, 0.0, %v6314_v37 }
 0x380   :  { %v1063_v35 = vpop.f32.mrf.mxu1  ;;  %8631 = vst [vmem:[#allocation49_spill] sm:$0xff] %v7110_v21 }
 0x381   :  { %v7079_v6 = vadd.f32 %v1063_v35, %v7070_v34  ;;  %v1186_v10 = vsel %vm1167_vm4, %v7073_v11, -inf  ;;  %v952_v35 = vld [vmem:[#allocation5 + $0x60] sm:$0xff] }
 0x382   :  { %v5254_v53 = vpop.f32.mrf.mxu1  ;;  %1187 = vmax.xlane.f32.xlu0 %v1186_v10  ;;  %1172 = vmax.xlane.f32.xlu1 %v1171_v42  ;;  %vm968_vm15 = vcmp.ne.s32.totalorder %v952_v35, 0 }
 0x383   :  { %v7089_v54 = vadd.f32 %v5254_v53, %v7076_v17  ;;  %v1180_v52 = vsel %vm1167_vm4, %v7079_v6, -inf }
 0x384   :  { %v1066_v30 = vpop.f32.mrf.mxu1 }
 0x385   :  { %v7092_v43 = vadd.f32 %v1066_v30, %v7086_v20  ;;  %v1189_v32 = vsel %vm1167_vm4, %v7089_v54, -inf  ;;  %v7118_v30 = vsel %vm965_vm13, 0.0, %v6314_v37 }
 0x386   :  { %1181 = vmax.xlane.f32.xlu0 %v1180_v52  ;;  %1190 = vmax.xlane.f32.xlu1 %v1189_v32  ;;  %8632 = vst [vmem:[#allocation50_spill] sm:$0xff] %v7118_v30  ;;  %v955_v52 = vld [vmem:[#allocation5 + $0x78] sm:$0xff] }
 0x387   :  { %v1183_v38 = vsel %vm1167_vm4, %v7092_v43, -inf  ;;  %vm971_vm1 = vcmp.ne.s32.totalorder %v955_v52, 0 }
 0x38a   :  { %1184 = vmax.xlane.f32.xlu1 %v1183_v38 }
 0x397   :  { %v5265_v63 = vpop.f32.mrf.mxu0 }
 0x398   :  { %v7107_v58 = vadd.f32 %v5265_v63, %v7101_v31 }
 0x399   :  { %v1136_v27 = vpop.f32.mrf.mxu0 }
 0x39a   :  { %v7113_v10 = vadd.f32 %v1136_v27, %v7104_v24  ;;  %v1198_v42 = vsel %vm1167_vm4, %v7107_v58, -inf  ;;  %v7134_v27 = vsel %vm968_vm15, 0.0, %v6314_v37 }
 0x39b   :  { %1199 = vmax.xlane.f32.xlu0 %v1198_v42  ;;  %v5266_v53 = vpop.f32.mrf.mxu0  ;;  %8634 = vst [vmem:[#allocation52_spill] sm:$0xff] %v7134_v27 }
 0x39c   :  { %v7121_v32 = vadd.f32 %v5266_v53, %v7110_v21  ;;  %v1192_v63 = vsel %vm1167_vm4, %v7113_v10, -inf  ;;  %v7140_v53 = vsel %vm971_vm1, 0.0, %v6314_v37 }
 0x39d   :  { %v1139_v38 = vpop.f32.mrf.mxu0  ;;  %8635 = vst [vmem:[#allocation53_spill] sm:$0xff] %v7140_v53 }
 0x39e   :  { %v7127_v46 = vadd.f32 %v1139_v38, %v7118_v30  ;;  %v1201_v5 = vsel %vm1167_vm4, %v7121_v32, -inf }
 0x39f   :  { %1202 = vmax.xlane.f32.xlu1 %v1201_v5  ;;  %1193 = vmax.xlane.f32.xlu0 %v1192_v63  ;;  %v5269_v2 = vpop.f32.mrf.mxu0 }
 0x3a0   :  { %v7137_v35 = vadd.f32 %v5269_v2, %v7124_v1  ;;  %v1195_v52 = vsel %vm1167_vm4, %v7127_v46, -inf  ;;  %v7150_v2 = vsel %vm969_vm2, 0.0, %v6314_v37 }
 0x3a1   :  { %v1152_v42 = vpop.f32.mrf.mxu0  ;;  %8636 = vst [vmem:[#allocation54_spill] sm:$0xff] %v7150_v2 }
 0x3a2   :  { %v7143_v38 = vadd.f32 %v1152_v42, %v7134_v27  ;;  %v1210_v5 = vsel %vm1167_vm4, %v7137_v35, -inf }
 0x3a3   :  { %1196 = vmax.xlane.f32.xlu1 %v1195_v52  ;;  %1211 = vmax.xlane.f32.xlu0 %v1210_v5  ;;  %v5270_v63 = vpop.f32.mrf.mxu0 }
 0x3a4   :  { %v7153_v48 = vadd.f32 %v5270_v63, %v7140_v53  ;;  %v1204_v47 = vsel %vm1167_vm4, %v7143_v38, -inf }
 0x3a5   :  { %v1155_v51 = vpop.f32.mrf.mxu0 }
 0x3a6   :  { %v7156_v44 = vadd.f32 %v1155_v51, %v7150_v2  ;;  %v1213_v42 = vsel %vm1167_vm4, %v7153_v48, -inf  ;;  %v7168_v51 = vpop.permute.xlu1 %1651 }
 0x3a7   :  { %1214 = vmax.xlane.f32.xlu1 %v1213_v42  ;;  %1205 = vmax.xlane.f32.xlu0 %v1204_v47 }
 0x3a8   :  { %v1207_v52 = vsel %vm1167_vm4, %v7156_v44, -inf }
 0x3aa   :  { %v7170_v37 = vpop.permute.xlu1 %1653 }
 0x3ab   :  { %1208 = vmax.xlane.f32.xlu1 %v1207_v52 }
 0x3bc   :  { %1524 = vrot.lane.b32.xlu1 %v6927_v7, %s6313_s5 }
 0x3bd   :  { %1522 = vrot.lane.b32.xlu0 %v6795_v26, %s6313_s5 }
 0x403   :  { %v1176_v5 = vpop.xlane.xlu0 %1175 }
 0x404   :  { %v1218_v63 = vsub.f32 %v7043_v56, %v1176_v5 }
 0x406   :  { %v1236_v3 = vmul.f32 1.442695, %v1218_v63 }
 0x407   :  { %v1179_v42 = vpop.xlane.xlu1 %1178  ;;  %v1170_v47 = vpop.xlane.xlu0 %1169 }
 0x408   :  { %5770 = vpow2.f32 %v1236_v3  ;;  %v1219_v19 = vsub.f32 %v7057_v50, %v1179_v42  ;;  %v1216_v52 = vsub.f32 %v7049_v49, %v1170_v47 }
 0x40a   :  { %v1238_v8 = vmul.f32 1.442695, %v1219_v19  ;;  %v1232_v7 = vmul.f32 1.442695, %v1216_v52 }
 0x40b   :  { %v1173_v25 = vpop.xlane.xlu1 %1172  ;;  %v1188_v9 = vpop.xlane.xlu0 %1187 }
 0x40c   :  { %5772 = vpow2.f32 %v1238_v8  ;;  %v1217_v26 = vsub.f32 %v7063_v33, %v1173_v25  ;;  %v1222_v12 = vsub.f32 %v7073_v11, %v1188_v9 }
 0x40d   :  { %5774 = vpow2.f32 %v1232_v7 }
 0x40e   :  { %v1234_v62 = vmul.f32 1.442695, %v1217_v26  ;;  %v1244_v56 = vmul.f32 1.442695, %v1222_v12 }
 0x40f   :  { %v1191_v5 = vpop.xlane.xlu1 %1190  ;;  %v1182_v63 = vpop.xlane.xlu0 %1181 }
 0x410   :  { %5776 = vpow2.f32 %v1234_v62  ;;  %v1223_v3 = vsub.f32 %v7089_v54, %v1191_v5  ;;  %v1220_v50 = vsub.f32 %v7079_v6, %v1182_v63 }
 0x411   :  { %5778 = vpow2.f32 %v1244_v56 }
 0x412   :  { %v1246_v19 = vmul.f32 1.442695, %v1223_v3  ;;  %v1240_v49 = vmul.f32 1.442695, %v1220_v50 }
 0x413   :  { %v1185_v42 = vpop.xlane.xlu1 %1184 }
 0x414   :  { %5780 = vpow2.f32 %v1246_v19  ;;  %v1221_v8 = vsub.f32 %v7092_v43, %v1185_v42 }
 0x415   :  { %v7180_v25 = vpop.eup %5770  ;;  %5782 = vpow2.f32 %v1240_v49 }
 0x416   :  { %v1242_v7 = vmul.f32 1.442695, %v1221_v8  ;;  %v1270_v26 = vsel %vm1167_vm4, %v7180_v25, 0.0 }
 0x417   :  { %1271 = vadd.xlane.f32.xlu0 %v1270_v26 }
 0x418   :  { %5784 = vpow2.f32 %v1242_v7 }
 0x419   :  { %v7184_v62 = vpop.eup %5772 }
 0x41a   :  { %v7186_v12 = vpop.eup %5774  ;;  %v1273_v9 = vsel %vm1167_vm4, %v7184_v62, 0.0 }
 0x41b   :  { %1274 = vadd.xlane.f32.xlu1 %v1273_v9  ;;  %v1264_v33 = vsel %vm1167_vm4, %v7186_v12, 0.0 }
 0x41c   :  { %1265 = vadd.xlane.f32.xlu0 %v1264_v33 }
 0x41d   :  { %v7192_v11 = vpop.eup %5776 }
 0x41e   :  { %v7194_v6 = vpop.eup %5778  ;;  %v1267_v54 = vsel %vm1167_vm4, %v7192_v11, 0.0 }
 0x41f   :  { %1268 = vadd.xlane.f32.xlu1 %v1267_v54  ;;  %v1282_v43 = vsel %vm1167_vm4, %v7194_v6, 0.0 }
 0x420   :  { %1283 = vadd.xlane.f32.xlu0 %v1282_v43 }
 0x421   :  { %v7200_v47 = vpop.eup %5780 }
 0x422   :  { %v7202_v52 = vpop.eup %5782  ;;  %v1285_v56 = vsel %vm1167_vm4, %v7200_v47, 0.0 }
 0x423   :  { %1286 = vadd.xlane.f32.xlu1 %v1285_v56  ;;  %v1276_v5 = vsel %vm1167_vm4, %v7202_v52, 0.0 }
 0x424   :  { %1277 = vadd.xlane.f32.xlu0 %v1276_v5  ;;  %v1200_v63 = vpop.xlane.xlu0 %1199 }
 0x425   :  { %v7208_v3 = vpop.eup %5784  ;;  %v1226_v50 = vsub.f32 %v7107_v58, %v1200_v63 }
 0x426   :  { %v1279_v19 = vsel %vm1167_vm4, %v7208_v3, 0.0 }
 0x427   :  { %v1252_v49 = vmul.f32 1.442695, %v1226_v50  ;;  %1280 = vadd.xlane.f32.xlu1 %v1279_v19 }
 0x428   :  { %v1203_v42 = vpop.xlane.xlu1 %1202  ;;  %v1194_v8 = vpop.xlane.xlu0 %1193 }
 0x429   :  { %5786 = vpow2.f32 %v1252_v49  ;;  %v1227_v7 = vsub.f32 %v7121_v32, %v1203_v42  ;;  %v1224_v26 = vsub.f32 %v7113_v10, %v1194_v8 }
 0x42b   :  { %v1254_v9 = vmul.f32 1.442695, %v1227_v7  ;;  %v1248_v33 = vmul.f32 1.442695, %v1224_v26 }
 0x42c   :  { %v1197_v54 = vpop.xlane.xlu1 %1196  ;;  %v1212_v43 = vpop.xlane.xlu0 %1211 }
 0x42d   :  { %5788 = vpow2.f32 %v1254_v9  ;;  %v1225_v56 = vsub.f32 %v7127_v46, %v1197_v54 }
 0x42e   :  { %5790 = vpow2.f32 %v1248_v33  ;;  %v1230_v33 = vsub.f32 %v7137_v35, %v1212_v43 }
 0x42f   :  { %v1250_v58 = vmul.f32 1.442695, %v1225_v56 }
 0x430   :  { %v1215_v5 = vpop.xlane.xlu1 %1214  ;;  %v1206_v63 = vpop.xlane.xlu0 %1205  ;;  %v1260_v56 = vmul.f32 1.442695, %v1230_v33 }
 0x431   :  { %5792 = vpow2.f32 %v1250_v58  ;;  %v1228_v54 = vsub.f32 %v7143_v38, %v1206_v63 }
 0x432   :  { %5794 = vpow2.f32 %v1260_v56 }
 0x434   :  { %v1209_v50 = vpop.xlane.xlu1 %1208  ;;  %v1523_v19 = vpop.permute.xlu0 %1522 }
 0x435   :  { %5311 = vmatprep.mubr.msk.bf16.mxu0 %vm988_vm0, %v1523_v19  ;;  %v1229_v58 = vsub.f32 %v7156_v44, %v1209_v50  ;;  %v1231_v19 = vsub.f32 %v7153_v48, %v1215_v5 }
 0x436   :  { %v7217_v49 = vpop.eup %5786 }
 0x437   :  { %v1294_v10 = vsel %vm1167_vm4, %v7217_v49, 0.0 }
 0x438   :  { %v1525_v32 = vpop.permute.xlu1 %1524  ;;  %1295 = vadd.xlane.f32.xlu0 %v1294_v10  ;;  %v1256_v10 = vmul.f32 1.442695, %v1228_v54 }
 0x439   :  { %5312 = vmatmul.mubr.msk.bf16.vlgmr.msra.gmra.mxu0 %vm988_vm0, %v1525_v32  ;;  %v1258_v32 = vmul.f32 1.442695, %v1229_v58 }
 0x43a   :  { %v7222_v42 = vpop.eup %5788  ;;  %5796 = vpow2.f32 %v1256_v10 }
 0x43b   :  { %v7224_v46 = vpop.eup %5790  ;;  %v1297_v8 = vsel %vm1167_vm4, %v7222_v42, 0.0  ;;  %5798 = vpow2.f32 %v1258_v32 }
 0x43c   :  { %1298 = vadd.xlane.f32.xlu1 %v1297_v8  ;;  %v1288_v7 = vsel %vm1167_vm4, %v7224_v46, 0.0  ;;  %v1262_v8 = vmul.f32 1.442695, %v1231_v19 }
 0x43d   :  { %1289 = vadd.xlane.f32.xlu0 %v1288_v7 }
 0x43e   :  { %v7230_v26 = vpop.eup %5792  ;;  %5800 = vpow2.f32 %v1262_v8 }
 0x43f   :  { %v1291_v9 = vsel %vm1167_vm4, %v7230_v26, 0.0  ;;  %v7242_v7 = vpop.eup %5794 }
 0x440   :  { %1292 = vadd.xlane.f32.xlu1 %v1291_v9  ;;  %v1306_v35 = vsel %vm1167_vm4, %v7242_v7, 0.0 }
 0x447   :  { %v7244_v9 = vpop.eup %5796 }
 0x448   :  { %v7248_v38 = vpop.eup %5798  ;;  %v1300_v44 = vsel %vm1167_vm4, %v7244_v9, 0.0 }
 0x449   :  { %v1303_v43 = vsel %vm1167_vm4, %v7248_v38, 0.0 }
 0x44b   :  { %v7252_v48 = vpop.eup %5800 }
 0x44c   :  { %v1309_v5 = vsel %vm1167_vm4, %v7252_v48, 0.0 }
 0x451   :  { %1526 = vrot.lane.b32.xlu1 %v6935_v28, %s6313_s5 }
 0x453   :  { %1649 = vrot.lane.b32.xlu0 %v6978_v60, %s6313_s5 }
 0x472   :  { %1307 = vadd.xlane.f32.xlu0 %v1306_v35 }
 0x475   :  { %1301 = vadd.xlane.f32.xlu1 %v1300_v44 }
 0x476   :  { %1304 = vadd.xlane.f32.xlu0 %v1303_v43 }
 0x479   :  { %1310 = vadd.xlane.f32.xlu1 %v1309_v5 }
 0x48a   :  { %1647 = vrot.lane.b32.xlu1 %v6996_v29, %s6313_s5 }
 0x48c   :  { %1528 = vrot.lane.b32.xlu0 %v6964_v41, %s6313_s5 }
 0x48e   :  { %1637 = vrot.lane.b32.xlu1 %v7012_v40, %s6313_s5 }
 0x490   :  { %1635 = vrot.lane.b32.xlu0 %v6876_v14, %s6313_s5 }
 0x492   :  { %1641 = vrot.lane.b32.xlu1 %v7024_v0, %s6313_s5 }
 0x494   :  { %1639 = vrot.lane.b32.xlu0 %v7016_v59, %s6313_s5 }
 0x4a0   :  { %v1272_v63 = vpop.xlane.xlu0 %1271 }
 0x4a4   :  { %v1275_v50 = vpop.xlane.xlu1 %1274 }
 0x4a5   :  { %v1266_v33 = vpop.xlane.xlu0 %1265  ;;  %5802 = vrcp.f32 %v1275_v50 }
 0x4a6   :  { %5804 = vrcp.f32 %v1266_v33 }
 0x4a7   :  { %5806 = vrcp.f32 %v1272_v63 }
 0x4a8   :  { %v1269_v54 = vpop.xlane.xlu1 %1268 }
 0x4a9   :  { %5808 = vrcp.f32 %v1269_v54  ;;  %v1284_v56 = vpop.xlane.xlu0 %1283 }
 0x4ac   :  { %v1287_v58 = vpop.xlane.xlu1 %1286 }
 0x4ad   :  { %v1278_v19 = vpop.xlane.xlu0 %1277  ;;  %5810 = vrcp.f32 %v1287_v58 }
 0x4ae   :  { %5812 = vrcp.f32 %v1278_v19 }
 0x4af   :  { %5814 = vrcp.f32 %v1284_v56 }
 0x4b0   :  { %v1281_v10 = vpop.xlane.xlu1 %1280 }
 0x4b1   :  { %5816 = vrcp.f32 %v1281_v10 }
 0x4b2   :  { %v5803_v32 = vpop.eup %5802 }
 0x4b3   :  { %v5805_v8 = vpop.eup %5804  ;;  %v1331_v43 = vmul.f32 %v5803_v32, %v7184_v62 }
 0x4b4   :  { %v5807_v35 = vpop.eup %5806  ;;  %v1328_v5 = vmul.f32 %v5805_v8, %v7186_v12 }
 0x4b5   :  { %v1330_v50 = vmul.f32 %v5807_v35, %v7180_v25 }
 0x4b6   :  { %v5809_v44 = vpop.eup %5808 }
 0x4b7   :  { %v1329_v63 = vmul.f32 %v5809_v44, %v7192_v11  ;;  %v1345_v54 = vpack.c.bf16 %v1331_v43, %v1330_v50 }
 0x4b9   :  { %v1344_v33 = vpack.c.bf16 %v1329_v63, %v1328_v5 }
 0x4ba   :  { %v5811_v59 = vpop.eup %5810 }
 0x4bb   :  { %5279 = vmatprep.mubr.msk.bf16.mxu1 %vm1167_vm4, %v1344_v33  ;;  %v5813_v56 = vpop.eup %5812  ;;  %v1335_v62 = vmul.f32 %v5811_v59, %v7200_v47 }
 0x4bc   :  { %5280 = vmatmul.mubr.msk.bf16.vlgmr.msra.gmra.mxu1 %vm1167_vm4, %v1345_v54  ;;  %v5815_v58 = vpop.eup %5814  ;;  %v1332_v12 = vmul.f32 %v5813_v56, %v7202_v52 }
 0x4bd   :  { %5288 = vmatpush3.bf16.msra.mxu1 %v6988_v15  ;;  %v1334_v11 = vmul.f32 %v5815_v58, %v7194_v6  ;;  %v1677_v58 = vsel %vm988_vm0, %v7170_v37, 0 }
 0x4be   :  { %v5817_v19 = vpop.eup %5816  ;;  %5289 = vmatprep.subr.bf16.mxu1 %v6870_v55 }
 0x4bf   :  { %v1333_v25 = vmul.f32 %v5817_v19, %v7208_v3  ;;  %v1347_v8 = vpack.c.bf16 %v1335_v62, %v1334_v11 }
 0x4c1   :  { %5290 = vmatpush3.bf16.msra.mxu1 %v6870_v55  ;;  %v1296_v10 = vpop.xlane.xlu0 %1295  ;;  %v1346_v32 = vpack.c.bf16 %v1333_v25, %v1332_v12 }
 0x4c2   :  { %5291 = vmatprep.subr.bf16.mxu1 %v6841_v4 }
 0x4c3   :  { %5283 = vmatprep.mubr.msk.bf16.mxu1 %vm1167_vm4, %v1346_v32 }
 0x4c4   :  { %5284 = vmatmul.mubr.msk.bf16.gmra.mxu1 %vm1167_vm4, %v1347_v8 }
 0x4c5   :  { %v1299_v35 = vpop.xlane.xlu1 %1298  ;;  %5292 = vmatpush3.bf16.msra.mxu1 %v6841_v4 }
 0x4c6   :  { %v1290_v59 = vpop.xlane.xlu0 %1289  ;;  %5293 = vmatprep.subr.bf16.mxu1 %v6848_v18  ;;  %5818 = vrcp.f32 %v1299_v35 }
 0x4c7   :  { %5820 = vrcp.f32 %v1290_v59 }
 0x4c8   :  { %5822 = vrcp.f32 %v1296_v10 }
 0x4c9   :  { %v1293_v6 = vpop.xlane.xlu1 %1292  ;;  %5294 = vmatpush3.bf16.msra.mxu1 %v6848_v18 }
 0x4ca   :  { %5824 = vrcp.f32 %v1293_v6  ;;  %5587 = vmatprep.subr.msk.bf16.mxu1 %vm988_vm0, %v7170_v37 }
 0x4cd   :  { %v1527_v47 = vpop.permute.xlu1 %1526 }
 0x4ce   :  { %5315 = vmatprep.mubr.msk.bf16.mxu0 %vm988_vm0, %v1527_v47 }
 0x4d3   :  { %v5819_v52 = vpop.eup %5818 }
 0x4d4   :  { %v5821_v3 = vpop.eup %5820  ;;  %v1339_v5 = vmul.f32 %v5819_v52, %v7222_v42  ;;  %v1674_v42 = vsel %vm988_vm0, %v7168_v51, 0 }
 0x4d5   :  { %v5823_v44 = vpop.eup %5822  ;;  %v1336_v63 = vmul.f32 %v5821_v3, %v7224_v46  ;;  %v1650_v46 = vpop.permute.xlu0 %1649 }
 0x4d6   :  { %v1338_v33 = vmul.f32 %v5823_v44, %v7217_v49  ;;  %v1671_v49 = vsel %vm988_vm0, %v1650_v46, 0 }
 0x4d7   :  { %v5825_v43 = vpop.eup %5824 }
 0x4d8   :  { %v1337_v50 = vmul.f32 %v5825_v43, %v7230_v26  ;;  %v1349_v56 = vpack.c.bf16 %v1339_v5, %v1338_v33 }
 0x4da   :  { %v1348_v54 = vpack.c.bf16 %v1337_v50, %v1336_v63 }
 0x4dc   :  { %5295 = vmatprep.mubr.msk.bf16.mxu1 %vm1167_vm4, %v1348_v54 }
 0x4dd   :  { %5296 = vmatmul.mubr.msk.bf16.vlgmr.msra.gmra.mxu1 %vm1167_vm4, %v1349_v56 }
 0x4de   :  { %5320 = vmatpush3.bf16.xpose.msra.mxu1 %v1677_v58 }
 0x4df   :  { %5588 = vmatprep.subr.msk.bf16.mxu1 %vm988_vm0, %v7168_v51 }
 0x4e6   :  { %5322 = vmatpush3.bf16.xpose.msra.mxu1 %v1674_v42 }
 0x4e7   :  { %5589 = vmatprep.subr.msk.bf16.mxu1 %vm988_vm0, %v1650_v46 }
 0x4ee   :  { %5324 = vmatpush3.bf16.xpose.msra.mxu1 %v1671_v49 }
 0x4f9   :  { %v5313_v26 = vpop.f32.mrf.mxu0 }
 0x4fa   :  { %v7310_v25 = vadd.f32 %v5313_v26, %v7037_v22 }
 0x4fb   :  { %v1308_v19 = vpop.xlane.xlu0 %1307  ;;  %v1600_v62 = vpop.f32.mrf.mxu0 }
 0x4fc   :  { %v7307_v12 = vadd.f32 %v1600_v62, %v7040_v13  ;;  %v1750_v47 = vsel %vm1167_vm4, %v7310_v25, -inf }
 0x4fd   :  { %v5314_v37 = vpop.f32.mrf.mxu0 }
 0x4fe   :  { %v1302_v11 = vpop.xlane.xlu1 %1301  ;;  %v1744_v51 = vsel %vm1167_vm4, %v7307_v12, -inf  ;;  %v1612_v35 = vadd.f32 %v5314_v37, %v7046_v23 }
 0x4ff   :  { %5826 = vrcp.f32 %v1302_v11  ;;  %v1305_v10 = vpop.xlane.xlu0 %1304  ;;  %v1603_v32 = vpop.f32.mrf.mxu0  ;;  %1745 = vmax.xlane.f32.xlu0 %v1744_v51 }
 0x500   :  { %5828 = vrcp.f32 %v1305_v10  ;;  %v7315_v8 = vadd.f32 %v1603_v32, %v7054_v45  ;;  %v1753_v44 = vsel %vm1167_vm4, %v1612_v35, -inf }
 0x501   :  { %5830 = vrcp.f32 %v1308_v19 }
 0x502   :  { %v1311_v59 = vpop.xlane.xlu1 %1310  ;;  %v1747_v6 = vsel %vm1167_vm4, %v7315_v8, -inf }
 0x503   :  { %5832 = vrcp.f32 %v1311_v59  ;;  %v1529_v52 = vpop.permute.xlu0 %1528  ;;  %1748 = vmax.xlane.f32.xlu1 %v1747_v6  ;;  %1751 = vmax.xlane.f32.xlu0 %v1750_v47 }
 0x504   :  { %5316 = vmatmul.mubr.msk.bf16.gmra.mxu0 %vm988_vm0, %v1529_v52 }
 0x506   :  { %v1648_v3 = vpop.permute.xlu1 %1647 }
 0x507   :  { %1754 = vmax.xlane.f32.xlu0 %v1753_v44  ;;  %5590 = vmatprep.subr.msk.bf16.mxu1 %vm988_vm0, %v1648_v3  ;;  %v1668_v43 = vsel %vm988_vm0, %v1648_v3, 0  ;;  %v1636_v26 = vpop.permute.xlu0 %1635 }
 0x508   :  { %5326 = vmatpush3.bf16.xpose.msra.mxu1 %v1668_v43 }
 0x50a   :  { %v1638_v19 = vpop.permute.xlu1 %1637 }
 0x50b   :  { %v1640_v62 = vpop.permute.xlu0 %1639 }
 0x50c   :  { %v5827_v5 = vpop.eup %5826 }
 0x50d   :  { %v5829_v63 = vpop.eup %5828  ;;  %v1340_v50 = vmul.f32 %v5827_v5, %v7244_v9 }
 0x50e   :  { %v5831_v33 = vpop.eup %5830  ;;  %v1341_v54 = vmul.f32 %v5829_v63, %v7248_v38  ;;  %v1642_v9 = vpop.permute.xlu1 %1641 }
 0x50f   :  { %v1342_v42 = vmul.f32 %v5831_v33, %v7242_v7 }
 0x510   :  { %v5833_v56 = vpop.eup %5832  ;;  %v1350_v58 = vpack.c.bf16 %v1341_v54, %v1340_v50 }
 0x511   :  { %v1343_v46 = vmul.f32 %v5833_v56, %v7252_v48 }
 0x512   :  { %5299 = vmatprep.mubr.msk.bf16.mxu1 %vm1167_vm4, %v1350_v58 }
 0x513   :  { %v1351_v49 = vpack.c.bf16 %v1343_v46, %v1342_v42 }
 0x515   :  { %5300 = vmatmul.mubr.msk.bf16.gmra.mxu1 %vm1167_vm4, %v1351_v49 }
 0x516   :  { %5327 = vmatprep.mubr.msk.bf16.mxu1 %vm988_vm0, %v1636_v26 }
 0x51d   :  { %5328 = vmatmul.mubr.msk.bf16.vlgmr.msra.gmra.mxu1 %vm988_vm0, %v1638_v19 }
 0x51e   :  { %5331 = vmatprep.mubr.msk.bf16.mxu1 %vm988_vm0, %v1640_v62 }
 0x525   :  { %5332 = vmatmul.mubr.msk.bf16.gmra.mxu1 %vm988_vm0, %v1642_v9 }
 0x57c   :  { %v7336_v7 = vpop.f32.mrf.mxu1 }
 0x57e   :  { %v7338_v38 = vpop.f32.mrf.mxu1 }
 0x580   :  { %v7340_v48 = vpop.f32.mrf.mxu1 }
 0x582   :  { %v7344_v11 = vpop.f32.mrf.mxu1 }
 0x584   :  { %v7346_v51 = vpop.f32.mrf.mxu1 }
 0x586   :  { %v7348_v10 = vpop.f32.mrf.mxu1 }
 0x588   :  { %v7350_v32 = vpop.f32.mrf.mxu1  ;;  %v1746_v43 = vpop.xlane.xlu0 %1745 }
 0x589   :  { %v1792_v33 = vsub.f32 %v7307_v12, %v1746_v43 }
 0x58a   :  { %v7354_v6 = vpop.f32.mrf.mxu1 }
 0x58b   :  { %v1808_v42 = vmul.f32 1.442695, %v1792_v33 }
 0x58c   :  { %v1752_v5 = vpop.xlane.xlu0 %1751  ;;  %v1749_v58 = vpop.xlane.xlu1 %1748 }
 0x58d   :  { %v1794_v63 = vsub.f32 %v7310_v25, %v1752_v5  ;;  %v1793_v46 = vsub.f32 %v7315_v8, %v1749_v58 }
 0x58f   :  { %v1812_v54 = vmul.f32 1.442695, %v1794_v63  ;;  %v1810_v19 = vmul.f32 1.442695, %v1793_v46 }
 0x590   :  { %v1755_v50 = vpop.xlane.xlu0 %1754 }
 0x591   :  { %v1795_v56 = vsub.f32 %v1612_v35, %v1755_v50  ;;  %5834 = vpow2.f32 %v1812_v54 }
 0x592   :  { %5836 = vpow2.f32 %v1808_v42 }
 0x593   :  { %v1814_v49 = vmul.f32 1.442695, %v1795_v56 }
 0x595   :  { %5838 = vpow2.f32 %v1814_v49 }
 0x596   :  { %5840 = vpow2.f32 %v1810_v19 }
 0x59d   :  { %v7356_v47 = vpop.f32.mrf.mxu1 }
 0x59e   :  { %v7374_v50 = vpop.eup %5834 }
 0x59f   :  { %v7358_v52 = vpop.f32.mrf.mxu1  ;;  %v7376_v33 = vpop.eup %5836  ;;  %v1846_v56 = vsel %vm1167_vm4, %v7374_v50, 0.0 }
 0x5a0   :  { %v1840_v46 = vsel %vm1167_vm4, %v7376_v33, 0.0 }
 0x5a1   :  { %v7360_v3 = vpop.f32.mrf.mxu1 }
 0x5a2   :  { %v7381_v58 = vpop.eup %5838 }
 0x5a3   :  { %v1849_v49 = vsel %vm1167_vm4, %v7381_v58, 0.0 }
 0x5c4   :  { %v5317_v26 = vpop.f32.mrf.mxu0 }
 0x5c5   :  { %v1625_v25 = vadd.f32 %v5317_v26, %v7060_v36  ;;  %v5841_v26 = vpop.eup %5840 }
 0x5c6   :  { %v1616_v62 = vpop.f32.mrf.mxu0 }
 0x5c7   :  { %v1617_v9 = vadd.f32 %v1616_v62, %v7070_v34  ;;  %v1762_v63 = vsel %vm1167_vm4, %v1625_v25, -inf }
 0x5c8   :  { %v5318_v44 = vpop.f32.mrf.mxu0 }
 0x5c9   :  { %v1756_v12 = vsel %vm1167_vm4, %v1617_v9, -inf  ;;  %v1628_v8 = vadd.f32 %v5318_v44, %v7076_v17  ;;  %v7383_v44 = vpop.f32.mrf.mxu1 }
 0x5ca   :  { %v1619_v35 = vpop.f32.mrf.mxu0  ;;  %1757 = vmax.xlane.f32.xlu0 %v1756_v12  ;;  %v1843_v12 = vsel %vm1167_vm4, %v5841_v26, 0.0 }
 0x5cb   :  { %v1620_v43 = vadd.f32 %v1619_v35, %v7086_v20  ;;  %v1765_v54 = vsel %vm1167_vm4, %v1628_v8, -inf }
 0x5cd   :  { %v1759_v5 = vsel %vm1167_vm4, %v1620_v43, -inf }
 0x5ce   :  { %1760 = vmax.xlane.f32.xlu1 %v1759_v5  ;;  %1763 = vmax.xlane.f32.xlu0 %v1762_v63 }
 0x5d2   :  { %1766 = vmax.xlane.f32.xlu1 %v1765_v54  ;;  %1847 = vadd.xlane.f32.xlu0 %v1846_v56 }
 0x5d5   :  { %v7385_v42 = vpop.f32.mrf.mxu1 }
 0x5d6   :  { %1841 = vadd.xlane.f32.xlu0 %v1840_v46  ;;  %1850 = vadd.xlane.f32.xlu1 %v1849_v49 }
 0x5d7   :  { %v7391_v19 = vpop.f32.mrf.mxu1 }
 0x5d9   :  { %v7393_v62 = vpop.f32.mrf.mxu1 }
 0x5da   :  { %1844 = vadd.xlane.f32.xlu1 %v1843_v12 }
 0x5db   :  { %v7398_v54 = vpop.f32.mrf.mxu1 }
 0x5dd   :  { %v5329_v49 = vpop.f32.mrf.mxu1 }
 0x5df   :  { %v1713_v36 = vpop.f32.mrf.mxu1 }
 0x653   :  { %v1758_v5 = vpop.xlane.xlu0 %1757 }
 0x654   :  { %v1796_v63 = vsub.f32 %v1617_v9, %v1758_v5  ;;  %v5330_v5 = vpop.f32.mrf.mxu1 }
 0x656   :  { %v1816_v56 = vmul.f32 1.442695, %v1796_v63 }
 0x657   :  { %v1761_v59 = vpop.xlane.xlu1 %1760  ;;  %v1764_v37 = vpop.xlane.xlu0 %1763 }
 0x658   :  { %5842 = vpow2.f32 %v1816_v56  ;;  %v1797_v46 = vsub.f32 %v1620_v43, %v1761_v59  ;;  %v1798_v35 = vsub.f32 %v1625_v25, %v1764_v37  ;;  %v1722_v59 = vadd.f32 %v5329_v49, %v7101_v31  ;;  %v1716_v56 = vpop.f32.mrf.mxu1 }
 0x659   :  { %v1714_v37 = vadd.f32 %v1713_v36, %v7104_v24 }
 0x65a   :  { %v1818_v20 = vmul.f32 1.442695, %v1797_v46  ;;  %v1820_v43 = vmul.f32 1.442695, %v1798_v35  ;;  %v5333_v46 = vpop.f32.mrf.mxu1  ;;  %v1717_v35 = vadd.f32 %v1716_v56, %v7118_v30 }
 0x65b   :  { %v1767_v34 = vpop.xlane.xlu1 %1766  ;;  %v7400_v17 = vpop.xlane.xlu0 %1847  ;;  %v1738_v49 = vadd.f32 %v5333_v46, %v7124_v1 }
 0x65c   :  { %5844 = vpow2.f32 %v1818_v20  ;;  %v1799_v45 = vsub.f32 %v1628_v8, %v1767_v34  ;;  %v1774_v8 = vsel %vm1167_vm4, %v1722_v59, -inf }
 0x65e   :  { %v1822_v9 = vmul.f32 1.442695, %v1799_v45  ;;  %v1725_v45 = vadd.f32 %v5330_v5, %v7110_v21 }
 0x65f   :  { %v7402_v23 = vpop.xlane.xlu1 %1850  ;;  %v1842_v12 = vpop.xlane.xlu0 %1841 }
 0x660   :  { %5846 = vrcp.f32 %v1842_v12  ;;  %v1777_v12 = vsel %vm1167_vm4, %v1725_v45, -inf }
 0x663   :  { %v1845_v63 = vpop.xlane.xlu1 %1844 }
 0x664   :  { %5848 = vrcp.f32 %v1845_v63  ;;  %v1729_v63 = vpop.f32.mrf.mxu1 }
 0x665   :  { %v7404_v13 = vpop.eup %5842  ;;  %5850 = vpow2.f32 %v1822_v9  ;;  %v1768_v9 = vsel %vm1167_vm4, %v1714_v37, -inf }
 0x666   :  { %v1852_v20 = vsel %vm1167_vm4, %v7404_v13, 0.0  ;;  %5852 = vpow2.f32 %v1820_v43  ;;  %v1771_v43 = vsel %vm1167_vm4, %v1717_v35, -inf }
 0x667   :  { %1853 = vadd.xlane.f32.xlu0 %v1852_v20  ;;  %v1730_v20 = vadd.f32 %v1729_v63, %v7134_v27 }
 0x669   :  { %v7409_v34 = vpop.eup %5844 }
 0x66a   :  { %v1855_v25 = vsel %vm1167_vm4, %v7409_v34, 0.0 }
 0x66b   :  { %1856 = vadd.xlane.f32.xlu1 %v1855_v25  ;;  %1775 = vmax.xlane.f32.xlu0 %v1774_v8  ;;  %v1786_v25 = vsel %vm1167_vm4, %v1738_v49, -inf }
 0x66d   :  { %v5847_v36 = vpop.eup %5846 }
 0x66e   :  { %v1904_v8 = vmul.f32 %v5847_v36, %v7376_v33 }
 0x66f   :  { %1778 = vmax.xlane.f32.xlu1 %v1777_v12  ;;  %1769 = vmax.xlane.f32.xlu0 %v1768_v9  ;;  %v1780_v9 = vsel %vm1167_vm4, %v1730_v20, -inf }
 0x671   :  { %v5849_v5 = vpop.eup %5848 }
 0x672   :  { %v1905_v56 = vmul.f32 %v5849_v5, %v5841_v26  ;;  %v7424_v22 = vpop.eup %5850  ;;  %v5334_v26 = vpop.f32.mrf.mxu1 }
 0x673   :  { %1772 = vmax.xlane.f32.xlu1 %v1771_v43  ;;  %1787 = vmax.xlane.f32.xlu0 %v1786_v25  ;;  %v1861_v12 = vsel %vm1167_vm4, %v7424_v22, 0.0  ;;  %v7430_v1 = vpop.eup %5852  ;;  %v7443_v36 = vadd.f32 %v5334_v26, %v7140_v53 }
 0x674   :  { %v1920_v46 = vpack.c.bf16 %v1905_v56, %v1904_v8  ;;  %v1858_v33 = vsel %vm1167_vm4, %v7430_v1, 0.0  ;;  %v1732_v63 = vpop.f32.mrf.mxu1 }
 0x675   :  { %v7446_v5 = vadd.f32 %v1732_v63, %v7150_v2  ;;  %v1789_v43 = vsel %vm1167_vm4, %v7443_v36, -inf }
 0x676   :  { %5343 = vmatprep.mubr.msk.bf16.mxu0 %vm1167_vm4, %v1920_v46 }
 0x677   :  { %1862 = vadd.xlane.f32.xlu1 %v1861_v12  ;;  %1781 = vmax.xlane.f32.xlu0 %v1780_v9  ;;  %v1783_v25 = vsel %vm1167_vm4, %v7446_v5, -inf }
 0x67b   :  { %1859 = vadd.xlane.f32.xlu0 %v1858_v33 }
 0x688   :  { %1936 = vrot.lane.b32.xlu1 %v6947_v16, %s6313_s5 }
 0x691   :  { %1938 = vrot.lane.b32.xlu0 %v6912_v57, %s6313_s5 }
 0x695   :  { %1934 = vrot.lane.b32.xlu0 %v6959_v61, %s6313_s5 }
 0x699   :  { %1932 = vrot.lane.b32.xlu0 %v6974_v39, %s6313_s5 }
 0x6ac   :  { %1790 = vmax.xlane.f32.xlu1 %v1789_v43 }
 0x6b0   :  { %1784 = vmax.xlane.f32.xlu1 %v1783_v25 }
 0x6c1   :  { %2031 = vrot.lane.b32.xlu1 %v6988_v15, %s6313_s5 }
 0x6c5   :  { %2029 = vrot.lane.b32.xlu1 %v6870_v55, %s6313_s5 }
 0x6f0   :  { %v1854_v8 = vpop.xlane.xlu0 %1853 }
 0x6f4   :  { %v1857_v56 = vpop.xlane.xlu1 %1856  ;;  %v1776_v46 = vpop.xlane.xlu0 %1775 }
 0x6f5   :  { %v1802_v12 = vsub.f32 %v1722_v59, %v1776_v46 }
 0x6f7   :  { %v1828_v9 = vmul.f32 1.442695, %v1802_v12 }
 0x6f8   :  { %v1779_v33 = vpop.xlane.xlu1 %1778  ;;  %v1770_v26 = vpop.xlane.xlu0 %1769 }
 0x6f9   :  { %5854 = vpow2.f32 %v1828_v9  ;;  %v1803_v63 = vsub.f32 %v1725_v45, %v1779_v33  ;;  %v1800_v43 = vsub.f32 %v1714_v37, %v1770_v26 }
 0x6fb   :  { %v1824_v39 = vmul.f32 1.442695, %v1800_v43  ;;  %v1830_v61 = vmul.f32 1.442695, %v1803_v63 }
 0x6fc   :  { %v1773_v16 = vpop.xlane.xlu1 %1772  ;;  %v1788_v25 = vpop.xlane.xlu0 %1787 }
 0x6fd   :  { %v1801_v2 = vsub.f32 %v1717_v35, %v1773_v16  ;;  %v1806_v53 = vsub.f32 %v1738_v49, %v1788_v25  ;;  %5856 = vpow2.f32 %v1824_v39 }
 0x6fe   :  { %5858 = vrcp.f32 %v7400_v17 }
 0x6ff   :  { %v1836_v55 = vmul.f32 1.442695, %v1806_v53  ;;  %5860 = vpow2.f32 %v1830_v61  ;;  %v1826_v15 = vmul.f32 1.442695, %v1801_v2 }
 0x700   :  { %v1782_v27 = vpop.xlane.xlu0 %1781  ;;  %5862 = vrcp.f32 %v7402_v23  ;;  %v1863_v37 = vpop.xlane.xlu1 %1862 }
 0x701   :  { %v1804_v59 = vsub.f32 %v1730_v20, %v1782_v27  ;;  %5864 = vpow2.f32 %v1836_v55 }
 0x702   :  { %5866 = vrcp.f32 %v1857_v56 }
 0x703   :  { %v1832_v45 = vmul.f32 1.442695, %v1804_v59  ;;  %5868 = vpow2.f32 %v1826_v15 }
 0x704   :  { %v1860_v46 = vpop.xlane.xlu0 %1859  ;;  %v1937_v39 = vpop.permute.xlu1 %1936 }
 0x705   :  { %5870 = vpow2.f32 %v1832_v45 }
 0x706   :  { %v7458_v12 = vpop.eup %5854  ;;  %5872 = vrcp.f32 %v1854_v8 }
 0x707   :  { %v1870_v16 = vsel %vm1167_vm4, %v7458_v12, 0.0  ;;  %5874 = vrcp.f32 %v1860_v46 }
 0x708   :  { %1871 = vadd.xlane.f32.xlu1 %v1870_v16  ;;  %v1939_v61 = vpop.permute.xlu0 %1938  ;;  %5876 = vrcp.f32 %v1863_v37 }
 0x709   :  { %5335 = vmatprep.subr.bf16.mxu0 %v1939_v61 }
 0x70a   :  { %5336 = vmatpush3.bf16.msra.mxu0 %v1939_v61  ;;  %v7462_v23 = vpop.eup %5856 }
 0x70b   :  { %5337 = vmatprep.subr.bf16.mxu0 %v1937_v39  ;;  %v5859_v55 = vpop.eup %5858  ;;  %v1864_v15 = vsel %vm1167_vm4, %v7462_v23, 0.0 }
 0x70c   :  { %v1935_v17 = vpop.permute.xlu0 %1934  ;;  %v7466_v27 = vpop.eup %5860  ;;  %1865 = vadd.xlane.f32.xlu1 %v1864_v15  ;;  %v1906_v59 = vmul.f32 %v5859_v55, %v7374_v50 }
 0x70d   :  { %v5863_v53 = vpop.eup %5862  ;;  %v1873_v49 = vsel %vm1167_vm4, %v7466_v27, 0.0 }
 0x70e   :  { %5338 = vmatpush3.bf16.msra.mxu0 %v1937_v39  ;;  %v7468_v2 = vpop.eup %5864  ;;  %v1907_v26 = vmul.f32 %v5863_v53, %v7381_v58 }
 0x70f   :  { %5339 = vmatprep.subr.bf16.mxu0 %v1935_v17  ;;  %v5867_v35 = vpop.eup %5866  ;;  %v1882_v20 = vsel %vm1167_vm4, %v7468_v2, 0.0 }
 0x710   :  { %v7474_v8 = vpop.eup %5868  ;;  %1874 = vadd.xlane.f32.xlu1 %v1873_v49  ;;  %1883 = vadd.xlane.f32.xlu0 %v1882_v20  ;;  %v1933_v9 = vpop.permute.xlu0 %1932  ;;  %v1909_v25 = vmul.f32 %v5867_v35, %v7409_v34  ;;  %v1921_v37 = vpack.c.bf16 %v1907_v26, %v1906_v59  ;;  %v8638_v26 = vld [vmem:[#allocation28_spill] sm:$0xff]  ;;  %v8642_v59 = vld [vmem:[#allocation25_spill] sm:$0xff] }
 0x711   :  { %v1867_v43 = vsel %vm1167_vm4, %v7474_v8, 0.0 }
 0x712   :  { %v7476_v56 = vpop.eup %5870  ;;  %5340 = vmatpush3.bf16.msra.mxu0 %v1935_v17 }
 0x713   :  { %v5873_v33 = vpop.eup %5872  ;;  %5341 = vmatprep.subr.bf16.mxu0 %v1933_v9  ;;  %v1876_v63 = vsel %vm1167_vm4, %v7476_v56, 0.0 }
 0x714   :  { %1868 = vadd.xlane.f32.xlu1 %v1867_v43  ;;  %1877 = vadd.xlane.f32.xlu0 %v1876_v63  ;;  %v1908_v45 = vmul.f32 %v5873_v33, %v7404_v13  ;;  %v5875_v46 = vpop.eup %5874  ;;  %v8637_v33 = vld [vmem:[#allocation27_spill] sm:$0xff]  ;;  %v8639_v63 = vld [vmem:[#allocation33_spill] sm:$0xff]  ;;  %v8640_v43 = vld [vmem:[#allocation26_spill] sm:$0xff] }
 0x715   :  { %v5877_v58 = vpop.eup %5876  ;;  %v1910_v61 = vmul.f32 %v5875_v46, %v7430_v1  ;;  %v8645_v46 = vld [vmem:[#allocation38_spill] sm:$0xff] }
 0x716   :  { %5342 = vmatpush3.bf16.msra.mxu0 %v1933_v9  ;;  %v1922_v16 = vpack.c.bf16 %v1909_v25, %v1908_v45  ;;  %v1911_v39 = vmul.f32 %v5877_v58, %v7424_v22  ;;  %v5659_v9 = vld [vmem:[#allocation11 + $0x10] sm:$0xff]   ;;  %v8641_v25 = vld [vmem:[#allocation30_spill] sm:$0xff]  ;;  %v8643_v45 = vld [vmem:[#allocation32_spill] sm:$0xff] }
 0x718   :  { %v1923_v34 = vpack.c.bf16 %v1911_v39, %v1910_v61 }
 0x719   :  { %5344 = vmatmul.mubr.msk.bf16.vlgmr.msra.gmra.mxu0 %vm1167_vm4, %v1921_v37  ;;  %v8644_v37 = vld [vmem:[#allocation24_spill] sm:$0xff] }
 0x71a   :  { %5347 = vmatprep.mubr.msk.bf16.mxu0 %vm1167_vm4, %v1922_v16 }
 0x721   :  { %5348 = vmatmul.mubr.msk.bf16.gmra.mxu0 %vm1167_vm4, %v1923_v34 }
 0x735   :  { %v1791_v50 = vpop.xlane.xlu1 %1790 }
 0x736   :  { %v1807_v55 = vsub.f32 %v7443_v36, %v1791_v50 }
 0x738   :  { %v1838_v15 = vmul.f32 1.442695, %v1807_v55 }
 0x739   :  { %v1785_v13 = vpop.xlane.xlu1 %1784 }
 0x73a   :  { %5878 = vpow2.f32 %v1838_v15  ;;  %v1805_v17 = vsub.f32 %v7446_v5, %v1785_v13  ;;  %v5658_v5 = vld [vmem:[#allocation11 + $0x18] sm:$0xff]  }
 0x73b   :  { %5367 = vmatprep.subr.bf16.mxu0 %v5658_v5 }
 0x73c   :  { %v1834_v53 = vmul.f32 1.442695, %v1805_v17  ;;  %5368 = vmatpush3.bf16.msra.mxu0 %v5658_v5 }
 0x73d   :  { %v2032_v35 = vpop.permute.xlu1 %2031  ;;  %5369 = vmatprep.subr.bf16.mxu0 %v5659_v9 }
 0x73e   :  { %5880 = vpow2.f32 %v1834_v53  ;;  %5351 = vmatprep.subr.bf16.mxu1 %v2032_v35 }
 0x73f   :  { %5352 = vmatpush3.bf16.msra.mxu1 %v2032_v35 }
 0x740   :  { %5370 = vmatpush3.bf16.msra.mxu0 %v5659_v9  ;;  %v5660_v9 = vld [vmem:[#allocation11 + $0x8] sm:$0xff]  }
 0x741   :  { %v2030_v49 = vpop.permute.xlu1 %2029 }
 0x742   :  { %5353 = vmatprep.subr.bf16.mxu1 %v2030_v49 }
 0x743   :  { %5354 = vmatpush3.bf16.msra.mxu1 %v2030_v49 }
 0x747   :  { %v7493_v22 = vpop.eup %5878 }
 0x748   :  { %v1885_v1 = vsel %vm1167_vm4, %v7493_v22, 0.0 }
 0x749   :  { %1886 = vadd.xlane.f32.xlu0 %v1885_v1 }
 0x74b   :  { %v7497_v36 = vpop.eup %5880 }
 0x74c   :  { %v1879_v20 = vsel %vm1167_vm4, %v7497_v36, 0.0 }
 0x74d   :  { %1880 = vadd.xlane.f32.xlu1 %v1879_v20 }
 0x75e   :  { %2025 = vrot.lane.b32.xlu1 %v6848_v18, %s6313_s5 }
 0x75f   :  { %2027 = vrot.lane.b32.xlu0 %v6841_v4, %s6313_s5 }
 0x762   :  { %2404 = vrot.lane.b32.xlu1 %v8637_v33, %s6303_s1 }
 0x763   :  { %2406 = vrot.lane.b32.xlu0 %v8638_v26, %s6303_s1 }
 0x766   :  { %2511 = vrot.lane.b32.xlu1 %v8639_v63, %s6303_s1 }
 0x767   :  { %2402 = vrot.lane.b32.xlu0 %v8640_v43, %s6303_s1 }
 0x76a   :  { %2509 = vrot.lane.b32.xlu1 %v8641_v25, %s6303_s1 }
 0x76b   :  { %2400 = vrot.lane.b32.xlu0 %v8642_v59, %s6303_s1 }
 0x76e   :  { %2394 = vrot.lane.b32.xlu1 %v8643_v45, %s6303_s1 }
 0x76f   :  { %2392 = vrot.lane.b32.xlu0 %v8644_v37, %s6303_s1 }
 0x772   :  { %2396 = vrot.lane.b32.xlu1 %v6935_v28, %s6303_s1 }
 0x773   :  { %2507 = vrot.lane.b32.xlu0 %v6978_v60, %s6303_s1 }
 0x776   :  { %2505 = vrot.lane.b32.xlu1 %v6996_v29, %s6303_s1 }
 0x777   :  { %2398 = vrot.lane.b32.xlu0 %v6964_v41, %s6303_s1 }
 0x77a   :  { %2499 = vrot.lane.b32.xlu1 %v7012_v40, %s6303_s1 }
 0x77b   :  { %2497 = vrot.lane.b32.xlu0 %v6876_v14, %s6303_s1 }
 0x77e   :  { %2503 = vrot.lane.b32.xlu1 %v7024_v0, %s6303_s1 }
 0x77f   :  { %2501 = vrot.lane.b32.xlu0 %v8645_v46, %s6303_s1 }
 0x783   :  { %2792 = vrot.lane.b32.xlu0 %v6912_v57, %s6303_s1  ;;  %v8675_v57 = vld [vmem:[#allocation40_spill] sm:$0xff] }
 0x791   :  { %v1872_v16 = vpop.xlane.xlu1 %1871 }
 0x795   :  { %v1866_v58 = vpop.xlane.xlu1 %1865 }
 0x796   :  { %5882 = vrcp.f32 %v1866_v58 }
 0x799   :  { %v1875_v61 = vpop.xlane.xlu1 %1874  ;;  %v1884_v17 = vpop.xlane.xlu0 %1883 }
 0x79d   :  { %v1869_v39 = vpop.xlane.xlu1 %1868  ;;  %v1878_v53 = vpop.xlane.xlu0 %1877 }
 0x79e   :  { %5884 = vrcp.f32 %v1869_v39 }
 0x79f   :  { %5886 = vrcp.f32 %v1875_v61 }
 0x7a0   :  { %5888 = vrcp.f32 %v1872_v16 }
 0x7a3   :  { %v5883_v34 = vpop.eup %5882 }
 0x7a4   :  { %v1912_v55 = vmul.f32 %v5883_v34, %v7462_v23 }
 0x7ab   :  { %v5885_v50 = vpop.eup %5884 }
 0x7ac   :  { %v1913_v15 = vmul.f32 %v5885_v50, %v7474_v8  ;;  %v5887_v49 = vpop.eup %5886 }
 0x7ad   :  { %v5889_v5 = vpop.eup %5888  ;;  %v1915_v23 = vmul.f32 %v5887_v49, %v7466_v27 }
 0x7ae   :  { %v1924_v13 = vpack.c.bf16 %v1913_v15, %v1912_v55  ;;  %v1914_v16 = vmul.f32 %v5889_v5, %v7458_v12  ;;  %v5661_v55 = vld [vmem:[#allocation11] sm:$0xff]  }
 0x7b0   :  { %5359 = vmatprep.mubr.msk.bf16.mxu1 %vm1167_vm4, %v1924_v13  ;;  %v1925_v50 = vpack.c.bf16 %v1915_v23, %v1914_v16 }
 0x7d2   :  { %v1887_v35 = vpop.xlane.xlu0 %1886 }
 0x7d3   :  { %5890 = vrcp.f32 %v1887_v35 }
 0x7d4   :  { %5892 = vrcp.f32 %v1878_v53 }
 0x7d5   :  { %5894 = vrcp.f32 %v1884_v17 }
 0x7d6   :  { %v1881_v1 = vpop.xlane.xlu1 %1880  ;;  %v2028_v20 = vpop.permute.xlu0 %2027 }
 0x7d7   :  { %5896 = vrcp.f32 %v1881_v1  ;;  %5355 = vmatprep.subr.bf16.mxu1 %v2028_v20 }
 0x7d8   :  { %5356 = vmatpush3.bf16.msra.mxu1 %v2028_v20 }
 0x7d9   :  { %v5345_v8 = vpop.f32.mrf.mxu0 }
 0x7da   :  { %v2026_v58 = vpop.permute.xlu1 %2025  ;;  %v2407_v39 = vpop.permute.xlu0 %2406 }
 0x7db   :  { %v1990_v61 = vpop.f32.mrf.mxu0  ;;  %5357 = vmatprep.subr.bf16.mxu1 %v2026_v58  ;;  %5591 = vmatprep.subr.msk.bf16.mxu0 %vm988_vm0, %v2407_v39  ;;  %v2430_v23 = vsel %vm988_vm0, %v2407_v39, 0 }
 0x7dc   :  { %5358 = vmatpush3.bf16.msra.mxu1 %v2026_v58 }
 0x7dd   :  { %v5346_v34 = vpop.f32.mrf.mxu0  ;;  %5387 = vmatprep.subr.bf16.mxu1 %v5660_v9 }
 0x7de   :  { %v2405_v15 = vpop.permute.xlu1 %2404  ;;  %v2403_v13 = vpop.permute.xlu0 %2402  ;;  %v2115_v35 = vpack.c.bf16 %v5346_v34, %v5345_v8 }
 0x7df   :  { %v1993_v17 = vpop.f32.mrf.mxu0  ;;  %5360 = vmatmul.mubr.msk.bf16.vlgmr.msra.gmra.mxu1 %vm1167_vm4, %v1925_v50 }
 0x7e0   :  { %v2114_v27 = vpack.c.bf16 %v1993_v17, %v1990_v61  ;;  %5388 = vmatpush3.bf16.msra.mxu1 %v5660_v9  ;;  %v5891_v53 = vpop.eup %5890 }
 0x7e1   :  { %v5349_v49 = vpop.f32.mrf.mxu0  ;;  %5389 = vmatprep.subr.bf16.mxu1 %v5661_v55  ;;  %v5893_v12 = vpop.eup %5892  ;;  %v1919_v9 = vmul.f32 %v5891_v53, %v7493_v22  ;;  %v1506_v22 = vpack.c.bf16 %v7344_v11, %v7338_v38  ;;  %v1508_v38 = vpack.c.bf16 %v7354_v6, %v7348_v10  ;;  %v8646_v53 = vpack.c.bf16 %v7340_v48, %v7336_v7 }
 0x7e2   :  { %5371 = vmatprep.mubr.msk.bf16.mxu0 %vm988_vm0, %v2114_v27  ;;  %v2401_v1 = vpop.permute.xlu0 %2400  ;;  %v5895_v20 = vpop.eup %5894  ;;  %v1916_v61 = vmul.f32 %v5893_v12, %v7476_v56  ;;  %v1510_v7 = vpack.c.bf16 %v7383_v44, %v7358_v52  ;;  %v8647_v48 = vpack.c.bf16 %v7350_v32, %v7346_v51  ;;  %v1512_v52 = vpack.c.bf16 %v7398_v54, %v7391_v19 }
 0x7e3   :  { %v2006_v5 = vpop.f32.mrf.mxu0  ;;  %5372 = vmatmul.mubr.msk.bf16.vlgmr.msra.gmra.mxu0 %vm988_vm0, %v2115_v35  ;;  %v2512_v16 = vpop.permute.xlu1 %2511  ;;  %v1918_v17 = vmul.f32 %v5895_v20, %v7468_v2  ;;  %v2427_v2 = vsel %vm988_vm0, %v2405_v15, 0  ;;  %v8648_v51 = vpack.c.bf16 %v7360_v3, %v7356_v47 }
 0x7e4   :  { %v5897_v58 = vpop.eup %5896  ;;  %5408 = vmatpush3.bf16.xpose.msra.mxu0 %v2430_v23  ;;  %5390 = vmatpush3.bf16.msra.mxu1 %v5661_v55 }
 0x7e5   :  { %5592 = vmatprep.subr.msk.bf16.mxu0 %vm988_vm0, %v2405_v15  ;;  %v5350_v8 = vpop.f32.mrf.mxu0  ;;  %5595 = vmatprep.subr.msk.bf16.mxu1 %vm988_vm0, %v2512_v16  ;;  %v1917_v34 = vmul.f32 %v5897_v58, %v7497_v36  ;;  %v1927_v23 = vpack.c.bf16 %v1919_v9, %v1918_v17  ;;  %v2424_v15 = vsel %vm988_vm0, %v2403_v13, 0 }
 0x7e6   :  { %v7554_v50 = vpop.permute.xlu0 %2392  ;;  %v2117_v55 = vpack.c.bf16 %v5350_v8, %v5349_v49  ;;  %v2535_v49 = vsel %vm988_vm0, %v2512_v16, 0 }
 0x7e7   :  { %v2009_v39 = vpop.f32.mrf.mxu0  ;;  %v1926_v27 = vpack.c.bf16 %v1917_v34, %v1916_v61  ;;  %v2510_v11 = vpop.permute.xlu1 %2509 }
 0x7e8   :  { %v2116_v35 = vpack.c.bf16 %v2009_v39, %v2006_v5  ;;  %v2532_v20 = vsel %vm988_vm0, %v2510_v11, 0 }
 0x7e9   :  { %5363 = vmatprep.mubr.msk.bf16.mxu1 %vm1167_vm4, %v1926_v27 }
 0x7ea   :  { %5364 = vmatmul.mubr.msk.bf16.gmra.mxu1 %vm1167_vm4, %v1927_v23  ;;  %5375 = vmatprep.mubr.msk.bf16.mxu0 %vm988_vm0, %v2116_v35  ;;  %v2508_v56 = vpop.permute.xlu0 %2507 }
 0x7eb   :  { %5376 = vmatmul.mubr.msk.bf16.gmra.mxu0 %vm988_vm0, %v2117_v55  ;;  %5391 = vmatprep.mubr.msk.bf16.mxu1 %vm988_vm0, %v1506_v22  ;;  %v2395_v6 = vpop.permute.xlu1 %2394  ;;  %v2529_v32 = vsel %vm988_vm0, %v2508_v56, 0 }
 0x7ec   :  { %5410 = vmatpush3.bf16.xpose.msra.mxu0 %v2427_v2 }
 0x7ed   :  { %5593 = vmatprep.subr.msk.bf16.mxu0 %vm988_vm0, %v2403_v13  ;;  %v2421_v13 = vsel %vm988_vm0, %v2401_v1, 0 }
 0x7ee   :  { %v7566_v36 = vpop.permute.xlu0 %2398 }
 0x7ef   :  { %v2397_v58 = vpop.permute.xlu1 %2396 }
 0x7f2   :  { %5392 = vmatmul.mubr.msk.bf16.vlgmr.msra.gmra.mxu1 %vm988_vm0, %v8646_v53  ;;  %v2498_v12 = vpop.permute.xlu0 %2497 }
 0x7f3   :  { %5424 = vmatpush3.bf16.xpose.msra.mxu1 %v2535_v49  ;;  %5395 = vmatprep.mubr.msk.bf16.mxu1 %vm988_vm0, %v1508_v38  ;;  %v2506_v44 = vpop.permute.xlu1 %2505 }
 0x7f4   :  { %5412 = vmatpush3.bf16.xpose.msra.mxu0 %v2424_v15  ;;  %5596 = vmatprep.subr.msk.bf16.mxu1 %vm988_vm0, %v2510_v11  ;;  %v2526_v19 = vsel %vm988_vm0, %v2506_v44, 0 }
 0x7f5   :  { %5594 = vmatprep.subr.msk.bf16.mxu0 %vm988_vm0, %v2401_v1  ;;  %v8649_v1 = vpack.c.bf16 %v7393_v62, %v7385_v42 }
 0x7f6   :  { %v2502_v10 = vpop.permute.xlu0 %2501 }
 0x7f7   :  { %v2500_v47 = vpop.permute.xlu1 %2499 }
 0x7fa   :  { %5396 = vmatmul.mubr.msk.bf16.gmra.mxu1 %vm988_vm0, %v8647_v48  ;;  %v2793_v5 = vpop.permute.xlu0 %2792 }
 0x7fb   :  { %5426 = vmatpush3.bf16.xpose.msra.mxu1 %v2532_v20  ;;  %5399 = vmatprep.mubr.msk.bf16.mxu1 %vm988_vm0, %v1510_v7  ;;  %v2504_v3 = vpop.permute.xlu1 %2503 }
 0x7fc   :  { %5414 = vmatpush3.bf16.xpose.msra.mxu0 %v2421_v13  ;;  %5597 = vmatprep.subr.msk.bf16.mxu1 %vm988_vm0, %v2508_v56 }
 0x7fd   :  { %5439 = vmatprep.subr.bf16.mxu0 %v2793_v5 }
 0x802   :  { %5400 = vmatmul.mubr.msk.bf16.gmra.mxu1 %vm988_vm0, %v8648_v51 }
 0x803   :  { %5428 = vmatpush3.bf16.xpose.msra.mxu1 %v2529_v32  ;;  %5403 = vmatprep.mubr.msk.bf16.mxu1 %vm988_vm0, %v1512_v52 }
 0x804   :  { %5598 = vmatprep.subr.msk.bf16.mxu1 %vm988_vm0, %v2506_v44 }
 0x80a   :  { %5404 = vmatmul.mubr.msk.bf16.gmra.mxu1 %vm988_vm0, %v8649_v1 }
 0x80b   :  { %5430 = vmatpush3.bf16.xpose.msra.mxu1 %v2526_v19  ;;  %5431 = vmatprep.mubr.msk.bf16.mxu1 %vm988_vm0, %v2498_v12 }
 0x812   :  { %5432 = vmatmul.mubr.msk.bf16.vlgmr.msra.gmra.mxu1 %vm988_vm0, %v2500_v47 }
 0x813   :  { %5435 = vmatprep.mubr.msk.bf16.mxu1 %vm988_vm0, %v2502_v10 }
 0x81a   :  { %5436 = vmatmul.mubr.msk.bf16.gmra.mxu1 %vm988_vm0, %v2504_v3 }
 0x89f   :  { %v5361_v54 = vpop.f32.mrf.mxu1 }
 0x8a1   :  { %v2083_v16 = vpop.f32.mrf.mxu1 }
 0x8a3   :  { %v5362_v9 = vpop.f32.mrf.mxu1  ;;  %v5373_v42 = vpop.f32.mrf.mxu0 }
 0x8a4   :  { %v2119_v61 = vpack.c.bf16 %v5362_v9, %v5361_v54 }
 0x8a5   :  { %v2086_v8 = vpop.f32.mrf.mxu1  ;;  %v2196_v34 = vpop.f32.mrf.mxu0 }
 0x8a6   :  { %v2118_v62 = vpack.c.bf16 %v2086_v8, %v2083_v16 }
 0x8a7   :  { %v5374_v27 = vpop.f32.mrf.mxu0 }
 0x8a8   :  { %5379 = vmatprep.mubr.msk.bf16.mxu0 %vm988_vm0, %v2118_v62 }
 0x8a9   :  { %5380 = vmatmul.mubr.msk.bf16.gmra.mxu0 %vm988_vm0, %v2119_v61  ;;  %v2199_v55 = vpop.f32.mrf.mxu0 }
 0x8aa   :  { %v5365_v17 = vpop.f32.mrf.mxu1 }
 0x8ab   :  { %v5377_v49 = vpop.f32.mrf.mxu0 }
 0x8ac   :  { %v2099_v39 = vpop.f32.mrf.mxu1 }
 0x8ad   :  { %v2212_v48 = vpop.f32.mrf.mxu0 }
 0x8ae   :  { %v5366_v35 = vpop.f32.mrf.mxu1 }
 0x8af   :  { %v2121_v56 = vpack.c.bf16 %v5366_v35, %v5365_v17 }
 0x8b0   :  { %v2102_v23 = vpop.f32.mrf.mxu1 }
 0x8b1   :  { %v2120_v22 = vpack.c.bf16 %v2102_v23, %v2099_v39 }
 0x8b2   :  { %v5393_v2 = vpop.f32.mrf.mxu1 }
 0x8b3   :  { %v7609_v38 = vadd.f32 %v5393_v2, %v5373_v42  ;;  %5383 = vmatprep.mubr.msk.bf16.mxu0 %vm988_vm0, %v2120_v22  ;;  %v8661_v22 = vld [vmem:[#allocation51_spill] sm:$0xff]  ;;  %v8662_v2 = vld [vmem:[#allocation52_spill] sm:$0xff] }
 0x8b4   :  { %5384 = vmatmul.mubr.msk.bf16.gmra.mxu0 %vm988_vm0, %v2121_v56  ;;  %v2329_v11 = vpop.f32.mrf.mxu1 }
 0x8b5   :  { %v7613_v53 = vadd.f32 %v2329_v11, %v2196_v34  ;;  %5415 = vmatprep.mubr.msk.bf16.mxu0 %vm988_vm0, %v7554_v50  ;;  %v5378_v50 = vpop.f32.mrf.mxu0 }
 0x8b6   :  { %v5394_v12 = vpop.f32.mrf.mxu1 }
 0x8b7   :  { %v7617_v15 = vadd.f32 %v5394_v12, %v5374_v27 }
 0x8b8   :  { %v2332_v10 = vpop.f32.mrf.mxu1 }
 0x8b9   :  { %v7619_v7 = vadd.f32 %v2332_v10, %v2199_v55 }
 0x8ba   :  { %v5397_v20 = vpop.f32.mrf.mxu1 }
 0x8bb   :  { %v7621_v13 = vadd.f32 %v5397_v20, %v5377_v49 }
 0x8bc   :  { %v2345_v52 = vpop.f32.mrf.mxu1  ;;  %5416 = vmatmul.mubr.msk.bf16.vlgmr.msra.gmra.mxu0 %vm988_vm0, %v2395_v6 }
 0x8bd   :  { %v7624_v51 = vadd.f32 %v2345_v52, %v2212_v48  ;;  %5440 = vmatpush3.bf16.msra.mxu0 %v2793_v5  ;;  %5419 = vmatprep.mubr.msk.bf16.mxu0 %vm988_vm0, %v2397_v58  ;;  %v8663_v48 = vld [vmem:[#allocation53_spill] sm:$0xff] }
 0x8be   :  { %v5398_v32 = vpop.f32.mrf.mxu1 }
 0x8bf   :  { %8650 = vst [vmem:[#allocation27_spill] sm:$0xff] %v7624_v51  ;;  %v7627_v44 = vadd.f32 %v5398_v32, %v5378_v50  ;;  %v8664_v50 = vld [vmem:[#allocation54_spill] sm:$0xff] }
 0x8c0   :  { %v7629_v1 = vpop.f32.mrf.mxu1 }
 0x8c1   :  { %8651 = vst [vmem:[#allocation28_spill] sm:$0xff] %v7627_v44  ;;  %8652 = vst [vmem:[#allocation33_spill] sm:$0xff] %v7629_v1 }
 0x8c2   :  { %v7631_v19 = vpop.f32.mrf.mxu1 }
 0x8c3   :  { %8653 = vst [vmem:[#allocation26_spill] sm:$0xff] %v7631_v19 }
 0x8c4   :  { %v7633_v47 = vpop.f32.mrf.mxu1  ;;  %5420 = vmatmul.mubr.msk.bf16.gmra.mxu0 %vm988_vm0, %v7566_v36 }
 0x8c5   :  { %8654 = vst [vmem:[#allocation30_spill] sm:$0xff] %v7633_v47 }
 0x8c6   :  { %v7637_v3 = vpop.f32.mrf.mxu1 }
 0x8c7   :  { %8655 = vst [vmem:[#allocation25_spill] sm:$0xff] %v7637_v3  ;;  %v8683_v3 = vld [vmem:[#allocation35_spill] sm:$0xff] }
 0x8c8   :  { %v7639_v6 = vpop.f32.mrf.mxu1 }
 0x8c9   :  { %8656 = vst [vmem:[#allocation32_spill] sm:$0xff] %v7639_v6 }
 0x8ca   :  { %v7641_v5 = vpop.f32.mrf.mxu1 }
 0x8cb   :  { %8657 = vst [vmem:[#allocation24_spill] sm:$0xff] %v7641_v5  ;;  %v8680_v5 = vld [vmem:[#allocation44_spill] sm:$0xff] }
 0x8cc   :  { %v7643_v58 = vpop.f32.mrf.mxu1 }
 0x8cd   :  { %8658 = vst [vmem:[#allocation38_spill] sm:$0xff] %v7643_v58 }
 0x8ce   :  { %v7645_v54 = vpop.f32.mrf.mxu1 }
 0x8cf   :  { %8659 = vst [vmem:[#allocation55_spill] sm:$0xff] %v7645_v54 }
 0x8d0   :  { %v7647_v16 = vpop.f32.mrf.mxu1 }
 0x8d1   :  { %8660 = vst [vmem:[#allocation56_spill] sm:$0xff] %v7647_v16 }
 0x8d2   :  { %v5433_v9 = vpop.f32.mrf.mxu1 }
 0x8d3   :  { %v2580_v8 = vadd.f32 %v5433_v9, %v7101_v31  ;;  %v8677_v31 = vld [vmem:[#allocation42_spill] sm:$0xff] }
 0x8d4   :  { %v2571_v42 = vpop.f32.mrf.mxu1 }
 0x8d5   :  { %v2572_v62 = vadd.f32 %v2571_v42, %v7104_v24  ;;  %v2632_v36 = vsel %vm1167_vm4, %v2580_v8, -inf  ;;  %v8676_v24 = vld [vmem:[#allocation41_spill] sm:$0xff] }
 0x8d6   :  { %2633 = vmax.xlane.f32.xlu0 %v2632_v36  ;;  %v5434_v61 = vpop.f32.mrf.mxu1 }
 0x8d7   :  { %v2583_v34 = vadd.f32 %v5434_v61, %v7110_v21  ;;  %v2626_v35 = vsel %vm1167_vm4, %v2572_v62, -inf }
 0x8d8   :  { %v2574_v17 = vpop.f32.mrf.mxu1 }
 0x8d9   :  { %v2575_v39 = vadd.f32 %v2574_v17, %v7118_v30  ;;  %v2635_v27 = vsel %vm1167_vm4, %v2583_v34, -inf }
 0x8da   :  { %2636 = vmax.xlane.f32.xlu1 %v2635_v27  ;;  %2627 = vmax.xlane.f32.xlu0 %v2626_v35  ;;  %v5437_v23 = vpop.f32.mrf.mxu1 }
 0x8db   :  { %v7657_v55 = vadd.f32 %v5437_v23, %v8661_v22  ;;  %v2629_v49 = vsel %vm1167_vm4, %v2575_v39, -inf }
 0x8dc   :  { %v2587_v56 = vpop.f32.mrf.mxu1 }
 0x8dd   :  { %v7660_v11 = vadd.f32 %v2587_v56, %v8662_v2  ;;  %v2644_v12 = vsel %vm1167_vm4, %v7657_v55, -inf }
 0x8de   :  { %2630 = vmax.xlane.f32.xlu1 %v2629_v49  ;;  %2645 = vmax.xlane.f32.xlu0 %v2644_v12  ;;  %v5438_v10 = vpop.f32.mrf.mxu1 }
 0x8df   :  { %v7666_v20 = vadd.f32 %v5438_v10, %v8663_v48  ;;  %v2638_v42 = vsel %vm1167_vm4, %v7660_v11, -inf  ;;  %v7677_v10 = vpop.f32.mrf.mxu0 }
 0x8e0   :  { %v2590_v52 = vpop.f32.mrf.mxu1  ;;  %8665 = vst [vmem:[#allocation57_spill] sm:$0xff] %v7677_v10 }
 0x8e1   :  { %v7669_v32 = vadd.f32 %v2590_v52, %v8664_v50  ;;  %v2647_v9 = vsel %vm1167_vm4, %v7666_v20, -inf }
 0x8e2   :  { %2648 = vmax.xlane.f32.xlu1 %v2647_v9  ;;  %2639 = vmax.xlane.f32.xlu0 %v2638_v42 }
 0x8e3   :  { %v2641_v36 = vsel %vm1167_vm4, %v7669_v32, -inf }
 0x8e6   :  { %2642 = vmax.xlane.f32.xlu1 %v2641_v36 }
 0x95f   :  { %v2634_v61 = vpop.xlane.xlu0 %2633 }
 0x960   :  { %v2660_v17 = vsub.f32 %v2580_v8, %v2634_v61 }
 0x962   :  { %v2686_v27 = vmul.f32 1.442695, %v2660_v17 }
 0x963   :  { %v2637_v35 = vpop.xlane.xlu1 %2636  ;;  %v2628_v23 = vpop.xlane.xlu0 %2627 }
 0x964   :  { %5898 = vpow2.f32 %v2686_v27  ;;  %v2661_v56 = vsub.f32 %v2583_v34, %v2637_v35  ;;  %v2658_v49 = vsub.f32 %v2572_v62, %v2628_v23 }
 0x966   :  { %v2682_v12 = vmul.f32 1.442695, %v2658_v49  ;;  %v2688_v52 = vmul.f32 1.442695, %v2661_v56 }
 0x967   :  { %v2631_v2 = vpop.xlane.xlu1 %2630 }
 0x968   :  { %v2659_v22 = vsub.f32 %v2575_v39, %v2631_v2  ;;  %5900 = vpow2.f32 %v2682_v12 }
 0x969   :  { %v7679_v9 = vpop.f32.mrf.mxu0  ;;  %5902 = vpow2.f32 %v2688_v52  ;;  %v8674_v52 = vld [vmem:[#allocation39_spill] sm:$0xff] }
 0x96a   :  { %8666 = vst [vmem:[#allocation58_spill] sm:$0xff] %v7679_v9  ;;  %v2684_v42 = vmul.f32 1.442695, %v2659_v22 }
 0x96b   :  { %v7681_v36 = vpop.f32.mrf.mxu0 }
 0x96c   :  { %8667 = vst [vmem:[#allocation59_spill] sm:$0xff] %v7681_v36  ;;  %5904 = vpow2.f32 %v2684_v42 }
 0x96d   :  { %v7683_v8 = vpop.f32.mrf.mxu0 }
 0x96e   :  { %8668 = vst [vmem:[#allocation60_spill] sm:$0xff] %v7683_v8 }
 0x96f   :  { %v7687_v34 = vpop.f32.mrf.mxu0 }
 0x970   :  { %8669 = vst [vmem:[#allocation61_spill] sm:$0xff] %v7687_v34  ;;  %v2649_v34 = vpop.xlane.xlu1 %2648 }
 0x971   :  { %v7685_v61 = vpop.eup %5898 }
 0x972   :  { %v2728_v62 = vsel %vm1167_vm4, %v7685_v61, 0.0 }
 0x973   :  { %2729 = vadd.xlane.f32.xlu1 %v2728_v62 }
 0x974   :  { %v7691_v17 = vpop.f32.mrf.mxu0  ;;  %v2643_v47 = vpop.xlane.xlu1 %2642 }
 0x975   :  { %8670 = vst [vmem:[#allocation62_spill] sm:$0xff] %v7691_v17  ;;  %v7693_v39 = vpop.eup %5900 }
 0x976   :  { %v7695_v2 = vpop.f32.mrf.mxu0  ;;  %v2722_v22 = vsel %vm1167_vm4, %v7693_v39, 0.0  ;;  %v7699_v27 = vpop.eup %5902 }
 0x977   :  { %8671 = vst [vmem:[#allocation63_spill] sm:$0xff] %v7695_v2  ;;  %2723 = vadd.xlane.f32.xlu1 %v2722_v22  ;;  %v2731_v56 = vsel %vm1167_vm4, %v7699_v27, 0.0 }
 0x978   :  { %v7701_v35 = vpop.f32.mrf.mxu0 }
 0x979   :  { %8672 = vst [vmem:[#allocation64_spill] sm:$0xff] %v7701_v35  ;;  %v7707_v49 = vpop.eup %5904 }
 0x97a   :  { %v7703_v23 = vpop.f32.mrf.mxu0  ;;  %v2725_v22 = vsel %vm1167_vm4, %v7707_v49, 0.0 }
 0x97b   :  { %8673 = vst [vmem:[#allocation65_spill] sm:$0xff] %v7703_v23  ;;  %2732 = vadd.xlane.f32.xlu1 %v2731_v56 }
 0x97c   :  { %v5417_v12 = vpop.f32.mrf.mxu0 }
 0x97d   :  { %v7710_v42 = vadd.f32 %v5417_v12, %v8674_v52 }
 0x97e   :  { %v2466_v62 = vpop.f32.mrf.mxu0 }
 0x97f   :  { %v7713_v50 = vadd.f32 %v2466_v62, %v8675_v57  ;;  %v2608_v48 = vsel %vm1167_vm4, %v7710_v42, -inf  ;;  %2726 = vadd.xlane.f32.xlu1 %v2725_v22  ;;  %v8678_v22 = vld [vmem:[#allocation43_spill] sm:$0xff] }
 0x980   :  { %v5418_v30 = vpop.f32.mrf.mxu0  ;;  %2609 = vmax.xlane.f32.xlu0 %v2608_v48 }
 0x981   :  { %v7720_v56 = vadd.f32 %v5418_v30, %v8676_v24  ;;  %v2602_v62 = vsel %vm1167_vm4, %v7713_v50, -inf }
 0x982   :  { %v2469_v21 = vpop.f32.mrf.mxu0 }
 0x983   :  { %v7723_v12 = vadd.f32 %v2469_v21, %v8677_v31  ;;  %v2611_v30 = vsel %vm1167_vm4, %v7720_v56, -inf  ;;  %v8679_v21 = vld [vmem:[#allocation45_spill] sm:$0xff] }
 0x984   :  { %v5421_v16 = vpop.f32.mrf.mxu0  ;;  %2603 = vmax.xlane.f32.xlu0 %v2602_v62  ;;  %v8681_v62 = vld [vmem:[#allocation46_spill] sm:$0xff] }
 0x985   :  { %v2605_v23 = vsel %vm1167_vm4, %v7723_v12, -inf  ;;  %v7730_v35 = vadd.f32 %v5421_v16, %v8678_v22 }
 0x986   :  { %v2482_v54 = vpop.f32.mrf.mxu0  ;;  %2606 = vmax.xlane.f32.xlu1 %v2605_v23 }
 0x987   :  { %v7738_v17 = vadd.f32 %v2482_v54, %v8680_v5  ;;  %v2620_v23 = vsel %vm1167_vm4, %v7730_v35, -inf  ;;  %v8682_v54 = vld [vmem:[#allocation34_spill] sm:$0xff] }
 0x988   :  { %v5422_v48 = vpop.f32.mrf.mxu0  ;;  %2612 = vmax.xlane.f32.xlu0 %v2611_v30 }
 0x989   :  { %v7735_v58 = vadd.f32 %v5422_v48, %v8679_v21  ;;  %v2614_v30 = vsel %vm1167_vm4, %v7738_v17, -inf }
 0x98a   :  { %v2485_v2 = vpop.f32.mrf.mxu0 }
 0x98b   :  { %v7741_v6 = vadd.f32 %v2485_v2, %v8681_v62  ;;  %v2623_v16 = vsel %vm1167_vm4, %v7735_v58, -inf  ;;  %v2646_v2 = vpop.xlane.xlu0 %2645 }
 0x98c   :  { %2621 = vmax.xlane.f32.xlu0 %v2620_v23  ;;  %2624 = vmax.xlane.f32.xlu1 %v2623_v16  ;;  %v2663_v16 = vsub.f32 %v7669_v32, %v2643_v47  ;;  %v2664_v19 = vsub.f32 %v7657_v55, %v2646_v2 }
 0x98d   :  { %v2617_v48 = vsel %vm1167_vm4, %v7741_v6, -inf }
 0x98e   :  { %v2692_v9 = vmul.f32 1.442695, %v2663_v16 }
 0x98f   :  { %v2640_v8 = vpop.xlane.xlu0 %2639 }
 0x990   :  { %2615 = vmax.xlane.f32.xlu0 %v2614_v30  ;;  %2618 = vmax.xlane.f32.xlu1 %v2617_v48  ;;  %v2662_v23 = vsub.f32 %v7660_v11, %v2640_v8  ;;  %v2694_v30 = vmul.f32 1.442695, %v2664_v19  ;;  %v2665_v48 = vsub.f32 %v7666_v20, %v2649_v34  ;;  %v8686_v8 = vld [vmem:[#allocation36_spill] sm:$0xff] }
 0x992   :  { %v2690_v36 = vmul.f32 1.442695, %v2662_v23 }
 0x994   :  { %5906 = vpow2.f32 %v2690_v36  ;;  %v8685_v36 = vld [vmem:[#allocation29_spill] sm:$0xff] }
 0x995   :  { %5908 = vpow2.f32 %v2692_v9  ;;  %v8684_v9 = vld [vmem:[#allocation37_spill] sm:$0xff] }
 0x996   :  { %5910 = vpow2.f32 %v2694_v30 }
 0x9a1   :  { %2790 = vrot.lane.b32.xlu1 %v8682_v54, %s6303_s1  ;;  %v2696_v54 = vmul.f32 1.442695, %v2665_v48  ;;  %v7759_v44 = vpop.eup %5906 }
 0x9a2   :  { %v2734_v47 = vsel %vm1167_vm4, %v7759_v44, 0.0 }
 0x9a3   :  { %5912 = vpow2.f32 %v2696_v54 }
 0x9a6   :  { %2788 = vrot.lane.b32.xlu0 %v8683_v3, %s6303_s1  ;;  %v7761_v3 = vpop.eup %5908 }
 0x9a7   :  { %v2737_v11 = vsel %vm1167_vm4, %v7761_v3, 0.0  ;;  %v7767_v55 = vpop.eup %5910 }
 0x9a8   :  { %v2740_v19 = vsel %vm1167_vm4, %v7767_v55, 0.0 }
 0x9b0   :  { %v7771_v20 = vpop.eup %5912 }
 0x9b1   :  { %v2743_v32 = vsel %vm1167_vm4, %v7771_v20, 0.0 }
 0x9c5   :  { %2738 = vadd.xlane.f32.xlu1 %v2737_v11  ;;  %2735 = vadd.xlane.f32.xlu0 %v2734_v47 }
 0x9c9   :  { %2741 = vadd.xlane.f32.xlu0 %v2740_v19 }
 0x9cd   :  { %2744 = vadd.xlane.f32.xlu0 %v2743_v32 }
 0x9d6   :  { %2881 = vrot.lane.b32.xlu1 %v8684_v9, %s6303_s1 }
 0x9da   :  { %2879 = vrot.lane.b32.xlu1 %v8685_v36, %s6303_s1 }
 0x9e3   :  { %2786 = vrot.lane.b32.xlu0 %v8686_v8, %s6303_s1 }
 0x9fc   :  { %v7781_v34 = vpop.xlane.xlu1 %2729 }
 0xa00   :  { %v2724_v54 = vpop.xlane.xlu1 %2723 }
 0xa01   :  { %5914 = vrcp.f32 %v2724_v54 }
 0xa04   :  { %v7783_v2 = vpop.xlane.xlu1 %2732 }
 0xa08   :  { %v2727_v23 = vpop.xlane.xlu1 %2726 }
 0xa09   :  { %v2610_v16 = vpop.xlane.xlu0 %2609  ;;  %5916 = vrcp.f32 %v2727_v23 }
 0xa0a   :  { %v2652_v30 = vsub.f32 %v7710_v42, %v2610_v16 }
 0xa0c   :  { %v2670_v48 = vmul.f32 1.442695, %v2652_v30 }
 0xa0d   :  { %v2604_v11 = vpop.xlane.xlu0 %2603 }
 0xa0e   :  { %5918 = vpow2.f32 %v2670_v48  ;;  %v2650_v47 = vsub.f32 %v7713_v50, %v2604_v11  ;;  %v5915_v1 = vpop.eup %5914 }
 0xa0f   :  { %v2607_v19 = vpop.xlane.xlu1 %2606  ;;  %v2770_v50 = vmul.f32 %v5915_v1, %v7693_v39 }
 0xa10   :  { %v2666_v32 = vmul.f32 1.442695, %v2650_v47  ;;  %v2651_v36 = vsub.f32 %v7723_v12, %v2607_v19 }
 0xa11   :  { %v2613_v9 = vpop.xlane.xlu0 %2612 }
 0xa12   :  { %5920 = vpow2.f32 %v2666_v32  ;;  %v2653_v8 = vsub.f32 %v7720_v56, %v2613_v9  ;;  %v2668_v54 = vmul.f32 1.442695, %v2651_v36 }
 0xa14   :  { %v2672_v10 = vmul.f32 1.442695, %v2653_v8 }
 0xa15   :  { %v2625_v51 = vpop.xlane.xlu1 %2624  ;;  %v2622_v23 = vpop.xlane.xlu0 %2621 }
 0xa16   :  { %5922 = vpow2.f32 %v2672_v10  ;;  %v2657_v42 = vsub.f32 %v7735_v58, %v2625_v51  ;;  %v2656_v16 = vsub.f32 %v7730_v35, %v2622_v23  ;;  %v5917_v30 = vpop.eup %5916 }
 0xa17   :  { %5924 = vpow2.f32 %v2668_v54  ;;  %v2771_v11 = vmul.f32 %v5917_v30, %v7707_v49 }
 0xa18   :  { %v2680_v48 = vmul.f32 1.442695, %v2657_v42  ;;  %v2678_v12 = vmul.f32 1.442695, %v2656_v16 }
 0xa19   :  { %v2619_v47 = vpop.xlane.xlu1 %2618  ;;  %v2616_v56 = vpop.xlane.xlu0 %2615  ;;  %v2782_v8 = vpack.c.bf16 %v2771_v11, %v2770_v50 }
 0xa1a   :  { %v2655_v9 = vsub.f32 %v7741_v6, %v2619_v47  ;;  %v2654_v36 = vsub.f32 %v7738_v17, %v2616_v56  ;;  %5926 = vpow2.f32 %v2678_v12 }
 0xa1b   :  { %v7795_v10 = vpop.eup %5918  ;;  %5928 = vpow2.f32 %v2680_v48  ;;  %5463 = vmatprep.mubr.msk.bf16.mxu1 %vm1167_vm4, %v2782_v8 }
 0xa1c   :  { %v2676_v51 = vmul.f32 1.442695, %v2655_v9  ;;  %v2674_v58 = vmul.f32 1.442695, %v2654_v36  ;;  %v2704_v1 = vsel %vm1167_vm4, %v7795_v10, 0.0 }
 0xa1d   :  { %v2791_v39 = vpop.permute.xlu1 %2790  ;;  %2705 = vadd.xlane.f32.xlu0 %v2704_v1  ;;  %v2789_v6 = vpop.permute.xlu0 %2788 }
 0xa1e   :  { %5441 = vmatprep.subr.bf16.mxu0 %v2791_v39  ;;  %5930 = vpow2.f32 %v2674_v58 }
 0xa1f   :  { %v7800_v35 = vpop.eup %5920  ;;  %5442 = vmatpush3.bf16.msra.mxu0 %v2791_v39  ;;  %5932 = vpow2.f32 %v2676_v51 }
 0xa20   :  { %5443 = vmatprep.subr.bf16.mxu0 %v2789_v6  ;;  %v2698_v17 = vsel %vm1167_vm4, %v7800_v35, 0.0  ;;  %5934 = vrcp.f32 %v7781_v34 }
 0xa21   :  { %2699 = vadd.xlane.f32.xlu0 %v2698_v17  ;;  %5936 = vrcp.f32 %v7783_v2 }
 0xa23   :  { %v7804_v49 = vpop.eup %5922  ;;  %5444 = vmatpush3.bf16.msra.mxu0 %v2789_v6 }
 0xa24   :  { %v2707_v19 = vsel %vm1167_vm4, %v7804_v49, 0.0  ;;  %v7808_v32 = vpop.eup %5924 }
 0xa25   :  { %2708 = vadd.xlane.f32.xlu1 %v2707_v19  ;;  %v2701_v23 = vsel %vm1167_vm4, %v7808_v32, 0.0 }
 0xa27   :  { %v7810_v54 = vpop.eup %5926 }
 0xa28   :  { %v7814_v42 = vpop.eup %5928  ;;  %v2716_v16 = vsel %vm1167_vm4, %v7810_v54, 0.0 }
 0xa29   :  { %2702 = vadd.xlane.f32.xlu1 %v2701_v23  ;;  %2717 = vadd.xlane.f32.xlu0 %v2716_v16  ;;  %v2719_v50 = vsel %vm1167_vm4, %v7814_v42, 0.0 }
 0xa2b   :  { %v7818_v30 = vpop.eup %5930 }
 0xa2c   :  { %v7822_v48 = vpop.eup %5932  ;;  %v2710_v12 = vsel %vm1167_vm4, %v7818_v30, 0.0 }
 0xa2d   :  { %2720 = vadd.xlane.f32.xlu1 %v2719_v50  ;;  %2711 = vadd.xlane.f32.xlu0 %v2710_v12  ;;  %v2713_v11 = vsel %vm1167_vm4, %v7822_v48, 0.0 }
 0xa31   :  { %2714 = vadd.xlane.f32.xlu1 %v2713_v11 }
 0xa42   :  { %2875 = vrot.lane.b32.xlu1 %v6848_v18, %s6303_s1 }
 0xa43   :  { %2877 = vrot.lane.b32.xlu0 %v6841_v4, %s6303_s1 }
 0xa46   :  { %3137 = vrot.lane.b32.xlu1 %v8637_v33, %s6315_s29 }
 0xa47   :  { %3139 = vrot.lane.b32.xlu0 %v8638_v26, %s6315_s29 }
 0xa4a   :  { %3133 = vrot.lane.b32.xlu1 %v8642_v59, %s6315_s29  ;;  %v7852_v59 = vld [vmem:[#allocation11 + $0x28] sm:$0xff]  }
 0xa4b   :  { %3135 = vrot.lane.b32.xlu0 %v8640_v43, %s6315_s29 }
 0xa4e   :  { %v2739_v47 = vpop.xlane.xlu1 %2738  ;;  %3127 = vrot.lane.b32.xlu1 %v8643_v45, %s6315_s29  ;;  %v2736_v56 = vpop.xlane.xlu0 %2735 }
 0xa4f   :  { %3125 = vrot.lane.b32.xlu0 %v8644_v37, %s6315_s29  ;;  %5938 = vrcp.f32 %v2739_v47 }
 0xa50   :  { %5940 = vrcp.f32 %v2736_v56 }
 0xa52   :  { %v2882_v9 = vpop.permute.xlu1 %2881  ;;  %3242 = vrot.lane.b32.xlu1 %v8641_v25, %s6315_s29  ;;  %v2742_v33 = vpop.xlane.xlu0 %2741 }
 0xa53   :  { %5455 = vmatprep.subr.bf16.mxu1 %v2882_v9  ;;  %3244 = vrot.lane.b32.xlu0 %v8639_v63, %s6315_s29  ;;  %v5935_v63 = vpop.eup %5934 }
 0xa54   :  { %5456 = vmatpush3.bf16.msra.mxu1 %v2882_v9  ;;  %v5937_v45 = vpop.eup %5936  ;;  %v2772_v23 = vmul.f32 %v5935_v63, %v7685_v61 }
 0xa55   :  { %v2773_v51 = vmul.f32 %v5937_v45, %v7699_v27 }
 0xa56   :  { %v2880_v26 = vpop.permute.xlu1 %2879  ;;  %3131 = vrot.lane.b32.xlu1 %v6964_v41, %s6315_s29  ;;  %v2745_v43 = vpop.xlane.xlu0 %2744 }
 0xa57   :  { %5457 = vmatprep.subr.bf16.mxu1 %v2880_v26  ;;  %3129 = vrot.lane.b32.xlu0 %v6935_v28, %s6315_s29  ;;  %v2783_v27 = vpack.c.bf16 %v2773_v51, %v2772_v23 }
 0xa58   :  { %5458 = vmatpush3.bf16.msra.mxu1 %v2880_v26 }
 0xa5a   :  { %3238 = vrot.lane.b32.xlu1 %v6996_v29, %s6315_s29  ;;  %v2787_v25 = vpop.permute.xlu0 %2786 }
 0xa5b   :  { %5445 = vmatprep.subr.bf16.mxu0 %v2787_v25  ;;  %3240 = vrot.lane.b32.xlu0 %v6978_v60, %s6315_s29 }
 0xa5c   :  { %5446 = vmatpush3.bf16.msra.mxu0 %v2787_v25 }
 0xa5d   :  { %5471 = vmatprep.subr.bf16.mxu0 %v7852_v59 }
 0xa5e   :  { %3232 = vrot.lane.b32.xlu1 %v7012_v40, %s6315_s29 }
 0xa5f   :  { %3230 = vrot.lane.b32.xlu0 %v6876_v14, %s6315_s29 }
 0xa62   :  { %3236 = vrot.lane.b32.xlu1 %v7024_v0, %s6315_s29 }
 0xa63   :  { %3234 = vrot.lane.b32.xlu0 %v8645_v46, %s6315_s29  ;;  %v5939_v46 = vpop.eup %5938 }
 0xa64   :  { %v5941_v2 = vpop.eup %5940  ;;  %v2775_v17 = vmul.f32 %v5939_v46, %v7761_v3 }
 0xa65   :  { %v2774_v6 = vmul.f32 %v5941_v2, %v7759_v44 }
 0xa67   :  { %v2784_v44 = vpack.c.bf16 %v2775_v17, %v2774_v6 }
 0xaa6   :  { %v2706_v28 = vpop.xlane.xlu0 %2705 }
 0xaaa   :  { %v2700_v41 = vpop.xlane.xlu0 %2699 }
 0xaab   :  { %5942 = vrcp.f32 %v2700_v41 }
 0xaae   :  { %v2709_v60 = vpop.xlane.xlu1 %2708 }
 0xaaf   :  { %5944 = vrcp.f32 %v2709_v60 }
 0xab0   :  { %5946 = vrcp.f32 %v2706_v28 }
 0xab2   :  { %v2703_v29 = vpop.xlane.xlu1 %2702  ;;  %v2718_v14 = vpop.xlane.xlu0 %2717 }
 0xab3   :  { %5948 = vrcp.f32 %v2703_v29 }
 0xab4   :  { %5950 = vrcp.f32 %v2745_v43 }
 0xab5   :  { %5952 = vrcp.f32 %v2742_v33 }
 0xab6   :  { %v2721_v40 = vpop.xlane.xlu1 %2720  ;;  %v2712_v0 = vpop.xlane.xlu0 %2711 }
 0xab7   :  { %5954 = vrcp.f32 %v2721_v40 }
 0xab8   :  { %5956 = vrcp.f32 %v2712_v0  ;;  %v5943_v36 = vpop.eup %5942 }
 0xab9   :  { %5958 = vrcp.f32 %v2718_v14  ;;  %v2762_v50 = vmul.f32 %v5943_v36, %v7800_v35  ;;  %v5663_v35 = vld [vmem:[#allocation11 + $0x20] sm:$0xff]  }
 0xaba   :  { %v2715_v37 = vpop.xlane.xlu1 %2714  ;;  %v2878_v34 = vpop.permute.xlu0 %2877 }
 0xabb   :  { %5960 = vrcp.f32 %v2715_v37  ;;  %5459 = vmatprep.subr.bf16.mxu1 %v2878_v34 }
 0xabc   :  { %5460 = vmatpush3.bf16.msra.mxu1 %v2878_v34  ;;  %v5945_v8 = vpop.eup %5944 }
 0xabd   :  { %v5947_v1 = vpop.eup %5946  ;;  %v2765_v16 = vmul.f32 %v5945_v8, %v7804_v49 }
 0xabe   :  { %v2876_v58 = vpop.permute.xlu1 %2875  ;;  %v3140_v39 = vpop.permute.xlu0 %3139  ;;  %v2764_v47 = vmul.f32 %v5947_v1, %v7795_v10 }
 0xabf   :  { %5461 = vmatprep.subr.bf16.mxu1 %v2876_v58  ;;  %v3163_v33 = vsel %vm988_vm0, %v3140_v39, 0 }
 0xac0   :  { %v5949_v19 = vpop.eup %5948  ;;  %5462 = vmatpush3.bf16.msra.mxu1 %v2876_v58  ;;  %v2779_v49 = vpack.c.bf16 %v2765_v16, %v2764_v47 }
 0xac1   :  { %v2763_v12 = vmul.f32 %v5949_v19, %v7808_v32  ;;  %5599 = vmatprep.subr.msk.bf16.mxu1 %vm988_vm0, %v3140_v39  ;;  %v5951_v11 = vpop.eup %5950 }
 0xac2   :  { %v3136_v56 = vpop.permute.xlu0 %3135  ;;  %v5953_v3 = vpop.eup %5952  ;;  %v2777_v10 = vmul.f32 %v5951_v11, %v7771_v20 }
 0xac3   :  { %v2778_v9 = vpack.c.bf16 %v2763_v12, %v2762_v50  ;;  %5464 = vmatmul.mubr.msk.bf16.vlgmr.msra.gmra.mxu1 %vm1167_vm4, %v2783_v27  ;;  %v3138_v26 = vpop.permute.xlu1 %3137  ;;  %v2776_v41 = vmul.f32 %v5953_v3, %v7767_v55 }
 0xac4   :  { %v5955_v61 = vpop.eup %5954  ;;  %5467 = vmatprep.mubr.msk.bf16.mxu1 %vm1167_vm4, %v2784_v44  ;;  %5492 = vmatpush3.bf16.xpose.msra.mxu1 %v3163_v33  ;;  %v3160_v45 = vsel %vm988_vm0, %v3138_v26, 0 }
 0xac5   :  { %v5957_v32 = vpop.eup %5956  ;;  %5447 = vmatprep.mubr.msk.bf16.mxu0 %vm1167_vm4, %v2778_v9  ;;  %5600 = vmatprep.subr.msk.bf16.mxu1 %vm988_vm0, %v3138_v26  ;;  %v2769_v14 = vmul.f32 %v5955_v61, %v7814_v42  ;;  %v2785_v40 = vpack.c.bf16 %v2777_v10, %v2776_v41  ;;  %v3157_v42 = vsel %vm988_vm0, %v3136_v56, 0 }
 0xac6   :  { %v5959_v43 = vpop.eup %5958  ;;  %5448 = vmatmul.mubr.msk.bf16.vlgmr.msra.gmra.mxu0 %vm1167_vm4, %v2779_v49  ;;  %v3126_v25 = vpop.permute.xlu0 %3125  ;;  %v2766_v60 = vmul.f32 %v5957_v32, %v7818_v30 }
 0xac7   :  { %5472 = vmatpush3.bf16.msra.mxu0 %v7852_v59  ;;  %v2768_v20 = vmul.f32 %v5959_v43, %v7810_v54  ;;  %v3134_v54 = vpop.permute.xlu1 %3133 }
 0xac8   :  { %v5961_v28 = vpop.eup %5960  ;;  %5473 = vmatprep.subr.bf16.mxu0 %v5663_v35  ;;  %v3154_v30 = vsel %vm988_vm0, %v3134_v54, 0 }
 0xac9   :  { %v2767_v29 = vmul.f32 %v5961_v28, %v7822_v48  ;;  %v2781_v55 = vpack.c.bf16 %v2769_v14, %v2768_v20 }
 0xaca   :  { %v3245_v0 = vpop.permute.xlu0 %3244 }
 0xacb   :  { %v2780_v63 = vpack.c.bf16 %v2767_v29, %v2766_v60  ;;  %5474 = vmatpush3.bf16.msra.mxu0 %v5663_v35  ;;  %5468 = vmatmul.mubr.msk.bf16.gmra.mxu1 %vm1167_vm4, %v2785_v40  ;;  %v3128_v48 = vpop.permute.xlu1 %3127  ;;  %v3268_v23 = vsel %vm988_vm0, %v3245_v0, 0 }
 0xacc   :  { %5603 = vmatprep.subr.msk.bf16.mxu0 %vm988_vm0, %v3245_v0  ;;  %5494 = vmatpush3.bf16.xpose.msra.mxu1 %v3160_v45 }
 0xacd   :  { %5499 = vmatprep.mubr.msk.bf16.mxu1 %vm988_vm0, %v3126_v25  ;;  %5451 = vmatprep.mubr.msk.bf16.mxu0 %vm1167_vm4, %v2780_v63 }
 0xace   :  { %5601 = vmatprep.subr.msk.bf16.mxu1 %vm988_vm0, %v3136_v56  ;;  %5452 = vmatmul.mubr.msk.bf16.gmra.mxu0 %vm1167_vm4, %v2781_v55  ;;  %v3130_v59 = vpop.permute.xlu0 %3129 }
 0xacf   :  { %v3243_v37 = vpop.permute.xlu1 %3242 }
 0xad0   :  { %v3265_v9 = vsel %vm988_vm0, %v3243_v37, 0 }
 0xad2   :  { %v3241_v33 = vpop.permute.xlu0 %3240 }
 0xad3   :  { %v3132_v46 = vpop.permute.xlu1 %3131  ;;  %v3262_v35 = vsel %vm988_vm0, %v3241_v33, 0 }
 0xad4   :  { %5496 = vmatpush3.bf16.xpose.msra.mxu1 %v3157_v42 }
 0xad5   :  { %5602 = vmatprep.subr.msk.bf16.mxu1 %vm988_vm0, %v3134_v54 }
 0xad6   :  { %v3231_v40 = vpop.permute.xlu0 %3230 }
 0xad7   :  { %v3239_v32 = vpop.permute.xlu1 %3238 }
 0xad8   :  { %v3259_v14 = vsel %vm988_vm0, %v3239_v32, 0 }
 0xadc   :  { %5498 = vmatpush3.bf16.xpose.msra.mxu1 %v3154_v30  ;;  %v3233_v30 = vpop.permute.xlu1 %3232 }
 0xae3   :  { %5500 = vmatmul.mubr.msk.bf16.vlgmr.msra.gmra.mxu1 %vm988_vm0, %v3128_v48 }
 0xae4   :  { %5503 = vmatprep.mubr.msk.bf16.mxu1 %vm988_vm0, %v3130_v59  ;;  %v3235_v59 = vpop.permute.xlu0 %3234 }
 0xaeb   :  { %5504 = vmatmul.mubr.msk.bf16.gmra.mxu1 %vm988_vm0, %v3132_v46 }
 0xb83   :  { %v5465_v34 = vpop.f32.mrf.mxu1 }
 0xb85   :  { %v2933_v2 = vpop.f32.mrf.mxu1 }
 0xb86   :  { %v5449_v36 = vpop.f32.mrf.mxu0 }
 0xb87   :  { %v5466_v8 = vpop.f32.mrf.mxu1 }
 0xb88   :  { %v2844_v51 = vpop.f32.mrf.mxu0  ;;  %v2969_v49 = vpack.c.bf16 %v5466_v8, %v5465_v34 }
 0xb89   :  { %v2936_v1 = vpop.f32.mrf.mxu1 }
 0xb8a   :  { %v5450_v58 = vpop.f32.mrf.mxu0  ;;  %v2968_v44 = vpack.c.bf16 %v2936_v1, %v2933_v2 }
 0xb8b   :  { %v2965_v17 = vpack.c.bf16 %v5450_v58, %v5449_v36  ;;  %v5469_v16 = vpop.f32.mrf.mxu1 }
 0xb8c   :  { %v2847_v39 = vpop.f32.mrf.mxu0 }
 0xb8d   :  { %v2964_v6 = vpack.c.bf16 %v2847_v39, %v2844_v51  ;;  %v2949_v27 = vpop.f32.mrf.mxu1 }
 0xb8e   :  { %v5453_v19 = vpop.f32.mrf.mxu0 }
 0xb8f   :  { %5475 = vmatprep.mubr.msk.bf16.mxu0 %vm988_vm0, %v2964_v6  ;;  %v5470_v3 = vpop.f32.mrf.mxu1 }
 0xb90   :  { %v2860_v50 = vpop.f32.mrf.mxu0  ;;  %5476 = vmatmul.mubr.msk.bf16.vlgmr.msra.gmra.mxu0 %vm988_vm0, %v2965_v17  ;;  %v2971_v28 = vpack.c.bf16 %v5470_v3, %v5469_v16 }
 0xb91   :  { %5508 = vmatpush3.bf16.xpose.msra.mxu0 %v3268_v23  ;;  %v2952_v61 = vpop.f32.mrf.mxu1 }
 0xb92   :  { %5604 = vmatprep.subr.msk.bf16.mxu0 %vm988_vm0, %v3243_v37  ;;  %v5454_v12 = vpop.f32.mrf.mxu0  ;;  %v2970_v26 = vpack.c.bf16 %v2952_v61, %v2949_v27 }
 0xb93   :  { %v2967_v56 = vpack.c.bf16 %v5454_v12, %v5453_v19 }
 0xb94   :  { %v2863_v11 = vpop.f32.mrf.mxu0 }
 0xb95   :  { %v2966_v47 = vpack.c.bf16 %v2863_v11, %v2860_v50 }
 0xb97   :  { %5479 = vmatprep.mubr.msk.bf16.mxu0 %vm988_vm0, %v2966_v47 }
 0xb98   :  { %5480 = vmatmul.mubr.msk.bf16.gmra.mxu0 %vm988_vm0, %v2967_v56 }
 0xb99   :  { %5510 = vmatpush3.bf16.xpose.msra.mxu0 %v3265_v9  ;;  %5483 = vmatprep.mubr.msk.bf16.mxu0 %vm988_vm0, %v2968_v44 }
 0xb9a   :  { %5605 = vmatprep.subr.msk.bf16.mxu0 %vm988_vm0, %v3241_v33 }
 0xba0   :  { %5484 = vmatmul.mubr.msk.bf16.gmra.mxu0 %vm988_vm0, %v2969_v49 }
 0xba1   :  { %5512 = vmatpush3.bf16.xpose.msra.mxu0 %v3262_v35  ;;  %5487 = vmatprep.mubr.msk.bf16.mxu0 %vm988_vm0, %v2970_v26 }
 0xba2   :  { %5606 = vmatprep.subr.msk.bf16.mxu0 %vm988_vm0, %v3239_v32 }
 0xba3   :  { %v5501_v10 = vpop.f32.mrf.mxu1 }
 0xba4   :  { %v3208_v43 = vadd.f32 %v5501_v10, %v8674_v52 }
 0xba5   :  { %v3199_v25 = vpop.f32.mrf.mxu1 }
 0xba6   :  { %v3200_v41 = vadd.f32 %v3199_v25, %v8675_v57  ;;  %v3341_v60 = vsel %vm1167_vm4, %v3208_v43, -inf }
 0xba7   :  { %3342 = vmax.xlane.f32.xlu0 %v3341_v60  ;;  %v5502_v29 = vpop.f32.mrf.mxu1 }
 0xba8   :  { %5488 = vmatmul.mubr.msk.bf16.gmra.mxu0 %vm988_vm0, %v2971_v28  ;;  %v3211_v63 = vadd.f32 %v5502_v29, %v8676_v24  ;;  %v3335_v20 = vsel %vm1167_vm4, %v3200_v41, -inf }
 0xba9   :  { %5514 = vmatpush3.bf16.xpose.msra.mxu0 %v3259_v14  ;;  %v3202_v0 = vpop.f32.mrf.mxu1  ;;  %5515 = vmatprep.mubr.msk.bf16.mxu0 %vm988_vm0, %v3231_v40 }
 0xbaa   :  { %v3203_v52 = vadd.f32 %v3202_v0, %v8677_v31  ;;  %v3344_v54 = vsel %vm1167_vm4, %v3211_v63, -inf }
 0xbab   :  { %3336 = vmax.xlane.f32.xlu0 %v3335_v20  ;;  %v5505_v57 = vpop.f32.mrf.mxu1 }
 0xbac   :  { %v3338_v45 = vsel %vm1167_vm4, %v3203_v52, -inf  ;;  %v3224_v42 = vadd.f32 %v5505_v57, %v8678_v22 }
 0xbad   :  { %3339 = vmax.xlane.f32.xlu1 %v3338_v45  ;;  %v3215_v55 = vpop.f32.mrf.mxu1 }
 0xbae   :  { %v3216_v37 = vadd.f32 %v3215_v55, %v8680_v5  ;;  %v3353_v34 = vsel %vm1167_vm4, %v3224_v42, -inf }
 0xbaf   :  { %3345 = vmax.xlane.f32.xlu0 %v3344_v54  ;;  %v5506_v48 = vpop.f32.mrf.mxu1 }
 0xbb0   :  { %v3227_v24 = vadd.f32 %v5506_v48, %v8679_v21  ;;  %5516 = vmatmul.mubr.msk.bf16.vlgmr.msra.gmra.mxu0 %vm988_vm0, %v3233_v30  ;;  %v3347_v36 = vsel %vm1167_vm4, %v3216_v37, -inf  ;;  %v3237_v21 = vpop.permute.xlu1 %3236  ;;  %v8687_v48 = vld [vmem:[#allocation27_spill] sm:$0xff] }
 0xbb1   :  { %v3218_v31 = vpop.f32.mrf.mxu1  ;;  %5519 = vmatprep.mubr.msk.bf16.mxu0 %vm988_vm0, %v3235_v59 }
 0xbb2   :  { %v3219_v46 = vadd.f32 %v3218_v31, %v8681_v62  ;;  %v3356_v22 = vsel %vm1167_vm4, %v3227_v24, -inf  ;;  %v8688_v31 = vld [vmem:[#allocation57_spill] sm:$0xff] }
 0xbb3   :  { %3354 = vmax.xlane.f32.xlu0 %v3353_v34  ;;  %3357 = vmax.xlane.f32.xlu1 %v3356_v22  ;;  %v8690_v34 = vld [vmem:[#allocation28_spill] sm:$0xff] }
 0xbb4   :  { %v3350_v2 = vsel %vm1167_vm4, %v3219_v46, -inf }
 0xbb7   :  { %3351 = vmax.xlane.f32.xlu1 %v3350_v2  ;;  %3348 = vmax.xlane.f32.xlu0 %v3347_v36  ;;  %v8691_v2 = vld [vmem:[#allocation58_spill] sm:$0xff] }
 0xbb8   :  { %5520 = vmatmul.mubr.msk.bf16.gmra.mxu0 %vm988_vm0, %v3237_v21  ;;  %v8692_v36 = vld [vmem:[#allocation26_spill] sm:$0xff] }
 0xbb9   :  { %v2370_v21 = vadd.f32 %v8692_v36, %v8691_v2 }
 0xc30   :  { %v3343_v8 = vpop.xlane.xlu0 %3342 }
 0xc31   :  { %v3385_v51 = vsub.f32 %v3208_v43, %v3343_v8 }
 0xc33   :  { %v3403_v5 = vmul.f32 1.442695, %v3385_v51 }
 0xc34   :  { %v3337_v58 = vpop.xlane.xlu0 %3336 }
 0xc35   :  { %5962 = vpow2.f32 %v3403_v5  ;;  %v3383_v62 = vsub.f32 %v3200_v41, %v3337_v58  ;;  %v8693_v58 = vld [vmem:[#allocation59_spill] sm:$0xff] }
 0xc36   :  { %v3340_v1 = vpop.xlane.xlu1 %3339 }
 0xc37   :  { %v3399_v39 = vmul.f32 1.442695, %v3383_v62  ;;  %v3384_v6 = vsub.f32 %v3203_v52, %v3340_v1  ;;  %v8694_v62 = vld [vmem:[#allocation30_spill] sm:$0xff] }
 0xc38   :  { %v3346_v17 = vpop.xlane.xlu0 %3345  ;;  %v2362_v1 = vadd.f32 %v8694_v62, %v8693_v58  ;;  %v8710_v62 = vld [vmem:[#allocation50_spill] sm:$0xff] }
 0xc39   :  { %5964 = vpow2.f32 %v3399_v39  ;;  %v3386_v19 = vsub.f32 %v3211_v63, %v3346_v17  ;;  %v3401_v23 = vmul.f32 1.442695, %v3384_v6  ;;  %v8695_v17 = vld [vmem:[#allocation60_spill] sm:$0xff] }
 0xc3b   :  { %v3405_v16 = vmul.f32 1.442695, %v3386_v19  ;;  %v8696_v19 = vld [vmem:[#allocation25_spill] sm:$0xff] }
 0xc3c   :  { %v3358_v50 = vpop.xlane.xlu1 %3357  ;;  %v3355_v12 = vpop.xlane.xlu0 %3354 }
 0xc3d   :  { %5966 = vpow2.f32 %v3405_v16  ;;  %v3389_v33 = vsub.f32 %v3224_v42, %v3355_v12  ;;  %v3390_v35 = vsub.f32 %v3227_v24, %v3358_v50  ;;  %v8697_v12 = vld [vmem:[#allocation61_spill] sm:$0xff] }
 0xc3e   :  { %5968 = vpow2.f32 %v3401_v23  ;;  %v2373_v23 = vadd.f32 %v8696_v19, %v8695_v17 }
 0xc3f   :  { %v3411_v32 = vmul.f32 1.442695, %v3389_v33  ;;  %v3413_v28 = vmul.f32 1.442695, %v3390_v35  ;;  %v8701_v35 = vld [vmem:[#allocation63_spill] sm:$0xff] }
 0xc40   :  { %v3352_v27 = vpop.xlane.xlu1 %3351  ;;  %v3349_v11 = vpop.xlane.xlu0 %3348 }
 0xc41   :  { %v3388_v47 = vsub.f32 %v3219_v46, %v3352_v27  ;;  %v3387_v56 = vsub.f32 %v3216_v37, %v3349_v11  ;;  %v8689_v37 = vld [vmem:[#allocation33_spill] sm:$0xff]  ;;  %v8698_v27 = vld [vmem:[#allocation32_spill] sm:$0xff] }
 0xc42   :  { %v7939_v44 = vpop.eup %5962  ;;  %v2349_v46 = vadd.f32 %v8689_v37, %v8688_v31  ;;  %v2365_v11 = vadd.f32 %v8698_v27, %v8697_v12  ;;  %v8707_v37 = vld [vmem:[#allocation47_spill] sm:$0xff]  ;;  %v8711_v27 = vld [vmem:[#allocation53_spill] sm:$0xff] }
 0xc43   :  { %v3407_v9 = vmul.f32 1.442695, %v3387_v56  ;;  %v3437_v3 = vsel %vm1167_vm4, %v7939_v44, 0.0  ;;  %v3409_v61 = vmul.f32 1.442695, %v3388_v47 }
 0xc44   :  { %3438 = vadd.xlane.f32.xlu0 %v3437_v3  ;;  %v8700_v3 = vld [vmem:[#allocation24_spill] sm:$0xff] }
 0xc45   :  { %5970 = vpow2.f32 %v3407_v9  ;;  %v8699_v9 = vld [vmem:[#allocation62_spill] sm:$0xff] }
 0xc46   :  { %v7943_v49 = vpop.eup %5964  ;;  %5972 = vpow2.f32 %v3409_v61  ;;  %v2386_v33 = vadd.f32 %v8700_v3, %v8699_v9  ;;  %v8712_v9 = vld [vmem:[#allocation54_spill] sm:$0xff] }
 0xc47   :  { %v3431_v26 = vsel %vm1167_vm4, %v7943_v49, 0.0  ;;  %5974 = vpow2.f32 %v3411_v32  ;;  %v8702_v32 = vld [vmem:[#allocation38_spill] sm:$0xff] }
 0xc48   :  { %3432 = vadd.xlane.f32.xlu0 %v3431_v26  ;;  %5976 = vpow2.f32 %v3413_v28 }
 0xc4a   :  { %v7947_v10 = vpop.eup %5966 }
 0xc4b   :  { %v3440_v43 = vsel %vm1167_vm4, %v7947_v10, 0.0  ;;  %v7951_v25 = vpop.eup %5968 }
 0xc4c   :  { %3441 = vadd.xlane.f32.xlu1 %v3440_v43  ;;  %v3434_v41 = vsel %vm1167_vm4, %v7951_v25, 0.0  ;;  %v2378_v43 = vadd.f32 %v8702_v32, %v8701_v35  ;;  %v8713_v35 = vld [vmem:[#allocation31_spill] sm:$0xff]  ;;  %v8714_v32 = vld [vmem:[#allocation34_spill] sm:$0xff] }
 0xc50   :  { %v5477_v60 = vpop.f32.mrf.mxu0  ;;  %3435 = vadd.xlane.f32.xlu1 %v3434_v41 }
 0xc51   :  { %v7956_v29 = vadd.f32 %v5477_v60, %v7609_v38  ;;  %v8703_v60 = vld [vmem:[#allocation64_spill] sm:$0xff] }
 0xc52   :  { %v3046_v14 = vpop.f32.mrf.mxu0  ;;  %v7958_v40 = vpop.eup %5970 }
 0xc53   :  { %v7961_v0 = vadd.f32 %v3046_v14, %v7613_v53  ;;  %v3443_v52 = vsel %vm1167_vm4, %v7958_v40, 0.0  ;;  %v7965_v20 = vpop.eup %5972  ;;  %v8704_v14 = vld [vmem:[#allocation55_spill] sm:$0xff] }
 0xc54   :  { %v5478_v63 = vpop.f32.mrf.mxu0  ;;  %3444 = vadd.xlane.f32.xlu1 %v3443_v52  ;;  %v3446_v42 = vsel %vm1167_vm4, %v7965_v20, 0.0  ;;  %v7975_v53 = vpop.eup %5974 }
 0xc55   :  { %v7968_v57 = vadd.f32 %v5478_v63, %v7617_v15  ;;  %v3449_v24 = vsel %vm1167_vm4, %v7975_v53, 0.0  ;;  %v2389_v63 = vadd.f32 %v8704_v14, %v8703_v60  ;;  %v8716_v60 = vld [vmem:[#allocation52_spill] sm:$0xff] }
 0xc56   :  { %v3049_v45 = vpop.f32.mrf.mxu0 }
 0xc57   :  { %v7971_v38 = vadd.f32 %v3049_v45, %v7619_v7  ;;  %v7985_v7 = vpop.eup %5976 }
 0xc58   :  { %v5481_v55 = vpop.f32.mrf.mxu0  ;;  %3447 = vadd.xlane.f32.xlu1 %v3446_v42  ;;  %v3452_v5 = vsel %vm1167_vm4, %v7985_v7, 0.0  ;;  %v8706_v42 = vld [vmem:[#allocation56_spill] sm:$0xff] }
 0xc59   :  { %v7978_v54 = vadd.f32 %v5481_v55, %v7621_v13  ;;  %v8705_v55 = vld [vmem:[#allocation65_spill] sm:$0xff] }
 0xc5a   :  { %v3062_v30 = vpop.f32.mrf.mxu0 }
 0xc5b   :  { %v7981_v59 = vadd.f32 %v3062_v30, %v8687_v48  ;;  %v2381_v30 = vadd.f32 %v8706_v42, %v8705_v55  ;;  %v8717_v55 = vld [vmem:[#allocation35_spill] sm:$0xff]  ;;  %v8718_v42 = vld [vmem:[#allocation36_spill] sm:$0xff] }
 0xc5c   :  { %v5482_v15 = vpop.f32.mrf.mxu0  ;;  %3450 = vadd.xlane.f32.xlu1 %v3449_v24 }
 0xc5d   :  { %v7990_v22 = vadd.f32 %v5482_v15, %v8690_v34 }
 0xc5e   :  { %v3065_v13 = vpop.f32.mrf.mxu0 }
 0xc5f   :  { %v7994_v8 = vadd.f32 %v3065_v13, %v2349_v46  ;;  %v8708_v13 = vld [vmem:[#allocation48_spill] sm:$0xff] }
 0xc60   :  { %v5485_v51 = vpop.f32.mrf.mxu0  ;;  %3453 = vadd.xlane.f32.xlu1 %v3452_v5 }
 0xc61   :  { %v8000_v39 = vadd.f32 %v5485_v51, %v2370_v21  ;;  %v8709_v51 = vld [vmem:[#allocation49_spill] sm:$0xff] }
 0xc62   :  { %v3078_v6 = vpop.f32.mrf.mxu0 }
 0xc63   :  { %v8004_v16 = vadd.f32 %v3078_v6, %v2362_v1 }
 0xc64   :  { %v5486_v50 = vpop.f32.mrf.mxu0 }
 0xc65   :  { %v8008_v47 = vadd.f32 %v5486_v50, %v2373_v23 }
 0xc66   :  { %v3081_v56 = vpop.f32.mrf.mxu0 }
 0xc67   :  { %v8012_v61 = vadd.f32 %v3081_v56, %v2365_v11 }
 0xc68   :  { %v5489_v26 = vpop.f32.mrf.mxu0 }
 0xc69   :  { %v8016_v28 = vadd.f32 %v5489_v26, %v2386_v33 }
 0xc6a   :  { %v3094_v41 = vpop.f32.mrf.mxu0 }
 0xc6b   :  { %v8020_v52 = vadd.f32 %v3094_v41, %v2378_v43  ;;  %v8715_v43 = vld [vmem:[#allocation51_spill] sm:$0xff] }
 0xc6c   :  { %v5490_v45 = vpop.f32.mrf.mxu0 }
 0xc6d   :  { %v8024_v48 = vadd.f32 %v5490_v45, %v2389_v63 }
 0xc6e   :  { %v3097_v15 = vpop.f32.mrf.mxu0 }
 0xc6f   :  { %v8026_v24 = vadd.f32 %v3097_v15, %v2381_v30  ;;  %v8719_v15 = vld [vmem:[#allocation37_spill] sm:$0xff] }
 0xc70   :  { %v5517_v31 = vpop.f32.mrf.mxu0 }
 0xc71   :  { %v8029_v46 = vadd.f32 %v5517_v31, %v8707_v37 }
 0xc72   :  { %v3304_v34 = vpop.f32.mrf.mxu0 }
 0xc73   :  { %v8032_v2 = vadd.f32 %v3304_v34, %v8708_v13  ;;  %v3365_v36 = vsel %vm1167_vm4, %v8029_v46, -inf }
 0xc74   :  { %v5518_v21 = vpop.f32.mrf.mxu0  ;;  %3366 = vmax.xlane.f32.xlu0 %v3365_v36 }
 0xc75   :  { %v8037_v5 = vadd.f32 %v5518_v21, %v8709_v51  ;;  %v3359_v6 = vsel %vm1167_vm4, %v8032_v2, -inf }
 0xc76   :  { %v3307_v58 = vpop.f32.mrf.mxu0 }
 0xc77   :  { %v8040_v1 = vadd.f32 %v3307_v58, %v8710_v62  ;;  %v3368_v17 = vsel %vm1167_vm4, %v8037_v5, -inf }
 0xc78   :  { %v5521_v19 = vpop.f32.mrf.mxu0  ;;  %3360 = vmax.xlane.f32.xlu0 %v3359_v6  ;;  %3369 = vmax.xlane.f32.xlu1 %v3368_v17 }
 0xc79   :  { %v3362_v50 = vsel %vm1167_vm4, %v8040_v1, -inf  ;;  %v8063_v41 = vadd.f32 %v5521_v19, %v8715_v43 }
 0xc7a   :  { %v3320_v23 = vpop.f32.mrf.mxu0 }
 0xc7b   :  { %v8066_v14 = vadd.f32 %v3320_v23, %v8716_v60  ;;  %v3377_v63 = vsel %vm1167_vm4, %v8063_v41, -inf }
 0xc7c   :  { %v5522_v12 = vpop.f32.mrf.mxu0  ;;  %3363 = vmax.xlane.f32.xlu1 %v3362_v50 }
 0xc7d   :  { %v8049_v11 = vadd.f32 %v5522_v12, %v8711_v27  ;;  %v3371_v45 = vsel %vm1167_vm4, %v8066_v14, -inf }
 0xc7e   :  { %v3323_v56 = vpop.f32.mrf.mxu0 }
 0xc7f   :  { %v8052_v3 = vadd.f32 %v3323_v56, %v8712_v9  ;;  %v3380_v33 = vsel %vm1167_vm4, %v8049_v11, -inf }
 0xc80   :  { %3381 = vmax.xlane.f32.xlu1 %v3380_v33 }
 0xc81   :  { %v3374_v26 = vsel %vm1167_vm4, %v8052_v3, -inf }
 0xc84   :  { %3375 = vmax.xlane.f32.xlu1 %v3374_v26 }
 0xc8e   :  { %3525 = vrot.lane.b32.xlu0 %v8713_v35, %s6315_s29 }
 0xc95   :  { %3523 = vrot.lane.b32.xlu1 %v8714_v32, %s6315_s29 }
 0xcad   :  { %3378 = vmax.xlane.f32.xlu0 %v3377_v63 }
 0xcb1   :  { %3372 = vmax.xlane.f32.xlu0 %v3371_v45 }
 0xcc7   :  { %3521 = vrot.lane.b32.xlu0 %v8717_v55, %s6315_s29 }
 0xccb   :  { %3519 = vrot.lane.b32.xlu0 %v8718_v42, %s6315_s29 }
 0xccd   :  { %v3439_v30 = vpop.xlane.xlu0 %3438 }
 0xcce   :  { %5978 = vrcp.f32 %v3439_v30 }
 0xccf   :  { %3614 = vrot.lane.b32.xlu0 %v8719_v15, %s6315_s29 }
 0xcd1   :  { %v3433_v31 = vpop.xlane.xlu0 %3432 }
 0xcd5   :  { %v3442_v37 = vpop.xlane.xlu1 %3441 }
 0xcd6   :  { %5980 = vrcp.f32 %v3442_v37 }
 0xcd7   :  { %5982 = vrcp.f32 %v3433_v31 }
 0xcd9   :  { %v3436_v34 = vpop.xlane.xlu1 %3435 }
 0xcda   :  { %5984 = vrcp.f32 %v3436_v34 }
 0xcdb   :  { %v5979_v36 = vpop.eup %5978 }
 0xcdc   :  { %v8079_v58 = vmul.f32 %v5979_v36, %v7939_v44 }
 0xcdd   :  { %v3445_v13 = vpop.xlane.xlu1 %3444 }
 0xcde   :  { %5986 = vrcp.f32 %v3445_v13 }
 0xce1   :  { %v3448_v21 = vpop.xlane.xlu1 %3447 }
 0xce2   :  { %5988 = vrcp.f32 %v3448_v21 }
 0xce3   :  { %v5981_v51 = vpop.eup %5980 }
 0xce4   :  { %v8082_v62 = vmul.f32 %v5981_v51, %v7947_v10  ;;  %v5983_v6 = vpop.eup %5982 }
 0xce5   :  { %v3495_v23 = vmul.f32 %v5983_v6, %v7943_v49  ;;  %v3451_v33 = vpop.xlane.xlu1 %3450 }
 0xce6   :  { %v3512_v17 = vpack.c.bf16 %v8082_v62, %v8079_v58 }
 0xce7   :  { %v5985_v19 = vpop.eup %5984 }
 0xce8   :  { %v3496_v50 = vmul.f32 %v5985_v19, %v7951_v25 }
 0xce9   :  { %v3454_v26 = vpop.xlane.xlu1 %3453 }
 0xcea   :  { %v3511_v12 = vpack.c.bf16 %v3496_v50, %v3495_v23 }
 0xceb   :  { %v5987_v27 = vpop.eup %5986 }
 0xcec   :  { %5531 = vmatprep.mubr.msk.bf16.mxu1 %vm1167_vm4, %v3511_v12  ;;  %v8090_v44 = vmul.f32 %v5987_v27, %v7958_v40 }
 0xcef   :  { %v5989_v56 = vpop.eup %5988 }
 0xcf0   :  { %v8093_v10 = vmul.f32 %v5989_v56, %v7965_v20 }
 0xcf2   :  { %v3513_v9 = vpack.c.bf16 %v8093_v10, %v8090_v44 }
 0xcfd   :  { %v3367_v35 = vpop.xlane.xlu0 %3366 }
 0xcfe   :  { %v3393_v49 = vsub.f32 %v8029_v46, %v3367_v35 }
 0xd00   :  { %v3419_v25 = vmul.f32 1.442695, %v3393_v49 }
 0xd01   :  { %v3370_v32 = vpop.xlane.xlu1 %3369  ;;  %v3361_v43 = vpop.xlane.xlu0 %3360 }
 0xd02   :  { %5990 = vpow2.f32 %v3419_v25  ;;  %v3394_v60 = vsub.f32 %v8037_v5, %v3370_v32  ;;  %v3391_v40 = vsub.f32 %v8032_v2, %v3361_v43  ;;  %v5664_v43 = vld [vmem:[#allocation11 + $0x38] sm:$0xff]  }
 0xd04   :  { %v3415_v63 = vmul.f32 1.442695, %v3391_v40  ;;  %v3421_v45 = vmul.f32 1.442695, %v3394_v60 }
 0xd05   :  { %v3364_v20 = vpop.xlane.xlu1 %3363  ;;  %v3526_v55 = vpop.permute.xlu0 %3525 }
 0xd06   :  { %v3392_v42 = vsub.f32 %v8040_v1, %v3364_v20  ;;  %5523 = vmatprep.subr.bf16.mxu1 %v3526_v55  ;;  %5992 = vpow2.f32 %v3415_v63 }
 0xd07   :  { %5524 = vmatpush3.bf16.msra.mxu1 %v3526_v55  ;;  %5994 = vpow2.f32 %v3421_v45 }
 0xd08   :  { %v3417_v30 = vmul.f32 1.442695, %v3392_v42 }
 0xd09   :  { %v3382_v46 = vpop.xlane.xlu1 %3381 }
 0xd0a   :  { %5996 = vpow2.f32 %v3417_v30  ;;  %v3398_v19 = vsub.f32 %v8049_v11, %v3382_v46 }
 0xd0b   :  { %5998 = vrcp.f32 %v3454_v26 }
 0xd0c   :  { %6000 = vrcp.f32 %v3451_v33  ;;  %v3429_v27 = vmul.f32 1.442695, %v3398_v19 }
 0xd0d   :  { %v3376_v15 = vpop.xlane.xlu1 %3375 }
 0xd0e   :  { %v3396_v56 = vsub.f32 %v8052_v3, %v3376_v15 }
 0xd0f   :  { %v8101_v31 = vpop.eup %5990 }
 0xd10   :  { %v3461_v5 = vsel %vm1167_vm4, %v8101_v31, 0.0 }
 0xd11   :  { %v3524_v2 = vpop.permute.xlu1 %3523  ;;  %3462 = vadd.xlane.f32.xlu0 %v3461_v5 }
 0xd12   :  { %5525 = vmatprep.subr.bf16.mxu1 %v3524_v2 }
 0xd13   :  { %5526 = vmatpush3.bf16.msra.mxu1 %v3524_v2  ;;  %v8105_v37 = vpop.eup %5992 }
 0xd14   :  { %v3455_v1 = vsel %vm1167_vm4, %v8105_v37, 0.0  ;;  %v8109_v34 = vpop.eup %5994 }
 0xd15   :  { %3456 = vadd.xlane.f32.xlu0 %v3455_v1  ;;  %v3464_v21 = vsel %vm1167_vm4, %v8109_v34, 0.0 }
 0xd17   :  { %v8111_v13 = vpop.eup %5996 }
 0xd18   :  { %v3458_v36 = vsel %vm1167_vm4, %v8111_v13, 0.0  ;;  %v5999_v11 = vpop.eup %5998 }
 0xd19   :  { %3459 = vadd.xlane.f32.xlu1 %v3458_v36  ;;  %3465 = vadd.xlane.f32.xlu0 %v3464_v21  ;;  %v6001_v26 = vpop.eup %6000  ;;  %v3502_v49 = vmul.f32 %v5999_v11, %v7985_v7  ;;  %v8720_v7 = vld [vmem:[#allocation29_spill] sm:$0xff] }
 0xd1a   :  { %v3501_v25 = vmul.f32 %v6001_v26, %v7975_v53  ;;  %v5665_v53 = vld [vmem:[#allocation11 + $0x30] sm:$0xff]  }
 0xd2f   :  { %3610 = vrot.lane.b32.xlu0 %v6841_v4, %s6315_s29 }
 0xd33   :  { %3608 = vrot.lane.b32.xlu0 %v6848_v18, %s6315_s29  ;;  %v3425_v18 = vmul.f32 1.442695, %v3396_v56 }
 0xd36   :  { %v3379_v51 = vpop.xlane.xlu0 %3378 }
 0xd37   :  { %v3397_v6 = vsub.f32 %v8063_v41, %v3379_v51 }
 0xd39   :  { %v3427_v23 = vmul.f32 1.442695, %v3397_v6 }
 0xd3a   :  { %v3373_v50 = vpop.xlane.xlu0 %3372 }
 0xd3b   :  { %6002 = vpow2.f32 %v3427_v23  ;;  %v3395_v12 = vsub.f32 %v8066_v14, %v3373_v50 }
 0xd3d   :  { %v3423_v35 = vmul.f32 1.442695, %v3395_v12 }
 0xd3e   :  { %v3522_v4 = vpop.permute.xlu0 %3521 }
 0xd3f   :  { %6004 = vpow2.f32 %v3423_v35  ;;  %5527 = vmatprep.subr.bf16.mxu1 %v3522_v4 }
 0xd40   :  { %5528 = vmatpush3.bf16.msra.mxu1 %v3522_v4  ;;  %6006 = vpow2.f32 %v3429_v27 }
 0xd41   :  { %6008 = vpow2.f32 %v3425_v18 }
 0xd42   :  { %v3520_v41 = vpop.permute.xlu0 %3519 }
 0xd43   :  { %5529 = vmatprep.subr.bf16.mxu1 %v3520_v41 }
 0xd44   :  { %5530 = vmatpush3.bf16.msra.mxu1 %v3520_v41 }
 0xd45   :  { %5555 = vmatprep.subr.bf16.mxu1 %v5664_v43 }
 0xd46   :  { %v3615_v33 = vpop.permute.xlu0 %3614 }
 0xd47   :  { %5532 = vmatmul.mubr.msk.bf16.vlgmr.msra.gmra.mxu1 %vm1167_vm4, %v3512_v17  ;;  %5539 = vmatprep.subr.bf16.mxu0 %v3615_v33  ;;  %v3514_v17 = vpack.c.bf16 %v3502_v49, %v3501_v25 }
 0xd48   :  { %v8129_v3 = vpop.eup %6002  ;;  %5535 = vmatprep.mubr.msk.bf16.mxu1 %vm1167_vm4, %v3513_v9  ;;  %5540 = vmatpush3.bf16.msra.mxu0 %v3615_v33  ;;  %v8721_v33 = vmov 0  }
 0xd49   :  { %v3473_v14 = vsel %vm1167_vm4, %v8129_v3, 0.0  ;;  %5556 = vmatpush3.bf16.msra.mxu1 %v5664_v43 }
 0xd4a   :  { %3474 = vadd.xlane.f32.xlu1 %v3473_v14  ;;  %5557 = vmatprep.subr.bf16.mxu1 %v5665_v53 }
 0xd4c   :  { %v6005_v58 = vpop.eup %6004 }
 0xd4d   :  { %v3467_v62 = vsel %vm1167_vm4, %v6005_v58, 0.0  ;;  %v6007_v32 = vpop.eup %6006  ;;  %5558 = vmatpush3.bf16.msra.mxu1 %v5665_v53 }
 0xd4e   :  { %3468 = vadd.xlane.f32.xlu1 %v3467_v62  ;;  %v3476_v44 = vsel %vm1167_vm4, %v6007_v32, 0.0  ;;  %v6009_v10 = vpop.eup %6008 }
 0xd4f   :  { %5536 = vmatmul.mubr.msk.bf16.gmra.mxu1 %vm1167_vm4, %v3514_v17  ;;  %v3470_v9 = vsel %vm1167_vm4, %v6009_v10, 0.0 }
 0xd52   :  { %3477 = vadd.xlane.f32.xlu1 %v3476_v44 }
 0xd56   :  { %3471 = vadd.xlane.f32.xlu1 %v3470_v9 }
 0xd67   :  { %3612 = vrot.lane.b32.xlu1 %v8720_v7, %s6315_s29 }
 0xd9a   :  { %v3463_v60 = vpop.xlane.xlu0 %3462 }
 0xd9e   :  { %v3457_v40 = vpop.xlane.xlu0 %3456 }
 0xd9f   :  { %6010 = vrcp.f32 %v3457_v40 }
 0xda2   :  { %v3460_v63 = vpop.xlane.xlu1 %3459  ;;  %v3466_v15 = vpop.xlane.xlu0 %3465 }
 0xda3   :  { %6012 = vrcp.f32 %v3460_v63 }
 0xda4   :  { %6014 = vrcp.f32 %v3466_v15 }
 0xda5   :  { %6016 = vrcp.f32 %v3463_v60 }
 0xda6   :  { %v3611_v36 = vpop.permute.xlu0 %3610 }
 0xdaa   :  { %v3609_v51 = vpop.permute.xlu0 %3608 }
 0xdac   :  { %v6011_v45 = vpop.eup %6010 }
 0xdad   :  { %v3503_v55 = vmul.f32 %v6011_v45, %v8105_v37 }
 0xdb0   :  { %v6013_v20 = vpop.eup %6012 }
 0xdb1   :  { %v3504_v42 = vmul.f32 %v6013_v20, %v8111_v13  ;;  %v6015_v37 = vpop.eup %6014 }
 0xdb2   :  { %v6017_v13 = vpop.eup %6016  ;;  %v3506_v6 = vmul.f32 %v6015_v37, %v8109_v34 }
 0xdb3   :  { %v3515_v30 = vpack.c.bf16 %v3504_v42, %v3503_v55  ;;  %v3505_v23 = vmul.f32 %v6017_v13, %v8101_v31  ;;  %v8168_v13 = vld [vmem:[%s8534_s7] ss:$0 sm:$0xff] }
 0xdb5   :  { %5547 = vmatprep.mubr.msk.bf16.mxu0 %vm1167_vm4, %v3515_v30  ;;  %v3516_v12 = vpack.c.bf16 %v3506_v6, %v3505_v23 }
 0xdd3   :  { %v3475_v46 = vpop.xlane.xlu1 %3474 }
 0xdd7   :  { %v3469_v5 = vpop.xlane.xlu1 %3468 }
 0xdd8   :  { %6018 = vrcp.f32 %v3469_v5 }
 0xddb   :  { %v3478_v2 = vpop.xlane.xlu1 %3477 }
 0xddf   :  { %v3472_v1 = vpop.xlane.xlu1 %3471 }
 0xde0   :  { %6020 = vrcp.f32 %v3472_v1 }
 0xde1   :  { %6022 = vrcp.f32 %v3478_v2 }
 0xde2   :  { %6024 = vrcp.f32 %v3475_v46 }
 0xde3   :  { %v3613_v21 = vpop.permute.xlu1 %3612 }
 0xde4   :  { %5541 = vmatprep.subr.bf16.mxu0 %v3613_v21 }
 0xde5   :  { %5542 = vmatpush3.bf16.msra.mxu0 %v3613_v21  ;;  %v6019_v19 = vpop.eup %6018 }
 0xde6   :  { %5543 = vmatprep.subr.bf16.mxu0 %v3611_v36  ;;  %v3507_v27 = vmul.f32 %v6019_v19, %v6005_v58 }
 0xde9   :  { %5544 = vmatpush3.bf16.msra.mxu0 %v3611_v36  ;;  %v6090_v36 = vld [vmem:[#allocation2] sm:$0xff] }
 0xdea   :  { %5545 = vmatprep.subr.bf16.mxu0 %v3609_v51 }
 0xded   :  { %v6021_v50 = vpop.eup %6020  ;;  %5546 = vmatpush3.bf16.msra.mxu0 %v3609_v51  ;;  %v6091_v51 = vld [vmem:[#allocation2 + $0x10] sm:$0xff] }
 0xdee   :  { %v3508_v56 = vmul.f32 %v6021_v50, %v6009_v10  ;;  %v6023_v35 = vpop.eup %6022 }
 0xdef   :  { %v6025_v18 = vpop.eup %6024  ;;  %v3510_v41 = vmul.f32 %v6023_v35, %v6007_v32 }
 0xdf0   :  { %5548 = vmatmul.mubr.msk.bf16.vlgmr.msra.gmra.mxu0 %vm1167_vm4, %v3516_v12  ;;  %v3517_v4 = vpack.c.bf16 %v3508_v56, %v3507_v27  ;;  %v3509_v11 = vmul.f32 %v6025_v18, %v8129_v3  ;;  %v6093_v56 = vld [vmem:[#allocation2 + $0x18] sm:$0xff] }
 0xdf2   :  { %5551 = vmatprep.mubr.msk.bf16.mxu0 %vm1167_vm4, %v3517_v4  ;;  %v3518_v34 = vpack.c.bf16 %v3510_v41, %v3509_v11 }
 0xdf8   :  { %5552 = vmatmul.mubr.msk.bf16.gmra.mxu0 %vm1167_vm4, %v3518_v34  ;;  %v6094_v34 = vld [vmem:[#allocation2 + $0x20] sm:$0xff] }
 0xdf9   :  { %4379 = vmatprep.mubr.bf16.mxu0 %v8721_v33 }
 0xe07   :  { %v5533_v31 = vpop.f32.mrf.mxu1 }
 0xe09   :  { %v3577_v26 = vpop.f32.mrf.mxu1 }
 0xe0b   :  { %v5534_v14 = vpop.f32.mrf.mxu1 }
 0xe0c   :  { %v3698_v58 = vpack.c.bf16 %v5534_v14, %v5533_v31 }
 0xe0d   :  { %v3580_v49 = vpop.f32.mrf.mxu1 }
 0xe0e   :  { %v3697_v25 = vpack.c.bf16 %v3580_v49, %v3577_v26  ;;  %v6095_v49 = vld [vmem:[#allocation2 + $0x28] sm:$0xff] }
 0xe0f   :  { %v5537_v62 = vpop.f32.mrf.mxu1 }
 0xe10   :  { %5559 = vmatprep.mubr.msk.bf16.mxu1 %vm988_vm0, %v3697_v25 }
 0xe11   :  { %v3593_v17 = vpop.f32.mrf.mxu1  ;;  %5560 = vmatmul.mubr.msk.bf16.vlgmr.msra.gmra.mxu1 %vm988_vm0, %v3698_v58  ;;  %v6096_v58 = vld [vmem:[#allocation2 + $0x30] sm:$0xff] }
 0xe13   :  { %v5538_v32 = vpop.f32.mrf.mxu1 }
 0xe14   :  { %v3700_v10 = vpack.c.bf16 %v5538_v32, %v5537_v62 }
 0xe15   :  { %v3596_v44 = vpop.f32.mrf.mxu1 }
 0xe16   :  { %v3699_v3 = vpack.c.bf16 %v3596_v44, %v3593_v17  ;;  %v6097_v17 = vld [vmem:[#allocation2 + $0x38] sm:$0xff] }
 0xe18   :  { %5563 = vmatprep.mubr.msk.bf16.mxu1 %vm988_vm0, %v3699_v3 }
 0xe19   :  { %5564 = vmatmul.mubr.msk.bf16.gmra.mxu1 %vm988_vm0, %v3700_v10 }
 0xeb0   :  { %v5549_v9 = vpop.f32.mrf.mxu0 }
 0xeb2   :  { %v3666_v7 = vpop.f32.mrf.mxu0 }
 0xeb4   :  { %v5550_v43 = vpop.f32.mrf.mxu0 }
 0xeb5   :  { %v3702_v40 = vpack.c.bf16 %v5550_v43, %v5549_v9 }
 0xeb6   :  { %v3669_v53 = vpop.f32.mrf.mxu0 }
 0xeb7   :  { %v3701_v60 = vpack.c.bf16 %v3669_v53, %v3666_v7 }
 0xeb8   :  { %v5553_v63 = vpop.f32.mrf.mxu0 }
 0xeb9   :  { %5567 = vmatprep.mubr.msk.bf16.mxu1 %vm988_vm0, %v3701_v60  ;;  %v6098_v60 = vld [vmem:[#allocation2 + $0x40] sm:$0xff] }
 0xeba   :  { %v3682_v45 = vpop.f32.mrf.mxu0  ;;  %5568 = vmatmul.mubr.msk.bf16.gmra.mxu1 %vm988_vm0, %v3702_v40 }
 0xebc   :  { %v5554_v20 = vpop.f32.mrf.mxu0 }
 0xebd   :  { %v3704_v30 = vpack.c.bf16 %v5554_v20, %v5553_v63 }
 0xebe   :  { %v3685_v55 = vpop.f32.mrf.mxu0 }
 0xebf   :  { %v3703_v42 = vpack.c.bf16 %v3685_v55, %v3682_v45  ;;  %v6099_v55 = vld [vmem:[#allocation2 + $0x50] sm:$0xff] }
 0xec1   :  { %5571 = vmatprep.mubr.msk.bf16.mxu1 %vm988_vm0, %v3703_v42 }
 0xec2   :  { %5572 = vmatmul.mubr.msk.bf16.gmra.mxu1 %vm988_vm0, %v3704_v30 }
 0xed1   :  { %v5561_v46 = vpop.f32.mrf.mxu1 }
 0xed2   :  { %v3844_v5 = vadd.f32 %v5561_v46, %v7956_v29 }
 0xed3   :  { %v3779_v15 = vpop.f32.mrf.mxu1 }
 0xed4   :  { %v3842_v2 = vadd.f32 %v3779_v15, %v7961_v0  ;;  %v3860_v6 = vadd.f32 %v6091_v51, %v3844_v5  ;;  %v6092_v0 = vld [vmem:[#allocation2 + $0x8] sm:$0xff] }
 0xed5   :  { %v5562_v1 = vpop.f32.mrf.mxu1  ;;  %v6100_v5 = vld [vmem:[#allocation2 + $0x48] sm:$0xff] }
 0xed6   :  { %v3858_v21 = vadd.f32 %v6090_v36, %v3842_v2  ;;  %v3845_v19 = vadd.f32 %v5562_v1, %v7968_v57  ;;  %v8178_v18 = vadd.f32 %v8168_v13, %v3860_v6  ;;  %v6102_v6 = vld [vmem:[#allocation2 + $0x60] sm:$0xff] }
 0xed7   :  { %v3782_v37 = vpop.f32.mrf.mxu1 }
 0xed8   :  { %v3843_v23 = vadd.f32 %v3782_v37, %v7971_v38  ;;  %v8173_v50 = vadd.f32 %v8168_v13, %v3858_v21  ;;  %v3861_v35 = vadd.f32 %v6093_v56, %v3845_v19 }
 0xed9   :  { %v5565_v29 = vpop.f32.mrf.mxu1 }
 0xeda   :  { %v3859_v12 = vadd.f32 %v6092_v0, %v3843_v23  ;;  %3897 = vadd.xlane.f32.xlu0 %v8173_v50  ;;  %v3848_v41 = vadd.f32 %v5565_v29, %v7978_v54  ;;  %v8189_v14 = vadd.f32 %v8168_v13, %v3861_v35  ;;  %v6103_v0 = vld [vmem:[#allocation2 + $0x70] sm:$0xff] }
 0xedb   :  { %v3795_v27 = vpop.f32.mrf.mxu1 }
 0xedc   :  { %v3846_v4 = vadd.f32 %v3795_v27, %v7981_v59  ;;  %v8181_v57 = vadd.f32 %v8168_v13, %v3859_v12  ;;  %v3864_v62 = vadd.f32 %v6096_v58, %v3848_v41 }
 0xedd   :  { %v5566_v38 = vpop.f32.mrf.mxu1 }
 0xede   :  { %3901 = vadd.xlane.f32.xlu0 %v8178_v18  ;;  %3899 = vadd.xlane.f32.xlu1 %v8181_v57  ;;  %v3862_v31 = vadd.f32 %v6094_v34, %v3846_v4  ;;  %v3849_v26 = vadd.f32 %v5566_v38, %v7990_v22  ;;  %v8201_v22 = vadd.f32 %v8168_v13, %v3864_v62  ;;  %v6104_v4 = vld [vmem:[#allocation2 + $0x68] sm:$0xff] }
 0xedf   :  { %v3798_v11 = vpop.f32.mrf.mxu1 }
 0xee0   :  { %v3847_v59 = vadd.f32 %v3798_v11, %v7994_v8  ;;  %v3865_v32 = vadd.f32 %v6097_v17, %v3849_v26  ;;  %v8193_v54 = vadd.f32 %v8168_v13, %v3862_v31  ;;  %v6105_v26 = vld [vmem:[#allocation2 + $0x78] sm:$0xff] }
 0xee2   :  { %v3863_v25 = vadd.f32 %v6095_v49, %v3847_v59  ;;  %3903 = vadd.xlane.f32.xlu0 %v8189_v14  ;;  %v8204_v8 = vadd.f32 %v8168_v13, %v3865_v32 }
 0xee4   :  { %v8196_v44 = vadd.f32 %v8168_v13, %v3863_v25 }
 0xee6   :  { %3905 = vadd.xlane.f32.xlu0 %v8193_v54  ;;  %3907 = vadd.xlane.f32.xlu1 %v8196_v44 }
 0xeea   :  { %3909 = vadd.xlane.f32.xlu0 %v8201_v22  ;;  %3911 = vadd.xlane.f32.xlu1 %v8204_v8 }
 0xf63   :  { %v3898_v3 = vpop.xlane.xlu0 %3897 }
 0xf64   :  { %v3929_v23 = vmul.f32 0.0078125, %v3898_v3 }
 0xf66   :  { %v8237_v41 = vsub.f32 %v8173_v50, %v3929_v23  ;;  %v5678_v23 = vld [vmem:[#allocation13 + $0x30] ss:$8 sps:$4 sm:$0xff]  }
 0xf67   :  { %v3902_v63 = vpop.xlane.xlu0 %3901 }
 0xf68   :  { %v3931_v31 = vmul.f32 0.0078125, %v3902_v63  ;;  %v3961_v3 = vmul.f32 %v8237_v41, %v8237_v41 }
 0xf6a   :  { %v8251_v62 = vsub.f32 %v8178_v18, %v3931_v31 }
 0xf6b   :  { %v3904_v37 = vpop.xlane.xlu0 %3903 }
 0xf6c   :  { %v3932_v25 = vmul.f32 0.0078125, %v3904_v37  ;;  %v5672_v37 = vld [vmem:[#allocation13 + $0x50] ss:$8 sps:$4 sm:$0xff]  }
 0xf6f   :  { %v3906_v34 = vpop.xlane.xlu0 %3905 }
 0xf70   :  { %v3933_v17 = vmul.f32 0.0078125, %v3906_v34 }
 0xf7a   :  { %v5569_v10 = vpop.f32.mrf.mxu1 }
 0xf7b   :  { %v3852_v7 = vadd.f32 %v5569_v10, %v8000_v39  ;;  %v6101_v39 = vld [vmem:[#allocation2 + $0x58] sm:$0xff]  ;;  %v3910_v10 = vpop.xlane.xlu0 %3909 }
 0xf7c   :  { %v3811_v9 = vpop.f32.mrf.mxu1 }
 0xf7d   :  { %v3850_v43 = vadd.f32 %v3811_v9, %v8004_v16  ;;  %v3868_v42 = vadd.f32 %v6099_v55, %v3852_v7  ;;  %v8260_v9 = vsub.f32 %v8189_v14, %v3932_v25 }
 0xf7e   :  { %v5570_v53 = vpop.f32.mrf.mxu1 }
 0xf7f   :  { %v3866_v40 = vadd.f32 %v6098_v60, %v3850_v43  ;;  %v3853_v45 = vadd.f32 %v5570_v53, %v8008_v47  ;;  %v8219_v21 = vadd.f32 %v8168_v13, %v3868_v42  ;;  %v8265_v53 = vsub.f32 %v8193_v54, %v3933_v17 }
 0xf80   :  { %v3814_v20 = vpop.f32.mrf.mxu1  ;;  %v3935_v60 = vmul.f32 0.0078125, %v3910_v10  ;;  %v3964_v63 = vmul.f32 %v8260_v9, %v8260_v9 }
 0xf81   :  { %v3851_v30 = vadd.f32 %v3814_v20, %v8012_v61  ;;  %v8213_v46 = vadd.f32 %v8168_v13, %v3866_v40  ;;  %v3869_v16 = vadd.f32 %v6101_v39, %v3853_v45  ;;  %v3965_v42 = vmul.f32 %v8265_v53, %v8265_v53  ;;  %v5668_v39 = vld [vmem:[#allocation13 + $0x74] ss:$8 sps:$4 sm:$0xff]  }
 0xf82   :  { %v5573_v15 = vpop.f32.mrf.mxu1  ;;  %v8275_v55 = vsub.f32 %v8201_v22, %v3935_v60  ;;  %4347 = vmatprep.subr.bf16.mxu0 %v5668_v39 }
 0xf83   :  { %v3867_v2 = vadd.f32 %v6100_v5, %v3851_v30  ;;  %3913 = vadd.xlane.f32.xlu0 %v8213_v46  ;;  %v3856_v36 = vadd.f32 %v5573_v15, %v8016_v28  ;;  %v8227_v28 = vadd.f32 %v8168_v13, %v3869_v16  ;;  %v5666_v16 = vld [vmem:[#allocation13 + $0x70] ss:$8 sps:$4 sm:$0xff]  }
 0xf84   :  { %v3827_v1 = vpop.f32.mrf.mxu1  ;;  %v3967_v5 = vmul.f32 %v8275_v55, %v8275_v55  ;;  %4348 = vmatpush1.bf16.msra.mxu0 %v5666_v16 }
 0xf85   :  { %v3854_v47 = vadd.f32 %v3827_v1, %v8020_v52  ;;  %v8222_v61 = vadd.f32 %v8168_v13, %v3867_v2  ;;  %v3900_v52 = vpop.xlane.xlu1 %3899  ;;  %v3872_v12 = vadd.f32 %v6103_v0, %v3856_v36  ;;  %v5671_v1 = vld [vmem:[#allocation13 + $0x64] ss:$8 sps:$4 sm:$0xff]   ;;  %v5669_v36 = vld [vmem:[#allocation13 + $0x60] ss:$8 sps:$4 sm:$0xff]   ;;  %v5686_v0 = vld [vmem:[#allocation13 + $0x14] ss:$8 sps:$4 sm:$0xff]  }
 0xf86   :  { %v5574_v51 = vpop.f32.mrf.mxu1  ;;  %v3930_v11 = vmul.f32 0.0078125, %v3900_v52  ;;  %4349 = vmatprep.subr.bf16.mxu0 %v5671_v1  ;;  %v5681_v52 = vld [vmem:[#allocation13 + $0x20] ss:$8 sps:$4 sm:$0xff]  }
 0xf87   :  { %v3870_v19 = vadd.f32 %v6102_v6, %v3854_v47  ;;  %3917 = vadd.xlane.f32.xlu0 %v8219_v21  ;;  %3915 = vadd.xlane.f32.xlu1 %v8222_v61  ;;  %v3857_v27 = vadd.f32 %v5574_v51, %v8024_v48  ;;  %v8240_v48 = vadd.f32 %v8168_v13, %v3872_v12  ;;  %v5674_v47 = vld [vmem:[#allocation13 + $0x54] ss:$8 sps:$4 sm:$0xff]   ;;  %v5677_v51 = vld [vmem:[#allocation13 + $0x44] ss:$8 sps:$4 sm:$0xff]   ;;  %v5675_v6 = vld [vmem:[#allocation13 + $0x40] ss:$8 sps:$4 sm:$0xff]  }
 0xf88   :  { %v3830_v29 = vpop.f32.mrf.mxu1  ;;  %v8248_v49 = vsub.f32 %v8181_v57, %v3930_v11  ;;  %4350 = vmatpush1.bf16.msra.mxu0 %v5669_v36  ;;  %v5684_v12 = vld [vmem:[#allocation13 + $0x10] ss:$8 sps:$4 sm:$0xff]  }
 0xf89   :  { %v3855_v56 = vadd.f32 %v3830_v29, %v8026_v24  ;;  %v8232_v35 = vadd.f32 %v8168_v13, %v3870_v19  ;;  %v3873_v59 = vadd.f32 %v6105_v26, %v3857_v27  ;;  %v3908_v58 = vpop.xlane.xlu1 %3907  ;;  %4351 = vmatprep.subr.bf16.mxu0 %v5674_v47  ;;  %v5680_v19 = vld [vmem:[#allocation13 + $0x34] ss:$8 sps:$4 sm:$0xff]   ;;  %v5683_v29 = vld [vmem:[#allocation13 + $0x24] ss:$8 sps:$4 sm:$0xff]  }
 0xf8a   :  { %v3962_v7 = vmul.f32 %v8248_v49, %v8248_v49  ;;  %v3934_v43 = vmul.f32 0.0078125, %v3908_v58  ;;  %v5689_v27 = vld [vmem:[#allocation13 + $0x4] ss:$8 sps:$4 sm:$0xff]  }
 0xf8b   :  { %v3871_v38 = vadd.f32 %v6104_v4, %v3855_v56  ;;  %3919 = vadd.xlane.f32.xlu1 %v8227_v28  ;;  %3921 = vadd.xlane.f32.xlu0 %v8232_v35  ;;  %v8254_v32 = vadd.f32 %v8168_v13, %v3873_v59  ;;  %v5687_v56 = vld [vmem:[#allocation13] ss:$8 sps:$4 sm:$0xff]  }
 0xf8c   :  { %v8272_v45 = vsub.f32 %v8196_v44, %v3934_v43  ;;  %4352 = vmatpush1.bf16.msra.mxu0 %v5672_v37 }
 0xf8d   :  { %v8243_v24 = vadd.f32 %v8168_v13, %v3871_v38  ;;  %v3963_v13 = vmul.f32 %v8251_v62, %v8251_v62  ;;  %v3912_v40 = vpop.xlane.xlu1 %3911  ;;  %4353 = vmatprep.subr.bf16.mxu0 %v5677_v51 }
 0xf8e   :  { %v3936_v20 = vmul.f32 0.0078125, %v3912_v40  ;;  %v3966_v15 = vmul.f32 %v8272_v45, %v8272_v45 }
 0xf8f   :  { %3925 = vadd.xlane.f32.xlu0 %v8240_v48  ;;  %3923 = vadd.xlane.f32.xlu1 %v8243_v24 }
 0xf90   :  { %v8280_v30 = vsub.f32 %v8204_v8, %v3936_v20  ;;  %4354 = vmatpush1.bf16.msra.mxu0 %v5675_v6 }
 0xf91   :  { %4355 = vmatprep.subr.bf16.mxu0 %v5680_v19 }
 0xf92   :  { %v3968_v2 = vmul.f32 %v8280_v30, %v8280_v30 }
 0xf93   :  { %3927 = vadd.xlane.f32.xlu1 %v8254_v32  ;;  %3977 = vadd.xlane.f32.xlu0 %v3961_v3 }
 0xf94   :  { %4356 = vmatpush1.bf16.msra.mxu0 %v5678_v23 }
 0xf95   :  { %4357 = vmatprep.subr.bf16.mxu0 %v5683_v29 }
 0xf97   :  { %3979 = vadd.xlane.f32.xlu1 %v3962_v7  ;;  %3981 = vadd.xlane.f32.xlu0 %v3963_v13 }
 0xf98   :  { %4358 = vmatpush1.bf16.msra.mxu0 %v5681_v52 }
 0xf99   :  { %4359 = vmatprep.subr.bf16.mxu0 %v5686_v0 }
 0xf9b   :  { %3983 = vadd.xlane.f32.xlu1 %v3964_v63  ;;  %3985 = vadd.xlane.f32.xlu0 %v3965_v42 }
 0xf9c   :  { %4360 = vmatpush1.bf16.msra.mxu0 %v5684_v12 }
 0xf9d   :  { %4361 = vmatprep.subr.bf16.mxu0 %v5689_v27 }
 0xf9f   :  { %3987 = vadd.xlane.f32.xlu1 %v3966_v15  ;;  %3989 = vadd.xlane.f32.xlu0 %v3967_v5 }
 0xfa0   :  { %4362 = vmatpush1.bf16.msra.mxu0 %v5687_v56 }
 0xfa3   :  { %3991 = vadd.xlane.f32.xlu1 %v3968_v2 }
0x100c   :  { %v3914_v4 = vpop.xlane.xlu0 %3913 }
0x100d   :  { %v3937_v38 = vmul.f32 0.0078125, %v3914_v4 }
0x100f   :  { %v8289_v11 = vsub.f32 %v8213_v46, %v3937_v38 }
0x1010   :  { %v3916_v34 = vpop.xlane.xlu1 %3915  ;;  %v3918_v31 = vpop.xlane.xlu0 %3917 }
0x1011   :  { %v3938_v26 = vmul.f32 0.0078125, %v3916_v34  ;;  %v3939_v59 = vmul.f32 0.0078125, %v3918_v31  ;;  %v3969_v25 = vmul.f32 %v8289_v11, %v8289_v11 }
0x1013   :  { %v8294_v58 = vsub.f32 %v8222_v61, %v3938_v26  ;;  %v8297_v17 = vsub.f32 %v8219_v21, %v3939_v59  ;;  %3993 = vadd.xlane.f32.xlu0 %v3969_v25 }
0x1014   :  { %v3920_v3 = vpop.xlane.xlu1 %3919  ;;  %v3922_v10 = vpop.xlane.xlu0 %3921 }
0x1015   :  { %v3940_v7 = vmul.f32 0.0078125, %v3920_v3  ;;  %v3941_v43 = vmul.f32 0.0078125, %v3922_v10  ;;  %v3970_v60 = vmul.f32 %v8294_v58, %v8294_v58  ;;  %v3971_v13 = vmul.f32 %v8297_v17, %v8297_v17 }
0x1017   :  { %v8304_v40 = vsub.f32 %v8227_v28, %v3940_v7  ;;  %v8307_v63 = vsub.f32 %v8232_v35, %v3941_v43  ;;  %3995 = vadd.xlane.f32.xlu1 %v3970_v60  ;;  %3997 = vadd.xlane.f32.xlu0 %v3971_v13 }
0x1018   :  { %v3924_v20 = vpop.xlane.xlu1 %3923  ;;  %v3926_v42 = vpop.xlane.xlu0 %3925 }
0x1019   :  { %v3942_v15 = vmul.f32 0.0078125, %v3924_v20  ;;  %v3943_v5 = vmul.f32 0.0078125, %v3926_v42  ;;  %v3972_v2 = vmul.f32 %v8304_v40, %v8304_v40  ;;  %v3973_v39 = vmul.f32 %v8307_v63, %v8307_v63 }
0x101b   :  { %v8314_v16 = vsub.f32 %v8243_v24, %v3942_v15  ;;  %v8317_v1 = vsub.f32 %v8240_v48, %v3943_v5  ;;  %3999 = vadd.xlane.f32.xlu1 %v3972_v2  ;;  %4001 = vadd.xlane.f32.xlu0 %v3973_v39 }
0x101c   :  { %v3928_v36 = vpop.xlane.xlu1 %3927  ;;  %v3978_v47 = vpop.xlane.xlu0 %3977 }
0x101d   :  { %v3944_v37 = vmul.f32 0.0078125, %v3928_v36  ;;  %v4009_v51 = vmul.f32 0.007874016, %v3978_v47  ;;  %v3974_v6 = vmul.f32 %v8314_v16, %v8314_v16  ;;  %v3975_v19 = vmul.f32 %v8317_v1, %v8317_v1 }
0x101f   :  { %v8324_v23 = vsub.f32 %v8254_v32, %v3944_v37  ;;  %6026 = vrsqrt.f32 %v4009_v51  ;;  %4003 = vadd.xlane.f32.xlu1 %v3974_v6  ;;  %4005 = vadd.xlane.f32.xlu0 %v3975_v19  ;;  %vm4027_vm0 = vcmp.eq.f32.partialorder %v4009_v51, inf  ;;  %v4030_v60 = vand.u32 2147483648, %v4009_v51 }
0x1020   :  { %v3980_v29 = vpop.xlane.xlu1 %3979  ;;  %v3982_v52 = vpop.xlane.xlu0 %3981  ;;  %vm4029_vm3 = vcmp.eq.f32.partialorder %v4009_v51, 0.0 }
0x1021   :  { %v4010_v0 = vmul.f32 0.007874016, %v3980_v29  ;;  %v4011_v12 = vmul.f32 0.007874016, %v3982_v52  ;;  %v3976_v27 = vmul.f32 %v8324_v23, %v8324_v23 }
0x1023   :  { %6028 = vrsqrt.f32 %v4010_v0  ;;  %4007 = vadd.xlane.f32.xlu1 %v3976_v27  ;;  %vm4034_vm4 = vcmp.eq.f32.partialorder %v4010_v0, inf  ;;  %vm4036_vm5 = vcmp.eq.f32.partialorder %v4010_v0, 0.0  ;;  %v4037_v39 = vand.u32 2147483648, %v4010_v0 }
0x1024   :  { %6030 = vrsqrt.f32 %v4011_v12  ;;  %v3984_v56 = vpop.xlane.xlu1 %3983  ;;  %v3986_v4 = vpop.xlane.xlu0 %3985  ;;  %vm4041_vm6 = vcmp.eq.f32.partialorder %v4011_v12, inf  ;;  %v4044_v37 = vand.u32 2147483648, %v4011_v12  ;;  %vm4043_vm7 = vcmp.eq.f32.partialorder %v4011_v12, 0.0 }
0x1025   :  { %v4012_v38 = vmul.f32 0.007874016, %v3984_v56  ;;  %v4013_v34 = vmul.f32 0.007874016, %v3986_v4 }
0x1027   :  { %6032 = vrsqrt.f32 %v4012_v38  ;;  %vm4048_vm8 = vcmp.eq.f32.partialorder %v4012_v38, inf  ;;  %vm4050_vm9 = vcmp.eq.f32.partialorder %v4012_v38, 0.0  ;;  %vm4055_vm10 = vcmp.eq.f32.partialorder %v4013_v34, inf }
0x1028   :  { %6034 = vrsqrt.f32 %v4013_v34  ;;  %v3988_v31 = vpop.xlane.xlu1 %3987  ;;  %v3990_v26 = vpop.xlane.xlu0 %3989  ;;  %vm4057_vm11 = vcmp.eq.f32.partialorder %v4013_v34, 0.0 }
0x1029   :  { %v8328_v59 = vmul.f32 0.007874016, %v3988_v31  ;;  %v8330_v25 = vmul.f32 0.007874016, %v3990_v26  ;;  %v4051_v31 = vand.u32 2147483648, %v4012_v38 }
0x102b   :  { %6036 = vrsqrt.f32 %v8328_v59  ;;  %vm4062_vm12 = vcmp.eq.f32.partialorder %v8328_v59, inf  ;;  %vm4064_vm13 = vcmp.eq.f32.partialorder %v8328_v59, 0.0  ;;  %vm4069_vm14 = vcmp.eq.f32.partialorder %v8330_v25, inf }
0x102c   :  { %v6027_v3 = vpop.eup %6026  ;;  %6038 = vrsqrt.f32 %v8330_v25  ;;  %v3992_v10 = vpop.xlane.xlu1 %3991  ;;  %vm4071_vm15 = vcmp.eq.f32.partialorder %v8330_v25, 0.0 }
0x102d   :  { %v4026_v7 = vmul.f32 %v6027_v3, %v4009_v51  ;;  %v8334_v43 = vmul.f32 0.007874016, %v3992_v10  ;;  %v4058_v10 = vand.u32 2147483648, %v4013_v34 }
0x102f   :  { %v4028_v13 = vsel %vm4027_vm0, %v4009_v51, %v4026_v7  ;;  %6040 = vrsqrt.f32 %v8334_v43  ;;  %vm4076_vm1 = vcmp.eq.f32.partialorder %v8334_v43, inf  ;;  %vm4078_vm2 = vcmp.eq.f32.partialorder %v8334_v43, 0.0 }
0x1030   :  { %v6029_v20 = vpop.eup %6028  ;;  %v4031_v42 = vsel %vm4029_vm3, %v4030_v60, %v4028_v13 }
0x1031   :  { %v6031_v15 = vpop.eup %6030  ;;  %v4137_v5 = vadd.f32 1e-06, %v4031_v42  ;;  %v4033_v2 = vmul.f32 %v6029_v20, %v4010_v0 }
0x1032   :  { %v4040_v36 = vmul.f32 %v6031_v15, %v4011_v12 }
0x1033   :  { %6042 = vrcp.f32 %v4137_v5  ;;  %v4035_v47 = vsel %vm4034_vm4, %v4010_v0, %v4033_v2  ;;  %v4065_v5 = vand.u32 2147483648, %v8328_v59 }
0x1034   :  { %v6033_v6 = vpop.eup %6032  ;;  %v4038_v19 = vsel %vm4036_vm5, %v4037_v39, %v4035_v47  ;;  %v4042_v29 = vsel %vm4041_vm6, %v4011_v12, %v4040_v36 }
0x1035   :  { %v6035_v51 = vpop.eup %6034  ;;  %v4138_v52 = vadd.f32 1e-06, %v4038_v19  ;;  %v4045_v27 = vsel %vm4043_vm7, %v4044_v37, %v4042_v29  ;;  %v4047_v56 = vmul.f32 %v6033_v6, %v4012_v38  ;;  %v8351_v29 = vld [vmem:[%s8535_s8] ss:$0 sm:$0xff] }
0x1036   :  { %v4139_v4 = vadd.f32 1e-06, %v4045_v27  ;;  %v4054_v26 = vmul.f32 %v6035_v51, %v4013_v34  ;;  %v4079_v51 = vand.u32 2147483648, %v8334_v43 }
0x1037   :  { %6044 = vrcp.f32 %v4138_v52  ;;  %v4049_v3 = vsel %vm4048_vm8, %v4012_v38, %v4047_v56  ;;  %v4176_v56 = vmul.f32 %v8351_v29, %v8237_v41  ;;  %v4179_v41 = vmul.f32 %v8351_v29, %v8260_v9 }
0x1038   :  { %v6037_v0 = vpop.eup %6036  ;;  %6046 = vrcp.f32 %v4139_v4  ;;  %v4052_v7 = vsel %vm4050_vm9, %v4051_v31, %v4049_v3  ;;  %v4056_v60 = vsel %vm4055_vm10, %v4013_v34, %v4054_v26  ;;  %v4072_v34 = vand.u32 2147483648, %v8330_v25 }
0x1039   :  { %v6039_v13 = vpop.eup %6038  ;;  %v4140_v12 = vadd.f32 1e-06, %v4052_v7  ;;  %v4059_v20 = vsel %vm4057_vm11, %v4058_v10, %v4056_v60  ;;  %v4061_v42 = vmul.f32 %v6037_v0, %v8328_v59  ;;  %v4177_v31 = vmul.f32 %v8351_v29, %v8248_v49  ;;  %v8364_v10 = vld [vmem:[%s8536_s9] ss:$0 sm:$0xff] }
0x103a   :  { %v4141_v15 = vadd.f32 1e-06, %v4059_v20  ;;  %v4068_v38 = vmul.f32 %v6039_v13, %v8330_v25 }
0x103b   :  { %6048 = vrcp.f32 %v4140_v12  ;;  %v4063_v2 = vsel %vm4062_vm12, %v8328_v59, %v4061_v42  ;;  %v4180_v42 = vmul.f32 %v8351_v29, %v8265_v53 }
0x103c   :  { %v6041_v39 = vpop.eup %6040  ;;  %6050 = vrcp.f32 %v4141_v15  ;;  %v4066_v36 = vsel %vm4064_vm13, %v4065_v5, %v4063_v2  ;;  %v4070_v47 = vsel %vm4069_vm14, %v8330_v25, %v4068_v38  ;;  %v4181_v38 = vmul.f32 %v8351_v29, %v8272_v45 }
0x103d   :  { %v4142_v37 = vadd.f32 1e-06, %v4066_v36  ;;  %v4073_v6 = vsel %vm4071_vm15, %v4072_v34, %v4070_v47  ;;  %v4075_v19 = vmul.f32 %v6041_v39, %v8334_v43  ;;  %v4182_v36 = vmul.f32 %v8351_v29, %v8275_v55 }
0x103e   :  { %v4143_v59 = vadd.f32 1e-06, %v4073_v6 }
0x103f   :  { %6052 = vrcp.f32 %v4142_v37  ;;  %v4077_v52 = vsel %vm4076_vm1, %v8334_v43, %v4075_v19  ;;  %v4178_v43 = vmul.f32 %v8351_v29, %v8251_v62  ;;  %v4183_v37 = vmul.f32 %v8351_v29, %v8280_v30  ;;  %v5690_v30 = vld [vmem:[#allocation14 + $0x78] sm:$0xff]  }
0x1040   :  { %v6043_v25 = vpop.eup %6042  ;;  %6054 = vrcp.f32 %v4143_v59  ;;  %v4080_v27 = vsel %vm4078_vm2, %v4079_v51, %v4077_v52  ;;  %5143 = vmatprep.subr.bf16.mxu1 %v5690_v30 }
0x1041   :  { %v4144_v4 = vadd.f32 1e-06, %v4080_v27  ;;  %v4192_v26 = vmul.f32 %v6043_v25, %v4176_v56  ;;  %v5691_v56 = vld [vmem:[#allocation14 + $0x38] sm:$0xff]  }
0x1042   :  { %5144 = vmatpush3.bf16.msra.mxu1 %v5691_v56 }
0x1043   :  { %6056 = vrcp.f32 %v4144_v4  ;;  %v4215_v60 = vadd.f32 %v8364_v10, %v4192_v26  ;;  %v5692_v4 = vld [vmem:[#allocation14 + $0x70] sm:$0xff]   ;;  %v5694_v26 = vld [vmem:[#allocation14 + $0x68] sm:$0xff]  }
0x1044   :  { %v6045_v3 = vpop.eup %6044  ;;  %5145 = vmatprep.subr.bf16.mxu1 %v5692_v4 }
0x1045   :  { %v6047_v0 = vpop.eup %6046  ;;  %v4193_v7 = vmul.f32 %v6045_v3, %v4177_v31  ;;  %v5693_v31 = vld [vmem:[#allocation14 + $0x30] sm:$0xff]   ;;  %v5695_v3 = vld [vmem:[#allocation14 + $0x28] sm:$0xff]  }
0x1046   :  { %v4194_v13 = vmul.f32 %v6047_v0, %v4178_v43  ;;  %5146 = vmatpush3.bf16.msra.mxu1 %v5693_v31  ;;  %v5696_v0 = vld [vmem:[#allocation14 + $0x60] sm:$0xff]  }
0x1047   :  { %v4216_v49 = vadd.f32 %v8364_v10, %v4193_v7  ;;  %5147 = vmatprep.subr.bf16.mxu1 %v5694_v26  ;;  %v5697_v43 = vld [vmem:[#allocation14 + $0x20] sm:$0xff]   ;;  %v5698_v7 = vld [vmem:[#allocation14 + $0x58] sm:$0xff]  }
0x1048   :  { %v6049_v12 = vpop.eup %6048  ;;  %v4217_v62 = vadd.f32 %v8364_v10, %v4194_v13  ;;  %v5702_v13 = vld [vmem:[#allocation14 + $0x48] sm:$0xff]  }
0x1049   :  { %v6051_v20 = vpop.eup %6050  ;;  %v4231_v15 = vpack.c.bf16 %v4216_v49, %v4215_v60  ;;  %v4195_v5 = vmul.f32 %v6049_v12, %v4179_v41  ;;  %v5699_v41 = vld [vmem:[#allocation14 + $0x18] sm:$0xff]   ;;  %v5700_v60 = vld [vmem:[#allocation14 + $0x50] sm:$0xff]   ;;  %v5703_v12 = vld [vmem:[#allocation14 + $0x8] sm:$0xff]  }
0x104a   :  { %v4196_v2 = vmul.f32 %v6051_v20, %v4180_v42  ;;  %5148 = vmatpush3.bf16.msra.mxu1 %v5695_v3  ;;  %v5701_v49 = vld [vmem:[#allocation14 + $0x10] sm:$0xff]   ;;  %v5704_v20 = vld [vmem:[#allocation14 + $0x40] sm:$0xff]  }
0x104b   :  { %4380 = vmatmul.mubr.bf16.vlgmr.msra.gmra.mxu0 %v4231_v15  ;;  %v4218_v9 = vadd.f32 %v8364_v10, %v4195_v5  ;;  %5149 = vmatprep.subr.bf16.mxu1 %v5696_v0  ;;  %v5705_v42 = vld [vmem:[#allocation14] sm:$0xff]  }
0x104c   :  { %v6053_v34 = vpop.eup %6052  ;;  %4389 = vmatprep.mubr.bf16.mxu0 %v8721_v33  ;;  %v4219_v45 = vadd.f32 %v8364_v10, %v4196_v2 }
0x104d   :  { %v6055_v39 = vpop.eup %6054  ;;  %v4232_v47 = vpack.c.bf16 %v4218_v9, %v4217_v62  ;;  %v4197_v53 = vmul.f32 %v6053_v34, %v4181_v38 }
0x104e   :  { %v4198_v19 = vmul.f32 %v6055_v39, %v4182_v36  ;;  %5150 = vmatpush3.bf16.msra.mxu1 %v5697_v43 }
0x104f   :  { %v4220_v6 = vadd.f32 %v8364_v10, %v4197_v53  ;;  %5151 = vmatprep.subr.bf16.mxu1 %v5698_v7 }
0x1050   :  { %v6057_v59 = vpop.eup %6056  ;;  %v4221_v25 = vadd.f32 %v8364_v10, %v4198_v19 }
0x1051   :  { %v4233_v51 = vpack.c.bf16 %v4220_v6, %v4219_v45  ;;  %v4199_v52 = vmul.f32 %v6057_v59, %v4183_v37 }
0x1052   :  { %5152 = vmatpush3.bf16.msra.mxu1 %v5699_v41 }
0x1053   :  { %4390 = vmatmul.mubr.bf16.gmra.mxu0 %v4232_v47  ;;  %v4222_v27 = vadd.f32 %v8364_v10, %v4199_v52  ;;  %5153 = vmatprep.subr.bf16.mxu1 %v5700_v60 }
0x1054   :  { %4399 = vmatprep.mubr.bf16.mxu0 %v8721_v33 }
0x1055   :  { %v4234_v55 = vpack.c.bf16 %v4222_v27, %v4221_v25 }
0x1056   :  { %5154 = vmatpush3.bf16.msra.mxu1 %v5701_v49 }
0x1057   :  { %5155 = vmatprep.subr.bf16.mxu1 %v5702_v13 }
0x105a   :  { %5156 = vmatpush3.bf16.msra.mxu1 %v5703_v12 }
0x105b   :  { %4400 = vmatmul.mubr.bf16.gmra.mxu0 %v4233_v51  ;;  %5157 = vmatprep.subr.bf16.mxu1 %v5704_v20 }
0x105c   :  { %4409 = vmatprep.mubr.bf16.mxu0 %v8721_v33 }
0x105e   :  { %5158 = vmatpush3.bf16.msra.mxu1 %v5705_v42 }
0x1063   :  { %4410 = vmatmul.mubr.bf16.gmra.mxu0 %v4234_v55 }
0x1064   :  { %4419 = vmatprep.mubr.bf16.mxu0 %v8721_v33 }
0x109c   :  { %v3994_v15 = vpop.xlane.xlu0 %3993 }
0x109d   :  { %v4017_v5 = vmul.f32 0.007874016, %v3994_v15 }
0x109f   :  { %6058 = vrsqrt.f32 %v4017_v5  ;;  %vm4083_vm0 = vcmp.eq.f32.partialorder %v4017_v5, inf  ;;  %v4086_v52 = vand.u32 2147483648, %v4017_v5  ;;  %vm4085_vm3 = vcmp.eq.f32.partialorder %v4017_v5, 0.0 }
0x10a0   :  { %v3996_v38 = vpop.xlane.xlu1 %3995  ;;  %v3998_v62 = vpop.xlane.xlu0 %3997 }
0x10a1   :  { %v4018_v9 = vmul.f32 0.007874016, %v3996_v38  ;;  %v4019_v2 = vmul.f32 0.007874016, %v3998_v62 }
0x10a3   :  { %6060 = vrsqrt.f32 %v4018_v9  ;;  %vm4090_vm4 = vcmp.eq.f32.partialorder %v4018_v9, inf  ;;  %vm4092_vm5 = vcmp.eq.f32.partialorder %v4018_v9, 0.0  ;;  %v4093_v26 = vand.u32 2147483648, %v4018_v9 }
0x10a4   :  { %6062 = vrsqrt.f32 %v4019_v2  ;;  %v4000_v34 = vpop.xlane.xlu1 %3999  ;;  %v4002_v39 = vpop.xlane.xlu0 %4001  ;;  %vm4097_vm6 = vcmp.eq.f32.partialorder %v4019_v2, inf  ;;  %v4100_v43 = vand.u32 2147483648, %v4019_v2  ;;  %vm4099_vm7 = vcmp.eq.f32.partialorder %v4019_v2, 0.0 }
0x10a5   :  { %v4020_v36 = vmul.f32 0.007874016, %v4000_v34  ;;  %v4021_v47 = vmul.f32 0.007874016, %v4002_v39 }
0x10a7   :  { %6064 = vrsqrt.f32 %v4020_v36  ;;  %vm4104_vm8 = vcmp.eq.f32.partialorder %v4020_v36, inf  ;;  %vm4106_vm9 = vcmp.eq.f32.partialorder %v4020_v36, 0.0  ;;  %v4107_v15 = vand.u32 2147483648, %v4020_v36 }
0x10a8   :  { %6066 = vrsqrt.f32 %v4021_v47  ;;  %v4004_v53 = vpop.xlane.xlu1 %4003  ;;  %v4006_v37 = vpop.xlane.xlu0 %4005  ;;  %vm4111_vm10 = vcmp.eq.f32.partialorder %v4021_v47, inf  ;;  %v4114_v62 = vand.u32 2147483648, %v4021_v47  ;;  %vm4113_vm11 = vcmp.eq.f32.partialorder %v4021_v47, 0.0 }
0x10a9   :  { %v8390_v45 = vmul.f32 0.007874016, %v4004_v53  ;;  %v8392_v6 = vmul.f32 0.007874016, %v4006_v37 }
0x10ab   :  { %6068 = vrsqrt.f32 %v8390_v45  ;;  %vm4118_vm12 = vcmp.eq.f32.partialorder %v8390_v45, inf  ;;  %vm4120_vm13 = vcmp.eq.f32.partialorder %v8390_v45, 0.0  ;;  %vm4125_vm14 = vcmp.eq.f32.partialorder %v8392_v6, inf }
0x10ac   :  { %v6059_v19 = vpop.eup %6058  ;;  %6070 = vrsqrt.f32 %v8392_v6  ;;  %v4008_v51 = vpop.xlane.xlu1 %4007  ;;  %vm4127_vm15 = vcmp.eq.f32.partialorder %v8392_v6, 0.0 }
0x10ad   :  { %v4082_v59 = vmul.f32 %v6059_v19, %v4017_v5  ;;  %v8396_v25 = vmul.f32 0.007874016, %v4008_v51  ;;  %v4121_v51 = vand.u32 2147483648, %v8390_v45 }
0x10af   :  { %v4084_v27 = vsel %vm4083_vm0, %v4017_v5, %v4082_v59  ;;  %6072 = vrsqrt.f32 %v8396_v25  ;;  %vm4132_vm1 = vcmp.eq.f32.partialorder %v8396_v25, inf  ;;  %vm4134_vm2 = vcmp.eq.f32.partialorder %v8396_v25, 0.0 }
0x10b0   :  { %v4087_v55 = vsel %vm4085_vm3, %v4086_v52, %v4084_v27  ;;  %v6061_v30 = vpop.eup %6060 }
0x10b1   :  { %v4145_v56 = vadd.f32 1e-06, %v4087_v55  ;;  %v6063_v4 = vpop.eup %6062  ;;  %v4089_v31 = vmul.f32 %v6061_v30, %v4018_v9 }
0x10b2   :  { %v4096_v3 = vmul.f32 %v6063_v4, %v4019_v2 }
0x10b3   :  { %6074 = vrcp.f32 %v4145_v56  ;;  %v4091_v0 = vsel %vm4090_vm4, %v4018_v9, %v4089_v31 }
0x10b4   :  { %v6065_v7 = vpop.eup %6064  ;;  %v4094_v41 = vsel %vm4092_vm5, %v4093_v26, %v4091_v0  ;;  %v4098_v60 = vsel %vm4097_vm6, %v4019_v2, %v4096_v3 }
0x10b5   :  { %v6067_v49 = vpop.eup %6066  ;;  %v4146_v13 = vadd.f32 1e-06, %v4094_v41  ;;  %v4101_v12 = vsel %vm4099_vm7, %v4100_v43, %v4098_v60  ;;  %v4103_v20 = vmul.f32 %v6065_v7, %v4020_v36  ;;  %v4185_v41 = vmul.f32 %v8351_v29, %v8294_v58 }
0x10b6   :  { %v4147_v42 = vadd.f32 1e-06, %v4101_v12  ;;  %v4110_v5 = vmul.f32 %v6067_v49, %v4021_v47  ;;  %v4186_v12 = vmul.f32 %v8351_v29, %v8297_v17  ;;  %v4188_v58 = vmul.f32 %v8351_v29, %v8307_v63 }
0x10b7   :  { %6076 = vrcp.f32 %v4146_v13  ;;  %v4105_v38 = vsel %vm4104_vm8, %v4020_v36, %v4103_v20 }
0x10b8   :  { %v6069_v9 = vpop.eup %6068  ;;  %6078 = vrcp.f32 %v4147_v42  ;;  %v4108_v34 = vsel %vm4106_vm9, %v4107_v15, %v4105_v38  ;;  %v4112_v39 = vsel %vm4111_vm10, %v4021_v47, %v4110_v5  ;;  %v4128_v47 = vand.u32 2147483648, %v8392_v6 }
0x10b9   :  { %v6071_v53 = vpop.eup %6070  ;;  %v4148_v2 = vadd.f32 1e-06, %v4108_v34  ;;  %v4115_v37 = vsel %vm4113_vm11, %v4114_v62, %v4112_v39  ;;  %v4117_v19 = vmul.f32 %v6069_v9, %v8390_v45  ;;  %v4189_v34 = vmul.f32 %v8351_v29, %v8314_v16 }
0x10ba   :  { %v4149_v59 = vadd.f32 1e-06, %v4115_v37  ;;  %v4124_v36 = vmul.f32 %v6071_v53, %v8392_v6  ;;  %v4190_v37 = vmul.f32 %v8351_v29, %v8317_v1 }
0x10bb   :  { %6080 = vrcp.f32 %v4148_v2  ;;  %v4119_v52 = vsel %vm4118_vm12, %v8390_v45, %v4117_v19  ;;  %v4135_v45 = vand.u32 2147483648, %v8396_v25 }
0x10bc   :  { %v6073_v27 = vpop.eup %6072  ;;  %6082 = vrcp.f32 %v4149_v59  ;;  %v4122_v55 = vsel %vm4120_vm13, %v4121_v51, %v4119_v52  ;;  %v4126_v30 = vsel %vm4125_vm14, %v8392_v6, %v4124_v36  ;;  %v4184_v6 = vmul.f32 %v8351_v29, %v8289_v11 }
0x10bd   :  { %v4150_v56 = vadd.f32 1e-06, %v4122_v55  ;;  %v4129_v4 = vsel %vm4127_vm15, %v4128_v47, %v4126_v30  ;;  %v4131_v31 = vmul.f32 %v6073_v27, %v8396_v25  ;;  %v4191_v59 = vmul.f32 %v8351_v29, %v8324_v23  ;;  %v4255_v23 = vld [vmem:[%s8538_s11] sm:$0x3] }
0x10be   :  { %v4151_v26 = vadd.f32 1e-06, %v4129_v4 }
0x10bf   :  { %6084 = vrcp.f32 %v4150_v56  ;;  %v4133_v3 = vsel %vm4132_vm1, %v8396_v25, %v4131_v31  ;;  %v4187_v25 = vmul.f32 %v8351_v29, %v8304_v40  ;;  %v8722_v56 = vld [vmem:[#allocation23_spill] sm:$0xff] }
0x10c0   :  { %v6075_v0 = vpop.eup %6074  ;;  %6086 = vrcp.f32 %v4151_v26  ;;  %v4136_v43 = vsel %vm4134_vm2, %v4135_v45, %v4133_v3  ;;  %v8723_v4 = vsub.s32 1, %v8722_v56  ;;  %v8724_v26 = vsub.s32 0, %v8722_v56 }
0x10c1   :  { %v4152_v7 = vadd.f32 1e-06, %v4136_v43  ;;  %v4200_v60 = vmul.f32 %v6075_v0, %v4184_v6 }
0x10c2   :  { %v8446_v31 = vrot.slane %v4255_v23, %v8723_v4  ;;  %v8450_v45 = vrot.slane %v4255_v23, %v8724_v26 }
0x10c3   :  { %6088 = vrcp.f32 %v4152_v7  ;;  %v4223_v42 = vadd.f32 %v8364_v10, %v4200_v60 }
0x10c4   :  { %v6077_v49 = vpop.eup %6076 }
0x10c5   :  { %v6079_v13 = vpop.eup %6078  ;;  %v4201_v20 = vmul.f32 %v6077_v49, %v4185_v41 }
0x10c6   :  { %v4202_v11 = vmul.f32 %v6079_v13, %v4186_v12 }
0x10c7   :  { %v4224_v15 = vadd.f32 %v8364_v10, %v4201_v20 }
0x10c8   :  { %v6081_v5 = vpop.eup %6080  ;;  %v4225_v17 = vadd.f32 %v8364_v10, %v4202_v11 }
0x10c9   :  { %v6083_v38 = vpop.eup %6082  ;;  %v4235_v62 = vpack.c.bf16 %v4224_v15, %v4223_v42  ;;  %v4203_v9 = vmul.f32 %v6081_v5, %v4187_v25 }
0x10ca   :  { %v4204_v39 = vmul.f32 %v6083_v38, %v4188_v58 }
0x10cb   :  { %4420 = vmatmul.mubr.bf16.gmra.mxu0 %v4235_v62  ;;  %v4226_v40 = vadd.f32 %v8364_v10, %v4203_v9 }
0x10cc   :  { %v6085_v53 = vpop.eup %6084  ;;  %4429 = vmatprep.mubr.bf16.mxu0 %v8721_v33  ;;  %v4227_v16 = vadd.f32 %v8364_v10, %v4204_v39 }
0x10cd   :  { %v6087_v2 = vpop.eup %6086  ;;  %v4236_v19 = vpack.c.bf16 %v4226_v40, %v4225_v17  ;;  %v4205_v63 = vmul.f32 %v6085_v53, %v4189_v34 }
0x10ce   :  { %v4206_v36 = vmul.f32 %v6087_v2, %v4190_v37 }
0x10cf   :  { %v4228_v51 = vadd.f32 %v8364_v10, %v4205_v63 }
0x10d0   :  { %v6089_v52 = vpop.eup %6088  ;;  %v4229_v55 = vadd.f32 %v8364_v10, %v4206_v36 }
0x10d1   :  { %v4237_v47 = vpack.c.bf16 %v4228_v51, %v4227_v16  ;;  %v4207_v27 = vmul.f32 %v6089_v52, %v4191_v59 }
0x10d3   :  { %4430 = vmatmul.mubr.bf16.gmra.mxu0 %v4236_v19  ;;  %v4230_v30 = vadd.f32 %v8364_v10, %v4207_v27 }
0x10d4   :  { %4439 = vmatprep.mubr.bf16.mxu0 %v8721_v33 }
0x10d5   :  { %v4238_v1 = vpack.c.bf16 %v4230_v30, %v4229_v55 }
0x10db   :  { %4440 = vmatmul.mubr.bf16.gmra.mxu0 %v4237_v47 }
0x10dc   :  { %4449 = vmatprep.mubr.bf16.mxu0 %v8721_v33 }
0x10e3   :  { %4450 = vmatmul.mubr.bf16.gmra.mxu0 %v4238_v1 }
0x110b   :  { %v4381_v29 = vpop.f32.mrf.mxu0 }
0x110c   :  { %v4382_v43 = vadd.f32 %v4381_v29, %v8450_v45 }
0x110d   :  { %v4383_v10 = vpop.f32.mrf.mxu0 }
0x110e   :  { %v4384_v0 = vadd.f32 %v4383_v10, %v8446_v31  ;;  %v4460_v12 = vmax.f32 %v4382_v43, 0.0 }
0x110f   :  { %v4385_v3 = vpop.f32.mrf.mxu0 }
0x1110   :  { %v4386_v33 = vadd.f32 %v4385_v3, %v8450_v45  ;;  %v4461_v49 = vmax.f32 %v4384_v0, 0.0 }
0x1111   :  { %v4387_v6 = vpop.f32.mrf.mxu0 }
0x1112   :  { %v4388_v7 = vadd.f32 %v4387_v6, %v8446_v31  ;;  %v4462_v41 = vmax.f32 %v4386_v33, 0.0 }
0x1113   :  { %v4391_v60 = vpop.f32.mrf.mxu0 }
0x1114   :  { %v4463_v13 = vmax.f32 %v4388_v7, 0.0  ;;  %v4492_v42 = vpack.c.bf16 %v4462_v41, %v4460_v12  ;;  %v4392_v38 = vadd.f32 %v4391_v60, %v8450_v45 }
0x1115   :  { %v4393_v20 = vpop.f32.mrf.mxu0 }
0x1116   :  { %v4493_v25 = vpack.c.bf16 %v4463_v13, %v4461_v49  ;;  %v4394_v11 = vadd.f32 %v4393_v20, %v8446_v31  ;;  %v4464_v39 = vmax.f32 %v4392_v38, 0.0 }
0x1117   :  { %v4395_v15 = vpop.f32.mrf.mxu0 }
0x1118   :  { %v4396_v5 = vadd.f32 %v4395_v15, %v8450_v45  ;;  %4675 = vmatprep.mubr.bf16.mxu1 %v4493_v25  ;;  %v4465_v17 = vmax.f32 %v4394_v11, 0.0 }
0x1119   :  { %v4397_v58 = vpop.f32.mrf.mxu0  ;;  %4676 = vmatmul.mubr.bf16.vlgmr.msra.gmra.mxu1 %v4492_v42 }
0x111a   :  { %v4398_v62 = vadd.f32 %v4397_v58, %v8446_v31  ;;  %v4466_v9 = vmax.f32 %v4396_v5, 0.0 }
0x111b   :  { %v4401_v34 = vpop.f32.mrf.mxu0 }
0x111c   :  { %v4467_v40 = vmax.f32 %v4398_v62, 0.0  ;;  %v4494_v37 = vpack.c.bf16 %v4466_v9, %v4464_v39  ;;  %v4402_v16 = vadd.f32 %v4401_v34, %v8450_v45 }
0x111d   :  { %v4403_v53 = vpop.f32.mrf.mxu0 }
0x111e   :  { %v4495_v2 = vpack.c.bf16 %v4467_v40, %v4465_v17  ;;  %v4404_v63 = vadd.f32 %v4403_v53, %v8446_v31  ;;  %v4468_v30 = vmax.f32 %v4402_v16, 0.0 }
0x111f   :  { %v4405_v19 = vpop.f32.mrf.mxu0 }
0x1120   :  { %v4406_v59 = vadd.f32 %v4405_v19, %v8450_v45  ;;  %4683 = vmatprep.mubr.bf16.mxu1 %v4495_v2  ;;  %v4469_v27 = vmax.f32 %v4404_v63, 0.0 }
0x1121   :  { %v4407_v51 = vpop.f32.mrf.mxu0  ;;  %4684 = vmatmul.mubr.bf16.gmra.mxu1 %v4494_v37 }
0x1122   :  { %v4408_v36 = vadd.f32 %v4407_v51, %v8446_v31  ;;  %v4470_v52 = vmax.f32 %v4406_v59, 0.0 }
0x1123   :  { %v4411_v47 = vpop.f32.mrf.mxu0 }
0x1124   :  { %v4471_v55 = vmax.f32 %v4408_v36, 0.0  ;;  %v4496_v29 = vpack.c.bf16 %v4470_v52, %v4468_v30  ;;  %v4412_v10 = vadd.f32 %v4411_v47, %v8450_v45 }
0x1125   :  { %v4413_v1 = vpop.f32.mrf.mxu0 }
0x1126   :  { %v4497_v23 = vpack.c.bf16 %v4471_v55, %v4469_v27  ;;  %v4414_v4 = vadd.f32 %v4413_v1, %v8446_v31  ;;  %v4472_v7 = vmax.f32 %v4412_v10, 0.0 }
0x1127   :  { %v4415_v56 = vpop.f32.mrf.mxu0 }
0x1128   :  { %v4416_v26 = vadd.f32 %v4415_v56, %v8450_v45  ;;  %4691 = vmatprep.mubr.bf16.mxu1 %v4497_v23  ;;  %v4473_v43 = vmax.f32 %v4414_v4, 0.0 }
0x1129   :  { %v4417_v3 = vpop.f32.mrf.mxu0  ;;  %4692 = vmatmul.mubr.bf16.gmra.mxu1 %v4496_v29 }
0x112a   :  { %v4418_v0 = vadd.f32 %v4417_v3, %v8446_v31  ;;  %v4474_v33 = vmax.f32 %v4416_v26, 0.0 }
0x112c   :  { %v4475_v6 = vmax.f32 %v4418_v0, 0.0  ;;  %v4498_v60 = vpack.c.bf16 %v4474_v33, %v4472_v7 }
0x112e   :  { %v4499_v41 = vpack.c.bf16 %v4475_v6, %v4473_v43 }
0x1130   :  { %4699 = vmatprep.mubr.bf16.mxu1 %v4499_v41 }
0x1131   :  { %4700 = vmatmul.mubr.bf16.gmra.mxu1 %v4498_v60 }
0x118b   :  { %v4421_v49 = vpop.f32.mrf.mxu0 }
0x118c   :  { %v4422_v42 = vadd.f32 %v4421_v49, %v8450_v45 }
0x118d   :  { %v4423_v13 = vpop.f32.mrf.mxu0 }
0x118e   :  { %v4424_v20 = vadd.f32 %v4423_v13, %v8446_v31  ;;  %v4476_v9 = vmax.f32 %v4422_v42, 0.0 }
0x118f   :  { %v4425_v12 = vpop.f32.mrf.mxu0 }
0x1190   :  { %v4426_v25 = vadd.f32 %v4425_v12, %v8450_v45  ;;  %v4477_v58 = vmax.f32 %v4424_v20, 0.0 }
0x1191   :  { %v4427_v15 = vpop.f32.mrf.mxu0 }
0x1192   :  { %v4428_v11 = vadd.f32 %v4427_v15, %v8446_v31  ;;  %v4478_v5 = vmax.f32 %v4426_v25, 0.0 }
0x1193   :  { %v4431_v38 = vpop.f32.mrf.mxu0 }
0x1194   :  { %v4479_v62 = vmax.f32 %v4428_v11, 0.0  ;;  %v4500_v40 = vpack.c.bf16 %v4478_v5, %v4476_v9  ;;  %v4432_v37 = vadd.f32 %v4431_v38, %v8450_v45 }
0x1195   :  { %v4433_v34 = vpop.f32.mrf.mxu0 }
0x1196   :  { %v4501_v17 = vpack.c.bf16 %v4479_v62, %v4477_v58  ;;  %v4434_v53 = vadd.f32 %v4433_v34, %v8446_v31  ;;  %v4480_v52 = vmax.f32 %v4432_v37, 0.0  ;;  %v8487_v62 = vld [vmem:[%s8540_s13] ss:$0 sm:$0xff]  ;;  %s6316_s13 = smov [#allocation16]  }
0x1197   :  { %v4435_v39 = vpop.f32.mrf.mxu0  ;;  %s4777_s15 = sshll.u32 %s6316_s13, 4  ;;  %s4778_s15 = int_to_ptr.vmem [resolvable:$true] %s4777_s15 }
0x1198   :  { %v4436_v2 = vadd.f32 %v4435_v39, %v8450_v45  ;;  %4707 = vmatprep.mubr.bf16.mxu1 %v4501_v17  ;;  %v4481_v51 = vmax.f32 %v4434_v53, 0.0  ;;  %s6266_s3 = scalar_lea.vmem %s4778_s15, 2048  ;;  %p6271_p13 = scmp.lt.s32.totalorder %s4778_s15, %s4778_s15 }
0x1199   :  { %v4437_v19 = vpop.f32.mrf.mxu0  ;;  %4708 = vmatmul.mubr.bf16.gmra.mxu1 %v4500_v40  ;;  %p6267_p12 = scmp.ne.s32.totalorder %s4778_s15, %s6266_s3  ;;  %p6272_p0 = scmp.lt.s32.totalorder %s6266_s3, %s6266_s3 }
0x119a   :  { %v4438_v63 = vadd.f32 %v4437_v19, %v8446_v31  ;;  %v4482_v59 = vmax.f32 %v4436_v2, 0.0 }
0x119b   :  { %v4441_v16 = vpop.f32.mrf.mxu0  ;;  %p6273_p1 = por %p6272_p0, %p6271_p13 }
0x119c   :  { %v4483_v36 = vmax.f32 %v4438_v63, 0.0  ;;  %v4502_v55 = vpack.c.bf16 %v4482_v59, %v4480_v52  ;;  %v4442_v29 = vadd.f32 %v4441_v16, %v8450_v45 }
0x119d   :  { %v4443_v47 = vpop.f32.mrf.mxu0  ;;  %p6274_p2 = pnand %p6273_p1, %p6267_p12 }
0x119e   :  { %v4503_v27 = vpack.c.bf16 %v4483_v36, %v4481_v51  ;;  %v4444_v1 = vadd.f32 %v4443_v47, %v8446_v31  ;;  %v4484_v33 = vmax.f32 %v4442_v29, 0.0 }
0x119f   :  { %v4445_v30 = vpop.f32.mrf.mxu0 }
0x11a0   :  { %v4446_v23 = vadd.f32 %v4445_v30, %v8450_v45  ;;  %4715 = vmatprep.mubr.bf16.mxu1 %v4503_v27  ;;  %v4485_v3 = vmax.f32 %v4444_v1, 0.0 }
0x11a1   :  { %v4447_v56 = vpop.f32.mrf.mxu0  ;;  %4716 = vmatmul.mubr.bf16.gmra.mxu1 %v4502_v55 }
0x11a2   :  { %v4448_v4 = vadd.f32 %v4447_v56, %v8446_v31  ;;  %v4486_v26 = vmax.f32 %v4446_v23, 0.0 }
0x11a3   :  { %v4451_v10 = vpop.f32.mrf.mxu0 }
0x11a4   :  { %v4487_v0 = vmax.f32 %v4448_v4, 0.0  ;;  %v4504_v7 = vpack.c.bf16 %v4486_v26, %v4484_v33  ;;  %v4452_v13 = vadd.f32 %v4451_v10, %v8450_v45 }
0x11a5   :  { %v4453_v43 = vpop.f32.mrf.mxu0 }
0x11a6   :  { %v4505_v6 = vpack.c.bf16 %v4487_v0, %v4485_v3  ;;  %v4454_v60 = vadd.f32 %v4453_v43, %v8446_v31  ;;  %v4488_v11 = vmax.f32 %v4452_v13, 0.0 }
0x11a7   :  { %v4455_v41 = vpop.f32.mrf.mxu0 }
0x11a8   :  { %v4456_v49 = vadd.f32 %v4455_v41, %v8450_v45  ;;  %4723 = vmatprep.mubr.bf16.mxu1 %v4505_v6  ;;  %v4489_v42 = vmax.f32 %v4454_v60, 0.0 }
0x11a9   :  { %v4457_v12 = vpop.f32.mrf.mxu0  ;;  %4724 = vmatmul.mubr.bf16.gmra.mxu1 %v4504_v7 }
0x11aa   :  { %v4458_v20 = vadd.f32 %v4457_v12, %v8446_v31  ;;  %v4490_v25 = vmax.f32 %v4456_v49, 0.0 }
0x11ac   :  { %v4491_v15 = vmax.f32 %v4458_v20, 0.0  ;;  %v4506_v38 = vpack.c.bf16 %v4490_v25, %v4488_v11 }
0x11ae   :  { %v4507_v5 = vpack.c.bf16 %v4491_v15, %v4489_v42 }
0x11b0   :  { %4731 = vmatprep.mubr.bf16.mxu1 %v4507_v5 }
0x11b1   :  { %4732 = vmatmul.mubr.bf16.gmra.mxu1 %v4506_v38 }
0x11d9   :  { %v5159_v58 = vpop.f32.mrf.mxu1 }
0x11db   :  { %v5160_v9 = vpop.f32.mrf.mxu1 }
0x11dc   :  { %v5161_v45 = vadd.f32 %v5160_v9, %v5159_v58 }
0x11dd   :  { %v5162_v34 = vpop.f32.mrf.mxu1 }
0x11de   :  { %v4678_v17 = vadd.f32 %v5161_v45, %v8487_v62 }
0x11df   :  { %v5163_v31 = vpop.f32.mrf.mxu1 }
0x11e0   :  { %v4740_v40 = vadd.f32 %v4678_v17, %v8173_v50  ;;  %v5164_v39 = vadd.f32 %v5163_v31, %v5162_v34 }
0x11e1   :  { %v5165_v53 = vpop.f32.mrf.mxu1 }
0x11e2   :  { %4756 = vst [vmem:[#allocation16] sm:$0xff] %v4740_v40  ;;  %v4681_v2 = vadd.f32 %v5164_v39, %v8487_v62 }
0x11e3   :  { %v5166_v37 = vpop.f32.mrf.mxu1 }
0x11e4   :  { %v4741_v19 = vadd.f32 %v4681_v2, %v8181_v57  ;;  %v5167_v63 = vadd.f32 %v5166_v37, %v5165_v53 }
0x11e5   :  { %v5168_v59 = vpop.f32.mrf.mxu1 }
0x11e6   :  { %4757 = vst [vmem:[#allocation16 + $0x8] sm:$0xff] %v4741_v19  ;;  %v4686_v16 = vadd.f32 %v5167_v63, %v8487_v62 }
0x11e7   :  { %v5169_v51 = vpop.f32.mrf.mxu1 }
0x11e8   :  { %v4742_v36 = vadd.f32 %v4686_v16, %v8178_v18  ;;  %v5170_v52 = vadd.f32 %v5169_v51, %v5168_v59 }
0x11e9   :  { %v5171_v47 = vpop.f32.mrf.mxu1 }
0x11ea   :  { %4758 = vst [vmem:[#allocation16 + $0x10] sm:$0xff] %v4742_v36  ;;  %v4689_v50 = vadd.f32 %v5170_v52, %v8487_v62 }
0x11eb   :  { %v5172_v27 = vpop.f32.mrf.mxu1 }
0x11ec   :  { %v4743_v55 = vadd.f32 %v4689_v50, %v8189_v14  ;;  %v5173_v30 = vadd.f32 %v5172_v27, %v5171_v47 }
0x11ed   :  { %v5174_v1 = vpop.f32.mrf.mxu1 }
0x11ee   :  { %4759 = vst [vmem:[#allocation16 + $0x18] sm:$0xff] %v4743_v55  ;;  %v4694_v57 = vadd.f32 %v5173_v30, %v8487_v62 }
0x11ef   :  { %v5175_v23 = vpop.f32.mrf.mxu1 }
0x11f0   :  { %v4744_v29 = vadd.f32 %v4694_v57, %v8193_v54  ;;  %v5176_v56 = vadd.f32 %v5175_v23, %v5174_v1 }
0x11f1   :  { %v5177_v4 = vpop.f32.mrf.mxu1 }
0x11f2   :  { %4760 = vst [vmem:[#allocation16 + $0x20] sm:$0xff] %v4744_v29  ;;  %v4697_v18 = vadd.f32 %v5176_v56, %v8487_v62 }
0x11f3   :  { %v5178_v26 = vpop.f32.mrf.mxu1 }
0x11f4   :  { %v4745_v10 = vadd.f32 %v4697_v18, %v8196_v44  ;;  %v5179_v3 = vadd.f32 %v5178_v26, %v5177_v4 }
0x11f5   :  { %v5180_v0 = vpop.f32.mrf.mxu1 }
0x11f6   :  { %4761 = vst [vmem:[#allocation16 + $0x28] sm:$0xff] %v4745_v10  ;;  %v4702_v14 = vadd.f32 %v5179_v3, %v8487_v62 }
0x11f7   :  { %v5181_v33 = vpop.f32.mrf.mxu1 }
0x11f8   :  { %v4746_v43 = vadd.f32 %v4702_v14, %v8201_v22  ;;  %v5182_v6 = vadd.f32 %v5181_v33, %v5180_v0 }
0x11fa   :  { %4762 = vst [vmem:[#allocation16 + $0x30] sm:$0xff] %v4746_v43  ;;  %v4705_v54 = vadd.f32 %v5182_v6, %v8487_v62 }
0x11fc   :  { %v4747_v7 = vadd.f32 %v4705_v54, %v8204_v8 }
0x11fe   :  { %4763 = vst [vmem:[#allocation16 + $0x38] sm:$0xff] %v4747_v7 }
0x1259   :  { %v5183_v41 = vpop.f32.mrf.mxu1 }
0x125b   :  { %v5184_v60 = vpop.f32.mrf.mxu1 }
0x125c   :  { %v5185_v49 = vadd.f32 %v5184_v60, %v5183_v41 }
0x125d   :  { %v5186_v13 = vpop.f32.mrf.mxu1 }
0x125e   :  { %v4710_v44 = vadd.f32 %v5185_v49, %v8487_v62 }
0x125f   :  { %v5187_v12 = vpop.f32.mrf.mxu1 }
0x1260   :  { %v4748_v20 = vadd.f32 %v4710_v44, %v8213_v46  ;;  %v5188_v25 = vadd.f32 %v5187_v12, %v5186_v13 }
0x1261   :  { %v5189_v42 = vpop.f32.mrf.mxu1 }
0x1262   :  { %4764 = vst [vmem:[#allocation16 + $0x40] sm:$0xff] %v4748_v20  ;;  %v4713_v22 = vadd.f32 %v5188_v25, %v8487_v62 }
0x1263   :  { %v5190_v15 = vpop.f32.mrf.mxu1 }
0x1264   :  { %v4749_v11 = vadd.f32 %v4713_v22, %v8222_v61  ;;  %v5191_v5 = vadd.f32 %v5190_v15, %v5189_v42 }
0x1265   :  { %v5192_v8 = vpop.f32.mrf.mxu1 }
0x1266   :  { %4765 = vst [vmem:[#allocation16 + $0x48] sm:$0xff] %v4749_v11  ;;  %v4718_v38 = vadd.f32 %v5191_v5, %v8487_v62 }
0x1267   :  { %v5193_v58 = vpop.f32.mrf.mxu1 }
0x1268   :  { %v4750_v9 = vadd.f32 %v4718_v38, %v8219_v21  ;;  %v5194_v45 = vadd.f32 %v5193_v58, %v5192_v8 }
0x1269   :  { %v5195_v34 = vpop.f32.mrf.mxu1 }
0x126a   :  { %4766 = vst [vmem:[#allocation16 + $0x50] sm:$0xff] %v4750_v9  ;;  %v4721_v46 = vadd.f32 %v5194_v45, %v8487_v62 }
0x126b   :  { %v5196_v17 = vpop.f32.mrf.mxu1 }
0x126c   :  { %v4751_v31 = vadd.f32 %v4721_v46, %v8227_v28  ;;  %v5197_v40 = vadd.f32 %v5196_v17, %v5195_v34 }
0x126d   :  { %v5198_v39 = vpop.f32.mrf.mxu1 }
0x126e   :  { %4767 = vst [vmem:[#allocation16 + $0x58] sm:$0xff] %v4751_v31  ;;  %v4726_v61 = vadd.f32 %v5197_v40, %v8487_v62 }
0x126f   :  { %v5199_v53 = vpop.f32.mrf.mxu1 }
0x1270   :  { %v4752_v2 = vadd.f32 %v4726_v61, %v8232_v35  ;;  %v5200_v37 = vadd.f32 %v5199_v53, %v5198_v39 }
0x1271   :  { %v5201_v19 = vpop.f32.mrf.mxu1 }
0x1272   :  { %4768 = vst [vmem:[#allocation16 + $0x60] sm:$0xff] %v4752_v2  ;;  %v4729_v21 = vadd.f32 %v5200_v37, %v8487_v62 }
0x1273   :  { %v5202_v63 = vpop.f32.mrf.mxu1 }
0x1274   :  { %v4753_v59 = vadd.f32 %v4729_v21, %v8243_v24  ;;  %v5203_v16 = vadd.f32 %v5202_v63, %v5201_v19 }
0x1275   :  { %v5204_v51 = vpop.f32.mrf.mxu1 }
0x1276   :  { %4769 = vst [vmem:[#allocation16 + $0x68] sm:$0xff] %v4753_v59  ;;  %v4734_v28 = vadd.f32 %v5203_v16, %v8487_v62 }
0x1277   :  { %v5205_v36 = vpop.f32.mrf.mxu1 }
0x1278   :  { %v4754_v52 = vadd.f32 %v4734_v28, %v8240_v48  ;;  %v5206_v47 = vadd.f32 %v5205_v36, %v5204_v51 }
0x127a   :  { %4770 = vst [vmem:[#allocation16 + $0x70] sm:$0xff] %v4754_v52  ;;  %v4737_v35 = vadd.f32 %v5206_v47, %v8487_v62 }
0x127c   :  { %v4755_v50 = vadd.f32 %v4737_v35, %v8254_v32 }
0x127e   :  { %4771 = vst [vmem:[#allocation16 + $0x78] sm:$0xff] %v4755_v50 }
0x127f   :  { %6277 = shalt.err (!%p6274_p2)
}
0x1280   :  { %4783 = dma.vmem_to_hbm [thread:$0]  %s4778_s15, 2048, %s8541_s14, [#allocation4], %s6300_s18, %s6300_s18, %s6301_s19  }
0x1281   :  { %6296 = dma.done.wait [#allocation4], 2048  }
0x1282   :  { %6297 = vsyncadd [#allocation4], 4294965248 }
0x1283   :  { %4787 = vsyncpa [#allocation3], 1 }
0x1284   :  { %4788 = vsyncpa [#allocation6], 1 }
0x1285   :  { %4789 = vsyncpa [#allocation9], 1 }
0x1286   :  { %4790 = vsyncpa [#allocation12], 1 }
0x1287   :  { %4791 = vsyncpa [#allocation15], 1 }
0x1288   :  { %4792 = vsyncpa [#allocation4], 1 }

</bundles_post_ra>
